<compile_context>
chip_gen: v5e
topology: v5e:2x2
jax: 0.10.0
libtpu: 0.0.40
codegen_flags: <defaults>
</compile_context>

<pallas_src>
import functools

import jax
import jax.numpy as jnp
from jax.experimental import pallas as pl
from jax.experimental.pallas import tpu as pltpu

EPS = 1e-5        # nn.InstanceNorm2d default eps (affine=False, no running stats)
_MXU_MIN_C = 16   # below this the (C,C)x(C,HW) matmuls run as VPU FMAs instead


# ---------------------------------------------------------------------------
# Fused Pallas kernel: both convs + IN + ReLU + residual, one image per step.
# ---------------------------------------------------------------------------
def _resnet_block_kernel(col_ref, x_ref, w1_ref, w2_ref, o_ref, xe_ref, *, W):
  """col_ref: (1, HW) int32 column index of every flattened spatial position.
  x_ref : (1, C, HW) f32, channel-major (HW on the lane axis).
  w*_ref: (9, C, C)  f32, spectral-normalized taps, index [ky*3+kx, c_out, c_in].
  o_ref : (1, C, HW) f32.
  xe_ref: (C, HW + 2W + 2) VMEM scratch: image + reflected top/bottom rows.
  """
  C, HW = x_ref.shape[1], x_ref.shape[2]
  B = W + 1                                    # lane offset of pixel (0, 0) in scratch

  x = x_ref[0]                                 # (C, HW)

  col = jnp.broadcast_to(col_ref[0:1, :], (C, HW))
  left_m = col == 0
  right_m = col == W - 1

  def load_padded(a):
    # Write `a` plus reflected top/bottom rows so every vertical tap is a
    # contiguous lane slice of the scratch.
    xe_ref[:, B:B + HW] = a
    xe_ref[:, B - W:B] = xe_ref[:, B + W:B + 2 * W]                      # row 1
    xe_ref[:, B + HW:B + HW + W] = xe_ref[:, B + HW - 2 * W:B + HW - W]  # row H-2

  def tap(oy, ox):
    # a[reflect(h+oy), reflect(w+ox)] at every flattened position h*W + w.
    off = B + oy * W + ox
    main = xe_ref[:, off:off + HW]
    if ox == 0:
      return main
    fix = xe_ref[:, off - 2 * ox:off - 2 * ox + HW]      # horizontal reflection
    return jnp.where(right_m if ox > 0 else left_m, fix, main)

  def conv3x3(a, w_ref):
    load_padded(a)
    acc = jnp.zeros((C, HW), jnp.float32)
    for oy in (-1, 0, 1):
      for ox in (-1, 0, 1):
        p = tap(oy, ox)                                  # (C_in, HW)
        wk = w_ref[(oy + 1) * 3 + (ox + 1)]              # (C_out, C_in)
        if C < _MXU_MIN_C:
          for ci in range(C):                            # lane-dense VPU FMAs
            acc = acc + wk[:, ci:ci + 1] * p[ci:ci + 1, :]
        else:
          acc = acc + jnp.dot(wk, p, preferred_element_type=jnp.float32)
    return acc        # conv bias omitted: exactly cancelled by affine-free IN

  def instance_norm(y):
    mean = jnp.mean(y, axis=1, keepdims=True)                      # per channel
    var = jnp.mean(jnp.square(y - mean), axis=1, keepdims=True)    # biased, like PyTorch
    return (y - mean) * jax.lax.rsqrt(var + EPS)

  h1 = jnp.maximum(instance_norm(conv3x3(x, w1_ref)), 0.0)   # h1 stays on-chip
  y2 = instance_norm(conv3x3(h1, w2_ref))
  o_ref[0] = (x + y2).astype(o_ref.dtype)


# ---------------------------------------------------------------------------
# Plain-JAX parameter prep: 1-iteration spectral norm (as PyTorch does/forward)
# ---------------------------------------------------------------------------
def spectral_normalize(w, n_power_iterations=1):
  """w / sigma_max(w) via power iteration on w.reshape(C_out, -1).

  TODO(synk): PyTorch SpectralNorm keeps a persistent randomly-initialized `u`
  updated in place each forward; a deterministic `u` stand-in is used here.
  """
  c_out = w.shape[0]
  wm = w.reshape(c_out, -1).astype(jnp.float32)
  u = jnp.ones((c_out,), jnp.float32) / jnp.sqrt(jnp.float32(c_out))
  v = None
  for _ in range(n_power_iterations):
    v = wm.T @ u
    v = v / (jnp.linalg.norm(v) + 1e-12)
    u = wm @ v
    u = u / (jnp.linalg.norm(u) + 1e-12)
  sigma = u @ (wm @ v)
  return w / sigma


# ---------------------------------------------------------------------------
# Full ResnetBlock forward
# ---------------------------------------------------------------------------
@jax.jit
def resnet_block(x_nchw, w1, b1, w2, b2):
  """x_nchw: (N, C, H, W) f32; conv weights (C, C, 3, 3); biases (C,)."""
  # The conv biases are exactly cancelled by InstanceNorm's per-channel mean
  # subtraction (affine=False), so they are intentionally unused.
  del b1, b2
  n, c, h, w = x_nchw.shape
  hw = h * w

  # Spectral-normalized taps, layout [ky*3+kx, c_out, c_in].
  wk1 = jnp.transpose(spectral_normalize(w1), (2, 3, 0, 1)).reshape(9, c, c)
  wk2 = jnp.transpose(spectral_normalize(w2), (2, 3, 0, 1)).reshape(9, c, c)

  # Channel-major, lane-dense activations: free reshape of NCHW, no transposes.
  x_flat = x_nchw.reshape(n, c, hw).astype(jnp.float32)

  # Column index of every flattened spatial position (for reflection selects).
  col_idx = (jnp.arange(hw, dtype=jnp.int32) % w).reshape(1, hw)

  kernel = functools.partial(_resnet_block_kernel, W=w)
  out_flat = pl.pallas_call(
      kernel,
      out_shape=jax.ShapeDtypeStruct((n, c, hw), jnp.float32),
      grid=(n,),
      in_specs=[
          pl.BlockSpec((1, hw), lambda i: (0, 0)),        # col_idx (replicated)
          pl.BlockSpec((1, c, hw), lambda i: (i, 0, 0)),  # image i
          pl.BlockSpec((9, c, c), lambda i: (0, 0, 0)),   # conv1 taps
          pl.BlockSpec((9, c, c), lambda i: (0, 0, 0)),   # conv2 taps
      ],
      out_specs=pl.BlockSpec((1, c, hw), lambda i: (i, 0, 0)),
      scratch_shapes=[pltpu.VMEM((c, hw + 2 * w + 2), jnp.float32)],
      compiler_params=pltpu.CompilerParams(
          dimension_semantics=("parallel",)),             # batch across v7x's 2 TCs
  )(col_idx, x_flat, wk1, wk2)

  return out_flat.reshape(n, c, h, w)


# ---------------------------------------------------------------------------
if __name__ == "__main__":
  N, C, H, W = 2, 4, 16, 16  # dim = C = 4, use_bias = True
  key = jax.random.PRNGKey(0)
  kx, kw1, kb1, kw2, kb2 = jax.random.split(key, 5)

  x = jax.random.normal(kx, (N, C, H, W), jnp.float32)
  w1 = jax.random.normal(kw1, (C, C, 3, 3), jnp.float32) * 0.2
  b1 = jax.random.normal(kb1, (C,), jnp.float32) * 0.1
  w2 = jax.random.normal(kw2, (C, C, 3, 3), jnp.float32) * 0.2
  b2 = jax.random.normal(kb2, (C,), jnp.float32) * 0.1

  out = jax.block_until_ready(resnet_block(x, w1, b1, w2, b2))
  assert out.shape == (N, C, H, W) and out.dtype == jnp.float32
  assert bool(jnp.all(jnp.isfinite(out)))
  print("KERNEL_OK")
</pallas_src>

<mosaic_0001>
module attributes {stable_mosaic.version = 11 : i64} {
  func.func @_resnet_block_kernel(%arg0: i32, %arg1: memref<1x256xi32, #tpu.memory_space<vmem>>, %arg2: memref<1x4x256xf32, #tpu.memory_space<vmem>>, %arg3: memref<9x4x4xf32, #tpu.memory_space<vmem>>, %arg4: memref<9x4x4xf32, #tpu.memory_space<vmem>>, %arg5: memref<1x4x256xf32, #tpu.memory_space<vmem>>, %arg6: memref<4x290xf32, #tpu.memory_space<vmem>>) attributes {dimension_semantics = [#tpu.dimension_semantics<parallel>], iteration_bounds = array<i64: 2>, scalar_prefetch = 0 : i64, scratch_operands = 1 : i64, tpu.core_type = #tpu.core_type<tc>, window_params = [{pipeline_mode = #tpu.pipeline_mode<synchronous>, transform_indices = @transform_0, window_bounds = array<i64: 1, 256>}, {transform_indices = @transform_1, window_bounds = array<i64: 1, 4, 256>}, {pipeline_mode = #tpu.pipeline_mode<synchronous>, transform_indices = @transform_2, window_bounds = array<i64: 9, 4, 4>}, {pipeline_mode = #tpu.pipeline_mode<synchronous>, transform_indices = @transform_3, window_bounds = array<i64: 9, 4, 4>}, {transform_indices = @transform_4, window_bounds = array<i64: 1, 4, 256>}]} {
    %c0 = arith.constant 0 : index
    %c0_0 = arith.constant 0 : index
    %c0_1 = arith.constant 0 : index
    %0 = vector.load %arg2[%c0, %c0_0, %c0_1] : memref<1x4x256xf32, #tpu.memory_space<vmem>>, vector<1x4x256xf32>
    %1 = vector.shape_cast %0 : vector<1x4x256xf32> to vector<4x256xf32>
    %c0_2 = arith.constant 0 : index
    %c0_3 = arith.constant 0 : index
    %2 = vector.load %arg1[%c0_2, %c0_3] : memref<1x256xi32, #tpu.memory_space<vmem>>, vector<1x256xi32>
    %3 = vector.shape_cast %2 : vector<1x256xi32> to vector<1x256xi32>
    %4 = vector.broadcast %3 : vector<1x256xi32> to vector<4x256xi32>
    %c0_i32 = arith.constant 0 : i32
    %5 = vector.broadcast %c0_i32 : i32 to vector<4x256xi32>
    %6 = arith.cmpi eq, %4, %5 : vector<4x256xi32>
    %c15_i32 = arith.constant 15 : i32
    %7 = vector.broadcast %c15_i32 : i32 to vector<4x256xi32>
    %8 = arith.cmpi eq, %4, %7 : vector<4x256xi32>
    %c0_4 = arith.constant 0 : index
    %c17 = arith.constant 17 : index
    %9 = vector.load %arg6[%c0_4, %c17] : memref<4x290xf32, #tpu.memory_space<vmem>>, vector<4x256xf32>
    tpu.vector_store %arg6[%c0_4, %c17], %1 {strides = array<i32>} : memref<4x290xf32, #tpu.memory_space<vmem>>, vector<4x256xf32>,
    %c0_5 = arith.constant 0 : index
    %c33 = arith.constant 33 : index
    %10 = vector.load %arg6[%c0_5, %c33] : memref<4x290xf32, #tpu.memory_space<vmem>>, vector<4x16xf32>
    %c0_6 = arith.constant 0 : index
    %c1 = arith.constant 1 : index
    %11 = vector.load %arg6[%c0_6, %c1] : memref<4x290xf32, #tpu.memory_space<vmem>>, vector<4x16xf32>
    tpu.vector_store %arg6[%c0_6, %c1], %10 {strides = array<i32>} : memref<4x290xf32, #tpu.memory_space<vmem>>, vector<4x16xf32>,
    %c0_7 = arith.constant 0 : index
    %c241 = arith.constant 241 : index
    %12 = vector.load %arg6[%c0_7, %c241] : memref<4x290xf32, #tpu.memory_space<vmem>>, vector<4x16xf32>
    %c0_8 = arith.constant 0 : index
    %c273 = arith.constant 273 : index
    %13 = vector.load %arg6[%c0_8, %c273] : memref<4x290xf32, #tpu.memory_space<vmem>>, vector<4x16xf32>
    tpu.vector_store %arg6[%c0_8, %c273], %12 {strides = array<i32>} : memref<4x290xf32, #tpu.memory_space<vmem>>, vector<4x16xf32>,
    %cst = arith.constant 0.000000e+00 : f32
    %14 = vector.broadcast %cst : f32 to vector<4x256xf32>
    %c0_9 = arith.constant 0 : index
    %c0_10 = arith.constant 0 : index
    %15 = vector.load %arg6[%c0_9, %c0_10] : memref<4x290xf32, #tpu.memory_space<vmem>>, vector<4x256xf32>
    %c0_11 = arith.constant 0 : index
    %c2 = arith.constant 2 : index
    %16 = vector.load %arg6[%c0_11, %c2] : memref<4x290xf32, #tpu.memory_space<vmem>>, vector<4x256xf32>
    %17 = arith.select %6, %16, %15 : vector<4x256xi1>, vector<4x256xf32>
    %c0_12 = arith.constant 0 : index
    %c0_13 = arith.constant 0 : index
    %c0_14 = arith.constant 0 : index
    %18 = vector.load %arg3[%c0_12, %c0_13, %c0_14] : memref<9x4x4xf32, #tpu.memory_space<vmem>>, vector<1x4x4xf32>
    %19 = vector.shape_cast %18 : vector<1x4x4xf32> to vector<4x4xf32>
    %20 = vector.extract_strided_slice %19 {offsets = [0, 0], sizes = [4, 1], strides = [1, 1]} : vector<4x4xf32> to vector<4x1xf32>
    %21 = vector.extract_strided_slice %17 {offsets = [0, 0], sizes = [1, 256], strides = [1, 1]} : vector<4x256xf32> to vector<1x256xf32>
    %22 = vector.broadcast %20 : vector<4x1xf32> to vector<4x256xf32>
    %23 = vector.broadcast %21 : vector<1x256xf32> to vector<4x256xf32>
    %24 = arith.mulf %22, %23 : vector<4x256xf32>
    %25 = arith.addf %14, %24 : vector<4x256xf32>
    %26 = vector.extract_strided_slice %19 {offsets = [0, 1], sizes = [4, 1], strides = [1, 1]} : vector<4x4xf32> to vector<4x1xf32>
    %27 = vector.extract_strided_slice %17 {offsets = [1, 0], sizes = [1, 256], strides = [1, 1]} : vector<4x256xf32> to vector<1x256xf32>
    %28 = vector.broadcast %26 : vector<4x1xf32> to vector<4x256xf32>
    %29 = vector.broadcast %27 : vector<1x256xf32> to vector<4x256xf32>
    %30 = arith.mulf %28, %29 : vector<4x256xf32>
    %31 = arith.addf %25, %30 : vector<4x256xf32>
    %32 = vector.extract_strided_slice %19 {offsets = [0, 2], sizes = [4, 1], strides = [1, 1]} : vector<4x4xf32> to vector<4x1xf32>
    %33 = vector.extract_strided_slice %17 {offsets = [2, 0], sizes = [1, 256], strides = [1, 1]} : vector<4x256xf32> to vector<1x256xf32>
    %34 = vector.broadcast %32 : vector<4x1xf32> to vector<4x256xf32>
    %35 = vector.broadcast %33 : vector<1x256xf32> to vector<4x256xf32>
    %36 = arith.mulf %34, %35 : vector<4x256xf32>
    %37 = arith.addf %31, %36 : vector<4x256xf32>
    %38 = vector.extract_strided_slice %19 {offsets = [0, 3], sizes = [4, 1], strides = [1, 1]} : vector<4x4xf32> to vector<4x1xf32>
    %39 = vector.extract_strided_slice %17 {offsets = [3, 0], sizes = [1, 256], strides = [1, 1]} : vector<4x256xf32> to vector<1x256xf32>
    %40 = vector.broadcast %38 : vector<4x1xf32> to vector<4x256xf32>
    %41 = vector.broadcast %39 : vector<1x256xf32> to vector<4x256xf32>
    %42 = arith.mulf %40, %41 : vector<4x256xf32>
    %43 = arith.addf %37, %42 : vector<4x256xf32>
    %c0_15 = arith.constant 0 : index
    %c1_16 = arith.constant 1 : index
    %44 = vector.load %arg6[%c0_15, %c1_16] : memref<4x290xf32, #tpu.memory_space<vmem>>, vector<4x256xf32>
    %c1_17 = arith.constant 1 : index
    %c0_18 = arith.constant 0 : index
    %c0_19 = arith.constant 0 : index
    %45 = vector.load %arg3[%c1_17, %c0_18, %c0_19] : memref<9x4x4xf32, #tpu.memory_space<vmem>>, vector<1x4x4xf32>
    %46 = vector.shape_cast %45 : vector<1x4x4xf32> to vector<4x4xf32>
    %47 = vector.extract_strided_slice %46 {offsets = [0, 0], sizes = [4, 1], strides = [1, 1]} : vector<4x4xf32> to vector<4x1xf32>
    %48 = vector.extract_strided_slice %44 {offsets = [0, 0], sizes = [1, 256], strides = [1, 1]} : vector<4x256xf32> to vector<1x256xf32>
    %49 = vector.broadcast %47 : vector<4x1xf32> to vector<4x256xf32>
    %50 = vector.broadcast %48 : vector<1x256xf32> to vector<4x256xf32>
    %51 = arith.mulf %49, %50 : vector<4x256xf32>
    %52 = arith.addf %43, %51 : vector<4x256xf32>
    %53 = vector.extract_strided_slice %46 {offsets = [0, 1], sizes = [4, 1], strides = [1, 1]} : vector<4x4xf32> to vector<4x1xf32>
    %54 = vector.extract_strided_slice %44 {offsets = [1, 0], sizes = [1, 256], strides = [1, 1]} : vector<4x256xf32> to vector<1x256xf32>
    %55 = vector.broadcast %53 : vector<4x1xf32> to vector<4x256xf32>
    %56 = vector.broadcast %54 : vector<1x256xf32> to vector<4x256xf32>
    %57 = arith.mulf %55, %56 : vector<4x256xf32>
    %58 = arith.addf %52, %57 : vector<4x256xf32>
    %59 = vector.extract_strided_slice %46 {offsets = [0, 2], sizes = [4, 1], strides = [1, 1]} : vector<4x4xf32> to vector<4x1xf32>
    %60 = vector.extract_strided_slice %44 {offsets = [2, 0], sizes = [1, 256], strides = [1, 1]} : vector<4x256xf32> to vector<1x256xf32>
    %61 = vector.broadcast %59 : vector<4x1xf32> to vector<4x256xf32>
    %62 = vector.broadcast %60 : vector<1x256xf32> to vector<4x256xf32>
    %63 = arith.mulf %61, %62 : vector<4x256xf32>
    %64 = arith.addf %58, %63 : vector<4x256xf32>
    %65 = vector.extract_strided_slice %46 {offsets = [0, 3], sizes = [4, 1], strides = [1, 1]} : vector<4x4xf32> to vector<4x1xf32>
    %66 = vector.extract_strided_slice %44 {offsets = [3, 0], sizes = [1, 256], strides = [1, 1]} : vector<4x256xf32> to vector<1x256xf32>
    %67 = vector.broadcast %65 : vector<4x1xf32> to vector<4x256xf32>
    %68 = vector.broadcast %66 : vector<1x256xf32> to vector<4x256xf32>
    %69 = arith.mulf %67, %68 : vector<4x256xf32>
    %70 = arith.addf %64, %69 : vector<4x256xf32>
    %c0_20 = arith.constant 0 : index
    %c2_21 = arith.constant 2 : index
    %71 = vector.load %arg6[%c0_20, %c2_21] : memref<4x290xf32, #tpu.memory_space<vmem>>, vector<4x256xf32>
    %c0_22 = arith.constant 0 : index
    %c0_23 = arith.constant 0 : index
    %72 = vector.load %arg6[%c0_22, %c0_23] : memref<4x290xf32, #tpu.memory_space<vmem>>, vector<4x256xf32>
    %73 = arith.select %8, %72, %71 : vector<4x256xi1>, vector<4x256xf32>
    %c2_24 = arith.constant 2 : index
    %c0_25 = arith.constant 0 : index
    %c0_26 = arith.constant 0 : index
    %74 = vector.load %arg3[%c2_24, %c0_25, %c0_26] : memref<9x4x4xf32, #tpu.memory_space<vmem>>, vector<1x4x4xf32>
    %75 = vector.shape_cast %74 : vector<1x4x4xf32> to vector<4x4xf32>
    %76 = vector.extract_strided_slice %75 {offsets = [0, 0], sizes = [4, 1], strides = [1, 1]} : vector<4x4xf32> to vector<4x1xf32>
    %77 = vector.extract_strided_slice %73 {offsets = [0, 0], sizes = [1, 256], strides = [1, 1]} : vector<4x256xf32> to vector<1x256xf32>
    %78 = vector.broadcast %76 : vector<4x1xf32> to vector<4x256xf32>
    %79 = vector.broadcast %77 : vector<1x256xf32> to vector<4x256xf32>
    %80 = arith.mulf %78, %79 : vector<4x256xf32>
    %81 = arith.addf %70, %80 : vector<4x256xf32>
    %82 = vector.extract_strided_slice %75 {offsets = [0, 1], sizes = [4, 1], strides = [1, 1]} : vector<4x4xf32> to vector<4x1xf32>
    %83 = vector.extract_strided_slice %73 {offsets = [1, 0], sizes = [1, 256], strides = [1, 1]} : vector<4x256xf32> to vector<1x256xf32>
    %84 = vector.broadcast %82 : vector<4x1xf32> to vector<4x256xf32>
    %85 = vector.broadcast %83 : vector<1x256xf32> to vector<4x256xf32>
    %86 = arith.mulf %84, %85 : vector<4x256xf32>
    %87 = arith.addf %81, %86 : vector<4x256xf32>
    %88 = vector.extract_strided_slice %75 {offsets = [0, 2], sizes = [4, 1], strides = [1, 1]} : vector<4x4xf32> to vector<4x1xf32>
    %89 = vector.extract_strided_slice %73 {offsets = [2, 0], sizes = [1, 256], strides = [1, 1]} : vector<4x256xf32> to vector<1x256xf32>
    %90 = vector.broadcast %88 : vector<4x1xf32> to vector<4x256xf32>
    %91 = vector.broadcast %89 : vector<1x256xf32> to vector<4x256xf32>
    %92 = arith.mulf %90, %91 : vector<4x256xf32>
    %93 = arith.addf %87, %92 : vector<4x256xf32>
    %94 = vector.extract_strided_slice %75 {offsets = [0, 3], sizes = [4, 1], strides = [1, 1]} : vector<4x4xf32> to vector<4x1xf32>
    %95 = vector.extract_strided_slice %73 {offsets = [3, 0], sizes = [1, 256], strides = [1, 1]} : vector<4x256xf32> to vector<1x256xf32>
    %96 = vector.broadcast %94 : vector<4x1xf32> to vector<4x256xf32>
    %97 = vector.broadcast %95 : vector<1x256xf32> to vector<4x256xf32>
    %98 = arith.mulf %96, %97 : vector<4x256xf32>
    %99 = arith.addf %93, %98 : vector<4x256xf32>
    %c0_27 = arith.constant 0 : index
    %c16 = arith.constant 16 : index
    %100 = vector.load %arg6[%c0_27, %c16] : memref<4x290xf32, #tpu.memory_space<vmem>>, vector<4x256xf32>
    %c0_28 = arith.constant 0 : index
    %c18 = arith.constant 18 : index
    %101 = vector.load %arg6[%c0_28, %c18] : memref<4x290xf32, #tpu.memory_space<vmem>>, vector<4x256xf32>
    %102 = arith.select %6, %101, %100 : vector<4x256xi1>, vector<4x256xf32>
    %c3 = arith.constant 3 : index
    %c0_29 = arith.constant 0 : index
    %c0_30 = arith.constant 0 : index
    %103 = vector.load %arg3[%c3, %c0_29, %c0_30] : memref<9x4x4xf32, #tpu.memory_space<vmem>>, vector<1x4x4xf32>
    %104 = vector.shape_cast %103 : vector<1x4x4xf32> to vector<4x4xf32>
    %105 = vector.extract_strided_slice %104 {offsets = [0, 0], sizes = [4, 1], strides = [1, 1]} : vector<4x4xf32> to vector<4x1xf32>
    %106 = vector.extract_strided_slice %102 {offsets = [0, 0], sizes = [1, 256], strides = [1, 1]} : vector<4x256xf32> to vector<1x256xf32>
    %107 = vector.broadcast %105 : vector<4x1xf32> to vector<4x256xf32>
    %108 = vector.broadcast %106 : vector<1x256xf32> to vector<4x256xf32>
    %109 = arith.mulf %107, %108 : vector<4x256xf32>
    %110 = arith.addf %99, %109 : vector<4x256xf32>
    %111 = vector.extract_strided_slice %104 {offsets = [0, 1], sizes = [4, 1], strides = [1, 1]} : vector<4x4xf32> to vector<4x1xf32>
    %112 = vector.extract_strided_slice %102 {offsets = [1, 0], sizes = [1, 256], strides = [1, 1]} : vector<4x256xf32> to vector<1x256xf32>
    %113 = vector.broadcast %111 : vector<4x1xf32> to vector<4x256xf32>
    %114 = vector.broadcast %112 : vector<1x256xf32> to vector<4x256xf32>
    %115 = arith.mulf %113, %114 : vector<4x256xf32>
    %116 = arith.addf %110, %115 : vector<4x256xf32>
    %117 = vector.extract_strided_slice %104 {offsets = [0, 2], sizes = [4, 1], strides = [1, 1]} : vector<4x4xf32> to vector<4x1xf32>
    %118 = vector.extract_strided_slice %102 {offsets = [2, 0], sizes = [1, 256], strides = [1, 1]} : vector<4x256xf32> to vector<1x256xf32>
    %119 = vector.broadcast %117 : vector<4x1xf32> to vector<4x256xf32>
    %120 = vector.broadcast %118 : vector<1x256xf32> to vector<4x256xf32>
    %121 = arith.mulf %119, %120 : vector<4x256xf32>
    %122 = arith.addf %116, %121 : vector<4x256xf32>
    %123 = vector.extract_strided_slice %104 {offsets = [0, 3], sizes = [4, 1], strides = [1, 1]} : vector<4x4xf32> to vector<4x1xf32>
    %124 = vector.extract_strided_slice %102 {offsets = [3, 0], sizes = [1, 256], strides = [1, 1]} : vector<4x256xf32> to vector<1x256xf32>
    %125 = vector.broadcast %123 : vector<4x1xf32> to vector<4x256xf32>
    %126 = vector.broadcast %124 : vector<1x256xf32> to vector<4x256xf32>
    %127 = arith.mulf %125, %126 : vector<4x256xf32>
    %128 = arith.addf %122, %127 : vector<4x256xf32>
    %c0_31 = arith.constant 0 : index
    %c17_32 = arith.constant 17 : index
    %129 = vector.load %arg6[%c0_31, %c17_32] : memref<4x290xf32, #tpu.memory_space<vmem>>, vector<4x256xf32>
    %c4 = arith.constant 4 : index
    %c0_33 = arith.constant 0 : index
    %c0_34 = arith.constant 0 : index
    %130 = vector.load %arg3[%c4, %c0_33, %c0_34] : memref<9x4x4xf32, #tpu.memory_space<vmem>>, vector<1x4x4xf32>
    %131 = vector.shape_cast %130 : vector<1x4x4xf32> to vector<4x4xf32>
    %132 = vector.extract_strided_slice %131 {offsets = [0, 0], sizes = [4, 1], strides = [1, 1]} : vector<4x4xf32> to vector<4x1xf32>
    %133 = vector.extract_strided_slice %129 {offsets = [0, 0], sizes = [1, 256], strides = [1, 1]} : vector<4x256xf32> to vector<1x256xf32>
    %134 = vector.broadcast %132 : vector<4x1xf32> to vector<4x256xf32>
    %135 = vector.broadcast %133 : vector<1x256xf32> to vector<4x256xf32>
    %136 = arith.mulf %134, %135 : vector<4x256xf32>
    %137 = arith.addf %128, %136 : vector<4x256xf32>
    %138 = vector.extract_strided_slice %131 {offsets = [0, 1], sizes = [4, 1], strides = [1, 1]} : vector<4x4xf32> to vector<4x1xf32>
    %139 = vector.extract_strided_slice %129 {offsets = [1, 0], sizes = [1, 256], strides = [1, 1]} : vector<4x256xf32> to vector<1x256xf32>
    %140 = vector.broadcast %138 : vector<4x1xf32> to vector<4x256xf32>
    %141 = vector.broadcast %139 : vector<1x256xf32> to vector<4x256xf32>
    %142 = arith.mulf %140, %141 : vector<4x256xf32>
    %143 = arith.addf %137, %142 : vector<4x256xf32>
    %144 = vector.extract_strided_slice %131 {offsets = [0, 2], sizes = [4, 1], strides = [1, 1]} : vector<4x4xf32> to vector<4x1xf32>
    %145 = vector.extract_strided_slice %129 {offsets = [2, 0], sizes = [1, 256], strides = [1, 1]} : vector<4x256xf32> to vector<1x256xf32>
    %146 = vector.broadcast %144 : vector<4x1xf32> to vector<4x256xf32>
    %147 = vector.broadcast %145 : vector<1x256xf32> to vector<4x256xf32>
    %148 = arith.mulf %146, %147 : vector<4x256xf32>
    %149 = arith.addf %143, %148 : vector<4x256xf32>
    %150 = vector.extract_strided_slice %131 {offsets = [0, 3], sizes = [4, 1], strides = [1, 1]} : vector<4x4xf32> to vector<4x1xf32>
    %151 = vector.extract_strided_slice %129 {offsets = [3, 0], sizes = [1, 256], strides = [1, 1]} : vector<4x256xf32> to vector<1x256xf32>
    %152 = vector.broadcast %150 : vector<4x1xf32> to vector<4x256xf32>
    %153 = vector.broadcast %151 : vector<1x256xf32> to vector<4x256xf32>
    %154 = arith.mulf %152, %153 : vector<4x256xf32>
    %155 = arith.addf %149, %154 : vector<4x256xf32>
    %c0_35 = arith.constant 0 : index
    %c18_36 = arith.constant 18 : index
    %156 = vector.load %arg6[%c0_35, %c18_36] : memref<4x290xf32, #tpu.memory_space<vmem>>, vector<4x256xf32>
    %c0_37 = arith.constant 0 : index
    %c16_38 = arith.constant 16 : index
    %157 = vector.load %arg6[%c0_37, %c16_38] : memref<4x290xf32, #tpu.memory_space<vmem>>, vector<4x256xf32>
    %158 = arith.select %8, %157, %156 : vector<4x256xi1>, vector<4x256xf32>
    %c5 = arith.constant 5 : index
    %c0_39 = arith.constant 0 : index
    %c0_40 = arith.constant 0 : index
    %159 = vector.load %arg3[%c5, %c0_39, %c0_40] : memref<9x4x4xf32, #tpu.memory_space<vmem>>, vector<1x4x4xf32>
    %160 = vector.shape_cast %159 : vector<1x4x4xf32> to vector<4x4xf32>
    %161 = vector.extract_strided_slice %160 {offsets = [0, 0], sizes = [4, 1], strides = [1, 1]} : vector<4x4xf32> to vector<4x1xf32>
    %162 = vector.extract_strided_slice %158 {offsets = [0, 0], sizes = [1, 256], strides = [1, 1]} : vector<4x256xf32> to vector<1x256xf32>
    %163 = vector.broadcast %161 : vector<4x1xf32> to vector<4x256xf32>
    %164 = vector.broadcast %162 : vector<1x256xf32> to vector<4x256xf32>
    %165 = arith.mulf %163, %164 : vector<4x256xf32>
    %166 = arith.addf %155, %165 : vector<4x256xf32>
    %167 = vector.extract_strided_slice %160 {offsets = [0, 1], sizes = [4, 1], strides = [1, 1]} : vector<4x4xf32> to vector<4x1xf32>
    %168 = vector.extract_strided_slice %158 {offsets = [1, 0], sizes = [1, 256], strides = [1, 1]} : vector<4x256xf32> to vector<1x256xf32>
    %169 = vector.broadcast %167 : vector<4x1xf32> to vector<4x256xf32>
    %170 = vector.broadcast %168 : vector<1x256xf32> to vector<4x256xf32>
    %171 = arith.mulf %169, %170 : vector<4x256xf32>
    %172 = arith.addf %166, %171 : vector<4x256xf32>
    %173 = vector.extract_strided_slice %160 {offsets = [0, 2], sizes = [4, 1], strides = [1, 1]} : vector<4x4xf32> to vector<4x1xf32>
    %174 = vector.extract_strided_slice %158 {offsets = [2, 0], sizes = [1, 256], strides = [1, 1]} : vector<4x256xf32> to vector<1x256xf32>
    %175 = vector.broadcast %173 : vector<4x1xf32> to vector<4x256xf32>
    %176 = vector.broadcast %174 : vector<1x256xf32> to vector<4x256xf32>
    %177 = arith.mulf %175, %176 : vector<4x256xf32>
    %178 = arith.addf %172, %177 : vector<4x256xf32>
    %179 = vector.extract_strided_slice %160 {offsets = [0, 3], sizes = [4, 1], strides = [1, 1]} : vector<4x4xf32> to vector<4x1xf32>
    %180 = vector.extract_strided_slice %158 {offsets = [3, 0], sizes = [1, 256], strides = [1, 1]} : vector<4x256xf32> to vector<1x256xf32>
    %181 = vector.broadcast %179 : vector<4x1xf32> to vector<4x256xf32>
    %182 = vector.broadcast %180 : vector<1x256xf32> to vector<4x256xf32>
    %183 = arith.mulf %181, %182 : vector<4x256xf32>
    %184 = arith.addf %178, %183 : vector<4x256xf32>
    %c0_41 = arith.constant 0 : index
    %c32 = arith.constant 32 : index
    %185 = vector.load %arg6[%c0_41, %c32] : memref<4x290xf32, #tpu.memory_space<vmem>>, vector<4x256xf32>
    %c0_42 = arith.constant 0 : index
    %c34 = arith.constant 34 : index
    %186 = vector.load %arg6[%c0_42, %c34] : memref<4x290xf32, #tpu.memory_space<vmem>>, vector<4x256xf32>
    %187 = arith.select %6, %186, %185 : vector<4x256xi1>, vector<4x256xf32>
    %c6 = arith.constant 6 : index
    %c0_43 = arith.constant 0 : index
    %c0_44 = arith.constant 0 : index
    %188 = vector.load %arg3[%c6, %c0_43, %c0_44] : memref<9x4x4xf32, #tpu.memory_space<vmem>>, vector<1x4x4xf32>
    %189 = vector.shape_cast %188 : vector<1x4x4xf32> to vector<4x4xf32>
    %190 = vector.extract_strided_slice %189 {offsets = [0, 0], sizes = [4, 1], strides = [1, 1]} : vector<4x4xf32> to vector<4x1xf32>
    %191 = vector.extract_strided_slice %187 {offsets = [0, 0], sizes = [1, 256], strides = [1, 1]} : vector<4x256xf32> to vector<1x256xf32>
    %192 = vector.broadcast %190 : vector<4x1xf32> to vector<4x256xf32>
    %193 = vector.broadcast %191 : vector<1x256xf32> to vector<4x256xf32>
    %194 = arith.mulf %192, %193 : vector<4x256xf32>
    %195 = arith.addf %184, %194 : vector<4x256xf32>
    %196 = vector.extract_strided_slice %189 {offsets = [0, 1], sizes = [4, 1], strides = [1, 1]} : vector<4x4xf32> to vector<4x1xf32>
    %197 = vector.extract_strided_slice %187 {offsets = [1, 0], sizes = [1, 256], strides = [1, 1]} : vector<4x256xf32> to vector<1x256xf32>
    %198 = vector.broadcast %196 : vector<4x1xf32> to vector<4x256xf32>
    %199 = vector.broadcast %197 : vector<1x256xf32> to vector<4x256xf32>
    %200 = arith.mulf %198, %199 : vector<4x256xf32>
    %201 = arith.addf %195, %200 : vector<4x256xf32>
    %202 = vector.extract_strided_slice %189 {offsets = [0, 2], sizes = [4, 1], strides = [1, 1]} : vector<4x4xf32> to vector<4x1xf32>
    %203 = vector.extract_strided_slice %187 {offsets = [2, 0], sizes = [1, 256], strides = [1, 1]} : vector<4x256xf32> to vector<1x256xf32>
    %204 = vector.broadcast %202 : vector<4x1xf32> to vector<4x256xf32>
    %205 = vector.broadcast %203 : vector<1x256xf32> to vector<4x256xf32>
    %206 = arith.mulf %204, %205 : vector<4x256xf32>
    %207 = arith.addf %201, %206 : vector<4x256xf32>
    %208 = vector.extract_strided_slice %189 {offsets = [0, 3], sizes = [4, 1], strides = [1, 1]} : vector<4x4xf32> to vector<4x1xf32>
    %209 = vector.extract_strided_slice %187 {offsets = [3, 0], sizes = [1, 256], strides = [1, 1]} : vector<4x256xf32> to vector<1x256xf32>
    %210 = vector.broadcast %208 : vector<4x1xf32> to vector<4x256xf32>
    %211 = vector.broadcast %209 : vector<1x256xf32> to vector<4x256xf32>
    %212 = arith.mulf %210, %211 : vector<4x256xf32>
    %213 = arith.addf %207, %212 : vector<4x256xf32>
    %c0_45 = arith.constant 0 : index
    %c33_46 = arith.constant 33 : index
    %214 = vector.load %arg6[%c0_45, %c33_46] : memref<4x290xf32, #tpu.memory_space<vmem>>, vector<4x256xf32>
    %c7 = arith.constant 7 : index
    %c0_47 = arith.constant 0 : index
    %c0_48 = arith.constant 0 : index
    %215 = vector.load %arg3[%c7, %c0_47, %c0_48] : memref<9x4x4xf32, #tpu.memory_space<vmem>>, vector<1x4x4xf32>
    %216 = vector.shape_cast %215 : vector<1x4x4xf32> to vector<4x4xf32>
    %217 = vector.extract_strided_slice %216 {offsets = [0, 0], sizes = [4, 1], strides = [1, 1]} : vector<4x4xf32> to vector<4x1xf32>
    %218 = vector.extract_strided_slice %214 {offsets = [0, 0], sizes = [1, 256], strides = [1, 1]} : vector<4x256xf32> to vector<1x256xf32>
    %219 = vector.broadcast %217 : vector<4x1xf32> to vector<4x256xf32>
    %220 = vector.broadcast %218 : vector<1x256xf32> to vector<4x256xf32>
    %221 = arith.mulf %219, %220 : vector<4x256xf32>
    %222 = arith.addf %213, %221 : vector<4x256xf32>
    %223 = vector.extract_strided_slice %216 {offsets = [0, 1], sizes = [4, 1], strides = [1, 1]} : vector<4x4xf32> to vector<4x1xf32>
    %224 = vector.extract_strided_slice %214 {offsets = [1, 0], sizes = [1, 256], strides = [1, 1]} : vector<4x256xf32> to vector<1x256xf32>
    %225 = vector.broadcast %223 : vector<4x1xf32> to vector<4x256xf32>
    %226 = vector.broadcast %224 : vector<1x256xf32> to vector<4x256xf32>
    %227 = arith.mulf %225, %226 : vector<4x256xf32>
    %228 = arith.addf %222, %227 : vector<4x256xf32>
    %229 = vector.extract_strided_slice %216 {offsets = [0, 2], sizes = [4, 1], strides = [1, 1]} : vector<4x4xf32> to vector<4x1xf32>
    %230 = vector.extract_strided_slice %214 {offsets = [2, 0], sizes = [1, 256], strides = [1, 1]} : vector<4x256xf32> to vector<1x256xf32>
    %231 = vector.broadcast %229 : vector<4x1xf32> to vector<4x256xf32>
    %232 = vector.broadcast %230 : vector<1x256xf32> to vector<4x256xf32>
    %233 = arith.mulf %231, %232 : vector<4x256xf32>
    %234 = arith.addf %228, %233 : vector<4x256xf32>
    %235 = vector.extract_strided_slice %216 {offsets = [0, 3], sizes = [4, 1], strides = [1, 1]} : vector<4x4xf32> to vector<4x1xf32>
    %236 = vector.extract_strided_slice %214 {offsets = [3, 0], sizes = [1, 256], strides = [1, 1]} : vector<4x256xf32> to vector<1x256xf32>
    %237 = vector.broadcast %235 : vector<4x1xf32> to vector<4x256xf32>
    %238 = vector.broadcast %236 : vector<1x256xf32> to vector<4x256xf32>
    %239 = arith.mulf %237, %238 : vector<4x256xf32>
    %240 = arith.addf %234, %239 : vector<4x256xf32>
    %c0_49 = arith.constant 0 : index
    %c34_50 = arith.constant 34 : index
    %241 = vector.load %arg6[%c0_49, %c34_50] : memref<4x290xf32, #tpu.memory_space<vmem>>, vector<4x256xf32>
    %c0_51 = arith.constant 0 : index
    %c32_52 = arith.constant 32 : index
    %242 = vector.load %arg6[%c0_51, %c32_52] : memref<4x290xf32, #tpu.memory_space<vmem>>, vector<4x256xf32>
    %243 = arith.select %8, %242, %241 : vector<4x256xi1>, vector<4x256xf32>
    %c8 = arith.constant 8 : index
    %c0_53 = arith.constant 0 : index
    %c0_54 = arith.constant 0 : index
    %244 = vector.load %arg3[%c8, %c0_53, %c0_54] : memref<9x4x4xf32, #tpu.memory_space<vmem>>, vector<1x4x4xf32>
    %245 = vector.shape_cast %244 : vector<1x4x4xf32> to vector<4x4xf32>
    %246 = vector.extract_strided_slice %245 {offsets = [0, 0], sizes = [4, 1], strides = [1, 1]} : vector<4x4xf32> to vector<4x1xf32>
    %247 = vector.extract_strided_slice %243 {offsets = [0, 0], sizes = [1, 256], strides = [1, 1]} : vector<4x256xf32> to vector<1x256xf32>
    %248 = vector.broadcast %246 : vector<4x1xf32> to vector<4x256xf32>
    %249 = vector.broadcast %247 : vector<1x256xf32> to vector<4x256xf32>
    %250 = arith.mulf %248, %249 : vector<4x256xf32>
    %251 = arith.addf %240, %250 : vector<4x256xf32>
    %252 = vector.extract_strided_slice %245 {offsets = [0, 1], sizes = [4, 1], strides = [1, 1]} : vector<4x4xf32> to vector<4x1xf32>
    %253 = vector.extract_strided_slice %243 {offsets = [1, 0], sizes = [1, 256], strides = [1, 1]} : vector<4x256xf32> to vector<1x256xf32>
    %254 = vector.broadcast %252 : vector<4x1xf32> to vector<4x256xf32>
    %255 = vector.broadcast %253 : vector<1x256xf32> to vector<4x256xf32>
    %256 = arith.mulf %254, %255 : vector<4x256xf32>
    %257 = arith.addf %251, %256 : vector<4x256xf32>
    %258 = vector.extract_strided_slice %245 {offsets = [0, 2], sizes = [4, 1], strides = [1, 1]} : vector<4x4xf32> to vector<4x1xf32>
    %259 = vector.extract_strided_slice %243 {offsets = [2, 0], sizes = [1, 256], strides = [1, 1]} : vector<4x256xf32> to vector<1x256xf32>
    %260 = vector.broadcast %258 : vector<4x1xf32> to vector<4x256xf32>
    %261 = vector.broadcast %259 : vector<1x256xf32> to vector<4x256xf32>
    %262 = arith.mulf %260, %261 : vector<4x256xf32>
    %263 = arith.addf %257, %262 : vector<4x256xf32>
    %264 = vector.extract_strided_slice %245 {offsets = [0, 3], sizes = [4, 1], strides = [1, 1]} : vector<4x4xf32> to vector<4x1xf32>
    %265 = vector.extract_strided_slice %243 {offsets = [3, 0], sizes = [1, 256], strides = [1, 1]} : vector<4x256xf32> to vector<1x256xf32>
    %266 = vector.broadcast %264 : vector<4x1xf32> to vector<4x256xf32>
    %267 = vector.broadcast %265 : vector<1x256xf32> to vector<4x256xf32>
    %268 = arith.mulf %266, %267 : vector<4x256xf32>
    %269 = arith.addf %263, %268 : vector<4x256xf32>
    %cst_55 = arith.constant dense<0.000000e+00> : vector<4xf32>
    %270 = vector.multi_reduction <add>, %269, %cst_55 [1] : vector<4x256xf32> to vector<4xf32>
    %271 = vector.shape_cast %270 : vector<4xf32> to vector<4x1xf32>
    %cst_56 = arith.constant 2.560000e+02 : f32
    %272 = vector.broadcast %cst_56 : f32 to vector<4x1xf32>
    %273 = arith.divf %271, %272 : vector<4x1xf32>
    %274 = vector.broadcast %273 : vector<4x1xf32> to vector<4x256xf32>
    %275 = arith.subf %269, %274 : vector<4x256xf32>
    %276 = arith.mulf %275, %275 : vector<4x256xf32>
    %cst_57 = arith.constant dense<0.000000e+00> : vector<4xf32>
    %277 = vector.multi_reduction <add>, %276, %cst_57 [1] : vector<4x256xf32> to vector<4xf32>
    %278 = vector.shape_cast %277 : vector<4xf32> to vector<4x1xf32>
    %cst_58 = arith.constant 2.560000e+02 : f32
    %279 = vector.broadcast %cst_58 : f32 to vector<4x1xf32>
    %280 = arith.divf %278, %279 : vector<4x1xf32>
    %281 = vector.broadcast %273 : vector<4x1xf32> to vector<4x256xf32>
    %282 = arith.subf %269, %281 : vector<4x256xf32>
    %cst_59 = arith.constant 9.99999974E-6 : f32
    %283 = vector.broadcast %cst_59 : f32 to vector<4x1xf32>
    %284 = arith.addf %280, %283 : vector<4x1xf32>
    %285 = math.rsqrt %284 : vector<4x1xf32>
    %286 = vector.broadcast %285 : vector<4x1xf32> to vector<4x256xf32>
    %287 = arith.mulf %282, %286 : vector<4x256xf32>
    %cst_60 = arith.constant 0.000000e+00 : f32
    %288 = vector.broadcast %cst_60 : f32 to vector<4x256xf32>
    %289 = arith.maximumf %287, %288 : vector<4x256xf32>
    %c0_61 = arith.constant 0 : index
    %c17_62 = arith.constant 17 : index
    %290 = vector.load %arg6[%c0_61, %c17_62] : memref<4x290xf32, #tpu.memory_space<vmem>>, vector<4x256xf32>
    tpu.vector_store %arg6[%c0_61, %c17_62], %289 {strides = array<i32>} : memref<4x290xf32, #tpu.memory_space<vmem>>, vector<4x256xf32>,
    %c0_63 = arith.constant 0 : index
    %c33_64 = arith.constant 33 : index
    %291 = vector.load %arg6[%c0_63, %c33_64] : memref<4x290xf32, #tpu.memory_space<vmem>>, vector<4x16xf32>
    %c0_65 = arith.constant 0 : index
    %c1_66 = arith.constant 1 : index
    %292 = vector.load %arg6[%c0_65, %c1_66] : memref<4x290xf32, #tpu.memory_space<vmem>>, vector<4x16xf32>
    tpu.vector_store %arg6[%c0_65, %c1_66], %291 {strides = array<i32>} : memref<4x290xf32, #tpu.memory_space<vmem>>, vector<4x16xf32>,
    %c0_67 = arith.constant 0 : index
    %c241_68 = arith.constant 241 : index
    %293 = vector.load %arg6[%c0_67, %c241_68] : memref<4x290xf32, #tpu.memory_space<vmem>>, vector<4x16xf32>
    %c0_69 = arith.constant 0 : index
    %c273_70 = arith.constant 273 : index
    %294 = vector.load %arg6[%c0_69, %c273_70] : memref<4x290xf32, #tpu.memory_space<vmem>>, vector<4x16xf32>
    tpu.vector_store %arg6[%c0_69, %c273_70], %293 {strides = array<i32>} : memref<4x290xf32, #tpu.memory_space<vmem>>, vector<4x16xf32>,
    %cst_71 = arith.constant 0.000000e+00 : f32
    %295 = vector.broadcast %cst_71 : f32 to vector<4x256xf32>
    %c0_72 = arith.constant 0 : index
    %c0_73 = arith.constant 0 : index
    %296 = vector.load %arg6[%c0_72, %c0_73] : memref<4x290xf32, #tpu.memory_space<vmem>>, vector<4x256xf32>
    %c0_74 = arith.constant 0 : index
    %c2_75 = arith.constant 2 : index
    %297 = vector.load %arg6[%c0_74, %c2_75] : memref<4x290xf32, #tpu.memory_space<vmem>>, vector<4x256xf32>
    %298 = arith.select %6, %297, %296 : vector<4x256xi1>, vector<4x256xf32>
    %c0_76 = arith.constant 0 : index
    %c0_77 = arith.constant 0 : index
    %c0_78 = arith.constant 0 : index
    %299 = vector.load %arg4[%c0_76, %c0_77, %c0_78] : memref<9x4x4xf32, #tpu.memory_space<vmem>>, vector<1x4x4xf32>
    %300 = vector.shape_cast %299 : vector<1x4x4xf32> to vector<4x4xf32>
    %301 = vector.extract_strided_slice %300 {offsets = [0, 0], sizes = [4, 1], strides = [1, 1]} : vector<4x4xf32> to vector<4x1xf32>
    %302 = vector.extract_strided_slice %298 {offsets = [0, 0], sizes = [1, 256], strides = [1, 1]} : vector<4x256xf32> to vector<1x256xf32>
    %303 = vector.broadcast %301 : vector<4x1xf32> to vector<4x256xf32>
    %304 = vector.broadcast %302 : vector<1x256xf32> to vector<4x256xf32>
    %305 = arith.mulf %303, %304 : vector<4x256xf32>
    %306 = arith.addf %295, %305 : vector<4x256xf32>
    %307 = vector.extract_strided_slice %300 {offsets = [0, 1], sizes = [4, 1], strides = [1, 1]} : vector<4x4xf32> to vector<4x1xf32>
    %308 = vector.extract_strided_slice %298 {offsets = [1, 0], sizes = [1, 256], strides = [1, 1]} : vector<4x256xf32> to vector<1x256xf32>
    %309 = vector.broadcast %307 : vector<4x1xf32> to vector<4x256xf32>
    %310 = vector.broadcast %308 : vector<1x256xf32> to vector<4x256xf32>
    %311 = arith.mulf %309, %310 : vector<4x256xf32>
    %312 = arith.addf %306, %311 : vector<4x256xf32>
    %313 = vector.extract_strided_slice %300 {offsets = [0, 2], sizes = [4, 1], strides = [1, 1]} : vector<4x4xf32> to vector<4x1xf32>
    %314 = vector.extract_strided_slice %298 {offsets = [2, 0], sizes = [1, 256], strides = [1, 1]} : vector<4x256xf32> to vector<1x256xf32>
    %315 = vector.broadcast %313 : vector<4x1xf32> to vector<4x256xf32>
    %316 = vector.broadcast %314 : vector<1x256xf32> to vector<4x256xf32>
    %317 = arith.mulf %315, %316 : vector<4x256xf32>
    %318 = arith.addf %312, %317 : vector<4x256xf32>
    %319 = vector.extract_strided_slice %300 {offsets = [0, 3], sizes = [4, 1], strides = [1, 1]} : vector<4x4xf32> to vector<4x1xf32>
    %320 = vector.extract_strided_slice %298 {offsets = [3, 0], sizes = [1, 256], strides = [1, 1]} : vector<4x256xf32> to vector<1x256xf32>
    %321 = vector.broadcast %319 : vector<4x1xf32> to vector<4x256xf32>
    %322 = vector.broadcast %320 : vector<1x256xf32> to vector<4x256xf32>
    %323 = arith.mulf %321, %322 : vector<4x256xf32>
    %324 = arith.addf %318, %323 : vector<4x256xf32>
    %c0_79 = arith.constant 0 : index
    %c1_80 = arith.constant 1 : index
    %325 = vector.load %arg6[%c0_79, %c1_80] : memref<4x290xf32, #tpu.memory_space<vmem>>, vector<4x256xf32>
    %c1_81 = arith.constant 1 : index
    %c0_82 = arith.constant 0 : index
    %c0_83 = arith.constant 0 : index
    %326 = vector.load %arg4[%c1_81, %c0_82, %c0_83] : memref<9x4x4xf32, #tpu.memory_space<vmem>>, vector<1x4x4xf32>
    %327 = vector.shape_cast %326 : vector<1x4x4xf32> to vector<4x4xf32>
    %328 = vector.extract_strided_slice %327 {offsets = [0, 0], sizes = [4, 1], strides = [1, 1]} : vector<4x4xf32> to vector<4x1xf32>
    %329 = vector.extract_strided_slice %325 {offsets = [0, 0], sizes = [1, 256], strides = [1, 1]} : vector<4x256xf32> to vector<1x256xf32>
    %330 = vector.broadcast %328 : vector<4x1xf32> to vector<4x256xf32>
    %331 = vector.broadcast %329 : vector<1x256xf32> to vector<4x256xf32>
    %332 = arith.mulf %330, %331 : vector<4x256xf32>
    %333 = arith.addf %324, %332 : vector<4x256xf32>
    %334 = vector.extract_strided_slice %327 {offsets = [0, 1], sizes = [4, 1], strides = [1, 1]} : vector<4x4xf32> to vector<4x1xf32>
    %335 = vector.extract_strided_slice %325 {offsets = [1, 0], sizes = [1, 256], strides = [1, 1]} : vector<4x256xf32> to vector<1x256xf32>
    %336 = vector.broadcast %334 : vector<4x1xf32> to vector<4x256xf32>
    %337 = vector.broadcast %335 : vector<1x256xf32> to vector<4x256xf32>
    %338 = arith.mulf %336, %337 : vector<4x256xf32>
    %339 = arith.addf %333, %338 : vector<4x256xf32>
    %340 = vector.extract_strided_slice %327 {offsets = [0, 2], sizes = [4, 1], strides = [1, 1]} : vector<4x4xf32> to vector<4x1xf32>
    %341 = vector.extract_strided_slice %325 {offsets = [2, 0], sizes = [1, 256], strides = [1, 1]} : vector<4x256xf32> to vector<1x256xf32>
    %342 = vector.broadcast %340 : vector<4x1xf32> to vector<4x256xf32>
    %343 = vector.broadcast %341 : vector<1x256xf32> to vector<4x256xf32>
    %344 = arith.mulf %342, %343 : vector<4x256xf32>
    %345 = arith.addf %339, %344 : vector<4x256xf32>
    %346 = vector.extract_strided_slice %327 {offsets = [0, 3], sizes = [4, 1], strides = [1, 1]} : vector<4x4xf32> to vector<4x1xf32>
    %347 = vector.extract_strided_slice %325 {offsets = [3, 0], sizes = [1, 256], strides = [1, 1]} : vector<4x256xf32> to vector<1x256xf32>
    %348 = vector.broadcast %346 : vector<4x1xf32> to vector<4x256xf32>
    %349 = vector.broadcast %347 : vector<1x256xf32> to vector<4x256xf32>
    %350 = arith.mulf %348, %349 : vector<4x256xf32>
    %351 = arith.addf %345, %350 : vector<4x256xf32>
    %c0_84 = arith.constant 0 : index
    %c2_85 = arith.constant 2 : index
    %352 = vector.load %arg6[%c0_84, %c2_85] : memref<4x290xf32, #tpu.memory_space<vmem>>, vector<4x256xf32>
    %c0_86 = arith.constant 0 : index
    %c0_87 = arith.constant 0 : index
    %353 = vector.load %arg6[%c0_86, %c0_87] : memref<4x290xf32, #tpu.memory_space<vmem>>, vector<4x256xf32>
    %354 = arith.select %8, %353, %352 : vector<4x256xi1>, vector<4x256xf32>
    %c2_88 = arith.constant 2 : index
    %c0_89 = arith.constant 0 : index
    %c0_90 = arith.constant 0 : index
    %355 = vector.load %arg4[%c2_88, %c0_89, %c0_90] : memref<9x4x4xf32, #tpu.memory_space<vmem>>, vector<1x4x4xf32>
    %356 = vector.shape_cast %355 : vector<1x4x4xf32> to vector<4x4xf32>
    %357 = vector.extract_strided_slice %356 {offsets = [0, 0], sizes = [4, 1], strides = [1, 1]} : vector<4x4xf32> to vector<4x1xf32>
    %358 = vector.extract_strided_slice %354 {offsets = [0, 0], sizes = [1, 256], strides = [1, 1]} : vector<4x256xf32> to vector<1x256xf32>
    %359 = vector.broadcast %357 : vector<4x1xf32> to vector<4x256xf32>
    %360 = vector.broadcast %358 : vector<1x256xf32> to vector<4x256xf32>
    %361 = arith.mulf %359, %360 : vector<4x256xf32>
    %362 = arith.addf %351, %361 : vector<4x256xf32>
    %363 = vector.extract_strided_slice %356 {offsets = [0, 1], sizes = [4, 1], strides = [1, 1]} : vector<4x4xf32> to vector<4x1xf32>
    %364 = vector.extract_strided_slice %354 {offsets = [1, 0], sizes = [1, 256], strides = [1, 1]} : vector<4x256xf32> to vector<1x256xf32>
    %365 = vector.broadcast %363 : vector<4x1xf32> to vector<4x256xf32>
    %366 = vector.broadcast %364 : vector<1x256xf32> to vector<4x256xf32>
    %367 = arith.mulf %365, %366 : vector<4x256xf32>
    %368 = arith.addf %362, %367 : vector<4x256xf32>
    %369 = vector.extract_strided_slice %356 {offsets = [0, 2], sizes = [4, 1], strides = [1, 1]} : vector<4x4xf32> to vector<4x1xf32>
    %370 = vector.extract_strided_slice %354 {offsets = [2, 0], sizes = [1, 256], strides = [1, 1]} : vector<4x256xf32> to vector<1x256xf32>
    %371 = vector.broadcast %369 : vector<4x1xf32> to vector<4x256xf32>
    %372 = vector.broadcast %370 : vector<1x256xf32> to vector<4x256xf32>
    %373 = arith.mulf %371, %372 : vector<4x256xf32>
    %374 = arith.addf %368, %373 : vector<4x256xf32>
    %375 = vector.extract_strided_slice %356 {offsets = [0, 3], sizes = [4, 1], strides = [1, 1]} : vector<4x4xf32> to vector<4x1xf32>
    %376 = vector.extract_strided_slice %354 {offsets = [3, 0], sizes = [1, 256], strides = [1, 1]} : vector<4x256xf32> to vector<1x256xf32>
    %377 = vector.broadcast %375 : vector<4x1xf32> to vector<4x256xf32>
    %378 = vector.broadcast %376 : vector<1x256xf32> to vector<4x256xf32>
    %379 = arith.mulf %377, %378 : vector<4x256xf32>
    %380 = arith.addf %374, %379 : vector<4x256xf32>
    %c0_91 = arith.constant 0 : index
    %c16_92 = arith.constant 16 : index
    %381 = vector.load %arg6[%c0_91, %c16_92] : memref<4x290xf32, #tpu.memory_space<vmem>>, vector<4x256xf32>
    %c0_93 = arith.constant 0 : index
    %c18_94 = arith.constant 18 : index
    %382 = vector.load %arg6[%c0_93, %c18_94] : memref<4x290xf32, #tpu.memory_space<vmem>>, vector<4x256xf32>
    %383 = arith.select %6, %382, %381 : vector<4x256xi1>, vector<4x256xf32>
    %c3_95 = arith.constant 3 : index
    %c0_96 = arith.constant 0 : index
    %c0_97 = arith.constant 0 : index
    %384 = vector.load %arg4[%c3_95, %c0_96, %c0_97] : memref<9x4x4xf32, #tpu.memory_space<vmem>>, vector<1x4x4xf32>
    %385 = vector.shape_cast %384 : vector<1x4x4xf32> to vector<4x4xf32>
    %386 = vector.extract_strided_slice %385 {offsets = [0, 0], sizes = [4, 1], strides = [1, 1]} : vector<4x4xf32> to vector<4x1xf32>
    %387 = vector.extract_strided_slice %383 {offsets = [0, 0], sizes = [1, 256], strides = [1, 1]} : vector<4x256xf32> to vector<1x256xf32>
    %388 = vector.broadcast %386 : vector<4x1xf32> to vector<4x256xf32>
    %389 = vector.broadcast %387 : vector<1x256xf32> to vector<4x256xf32>
    %390 = arith.mulf %388, %389 : vector<4x256xf32>
    %391 = arith.addf %380, %390 : vector<4x256xf32>
    %392 = vector.extract_strided_slice %385 {offsets = [0, 1], sizes = [4, 1], strides = [1, 1]} : vector<4x4xf32> to vector<4x1xf32>
    %393 = vector.extract_strided_slice %383 {offsets = [1, 0], sizes = [1, 256], strides = [1, 1]} : vector<4x256xf32> to vector<1x256xf32>
    %394 = vector.broadcast %392 : vector<4x1xf32> to vector<4x256xf32>
    %395 = vector.broadcast %393 : vector<1x256xf32> to vector<4x256xf32>
    %396 = arith.mulf %394, %395 : vector<4x256xf32>
    %397 = arith.addf %391, %396 : vector<4x256xf32>
    %398 = vector.extract_strided_slice %385 {offsets = [0, 2], sizes = [4, 1], strides = [1, 1]} : vector<4x4xf32> to vector<4x1xf32>
    %399 = vector.extract_strided_slice %383 {offsets = [2, 0], sizes = [1, 256], strides = [1, 1]} : vector<4x256xf32> to vector<1x256xf32>
    %400 = vector.broadcast %398 : vector<4x1xf32> to vector<4x256xf32>
    %401 = vector.broadcast %399 : vector<1x256xf32> to vector<4x256xf32>
    %402 = arith.mulf %400, %401 : vector<4x256xf32>
    %403 = arith.addf %397, %402 : vector<4x256xf32>
    %404 = vector.extract_strided_slice %385 {offsets = [0, 3], sizes = [4, 1], strides = [1, 1]} : vector<4x4xf32> to vector<4x1xf32>
    %405 = vector.extract_strided_slice %383 {offsets = [3, 0], sizes = [1, 256], strides = [1, 1]} : vector<4x256xf32> to vector<1x256xf32>
    %406 = vector.broadcast %404 : vector<4x1xf32> to vector<4x256xf32>
    %407 = vector.broadcast %405 : vector<1x256xf32> to vector<4x256xf32>
    %408 = arith.mulf %406, %407 : vector<4x256xf32>
    %409 = arith.addf %403, %408 : vector<4x256xf32>
    %c0_98 = arith.constant 0 : index
    %c17_99 = arith.constant 17 : index
    %410 = vector.load %arg6[%c0_98, %c17_99] : memref<4x290xf32, #tpu.memory_space<vmem>>, vector<4x256xf32>
    %c4_100 = arith.constant 4 : index
    %c0_101 = arith.constant 0 : index
    %c0_102 = arith.constant 0 : index
    %411 = vector.load %arg4[%c4_100, %c0_101, %c0_102] : memref<9x4x4xf32, #tpu.memory_space<vmem>>, vector<1x4x4xf32>
    %412 = vector.shape_cast %411 : vector<1x4x4xf32> to vector<4x4xf32>
    %413 = vector.extract_strided_slice %412 {offsets = [0, 0], sizes = [4, 1], strides = [1, 1]} : vector<4x4xf32> to vector<4x1xf32>
    %414 = vector.extract_strided_slice %410 {offsets = [0, 0], sizes = [1, 256], strides = [1, 1]} : vector<4x256xf32> to vector<1x256xf32>
    %415 = vector.broadcast %413 : vector<4x1xf32> to vector<4x256xf32>
    %416 = vector.broadcast %414 : vector<1x256xf32> to vector<4x256xf32>
    %417 = arith.mulf %415, %416 : vector<4x256xf32>
    %418 = arith.addf %409, %417 : vector<4x256xf32>
    %419 = vector.extract_strided_slice %412 {offsets = [0, 1], sizes = [4, 1], strides = [1, 1]} : vector<4x4xf32> to vector<4x1xf32>
    %420 = vector.extract_strided_slice %410 {offsets = [1, 0], sizes = [1, 256], strides = [1, 1]} : vector<4x256xf32> to vector<1x256xf32>
    %421 = vector.broadcast %419 : vector<4x1xf32> to vector<4x256xf32>
    %422 = vector.broadcast %420 : vector<1x256xf32> to vector<4x256xf32>
    %423 = arith.mulf %421, %422 : vector<4x256xf32>
    %424 = arith.addf %418, %423 : vector<4x256xf32>
    %425 = vector.extract_strided_slice %412 {offsets = [0, 2], sizes = [4, 1], strides = [1, 1]} : vector<4x4xf32> to vector<4x1xf32>
    %426 = vector.extract_strided_slice %410 {offsets = [2, 0], sizes = [1, 256], strides = [1, 1]} : vector<4x256xf32> to vector<1x256xf32>
    %427 = vector.broadcast %425 : vector<4x1xf32> to vector<4x256xf32>
    %428 = vector.broadcast %426 : vector<1x256xf32> to vector<4x256xf32>
    %429 = arith.mulf %427, %428 : vector<4x256xf32>
    %430 = arith.addf %424, %429 : vector<4x256xf32>
    %431 = vector.extract_strided_slice %412 {offsets = [0, 3], sizes = [4, 1], strides = [1, 1]} : vector<4x4xf32> to vector<4x1xf32>
    %432 = vector.extract_strided_slice %410 {offsets = [3, 0], sizes = [1, 256], strides = [1, 1]} : vector<4x256xf32> to vector<1x256xf32>
    %433 = vector.broadcast %431 : vector<4x1xf32> to vector<4x256xf32>
    %434 = vector.broadcast %432 : vector<1x256xf32> to vector<4x256xf32>
    %435 = arith.mulf %433, %434 : vector<4x256xf32>
    %436 = arith.addf %430, %435 : vector<4x256xf32>
    %c0_103 = arith.constant 0 : index
    %c18_104 = arith.constant 18 : index
    %437 = vector.load %arg6[%c0_103, %c18_104] : memref<4x290xf32, #tpu.memory_space<vmem>>, vector<4x256xf32>
    %c0_105 = arith.constant 0 : index
    %c16_106 = arith.constant 16 : index
    %438 = vector.load %arg6[%c0_105, %c16_106] : memref<4x290xf32, #tpu.memory_space<vmem>>, vector<4x256xf32>
    %439 = arith.select %8, %438, %437 : vector<4x256xi1>, vector<4x256xf32>
    %c5_107 = arith.constant 5 : index
    %c0_108 = arith.constant 0 : index
    %c0_109 = arith.constant 0 : index
    %440 = vector.load %arg4[%c5_107, %c0_108, %c0_109] : memref<9x4x4xf32, #tpu.memory_space<vmem>>, vector<1x4x4xf32>
    %441 = vector.shape_cast %440 : vector<1x4x4xf32> to vector<4x4xf32>
    %442 = vector.extract_strided_slice %441 {offsets = [0, 0], sizes = [4, 1], strides = [1, 1]} : vector<4x4xf32> to vector<4x1xf32>
    %443 = vector.extract_strided_slice %439 {offsets = [0, 0], sizes = [1, 256], strides = [1, 1]} : vector<4x256xf32> to vector<1x256xf32>
    %444 = vector.broadcast %442 : vector<4x1xf32> to vector<4x256xf32>
    %445 = vector.broadcast %443 : vector<1x256xf32> to vector<4x256xf32>
    %446 = arith.mulf %444, %445 : vector<4x256xf32>
    %447 = arith.addf %436, %446 : vector<4x256xf32>
    %448 = vector.extract_strided_slice %441 {offsets = [0, 1], sizes = [4, 1], strides = [1, 1]} : vector<4x4xf32> to vector<4x1xf32>
    %449 = vector.extract_strided_slice %439 {offsets = [1, 0], sizes = [1, 256], strides = [1, 1]} : vector<4x256xf32> to vector<1x256xf32>
    %450 = vector.broadcast %448 : vector<4x1xf32> to vector<4x256xf32>
    %451 = vector.broadcast %449 : vector<1x256xf32> to vector<4x256xf32>
    %452 = arith.mulf %450, %451 : vector<4x256xf32>
    %453 = arith.addf %447, %452 : vector<4x256xf32>
    %454 = vector.extract_strided_slice %441 {offsets = [0, 2], sizes = [4, 1], strides = [1, 1]} : vector<4x4xf32> to vector<4x1xf32>
    %455 = vector.extract_strided_slice %439 {offsets = [2, 0], sizes = [1, 256], strides = [1, 1]} : vector<4x256xf32> to vector<1x256xf32>
    %456 = vector.broadcast %454 : vector<4x1xf32> to vector<4x256xf32>
    %457 = vector.broadcast %455 : vector<1x256xf32> to vector<4x256xf32>
    %458 = arith.mulf %456, %457 : vector<4x256xf32>
    %459 = arith.addf %453, %458 : vector<4x256xf32>
    %460 = vector.extract_strided_slice %441 {offsets = [0, 3], sizes = [4, 1], strides = [1, 1]} : vector<4x4xf32> to vector<4x1xf32>
    %461 = vector.extract_strided_slice %439 {offsets = [3, 0], sizes = [1, 256], strides = [1, 1]} : vector<4x256xf32> to vector<1x256xf32>
    %462 = vector.broadcast %460 : vector<4x1xf32> to vector<4x256xf32>
    %463 = vector.broadcast %461 : vector<1x256xf32> to vector<4x256xf32>
    %464 = arith.mulf %462, %463 : vector<4x256xf32>
    %465 = arith.addf %459, %464 : vector<4x256xf32>
    %c0_110 = arith.constant 0 : index
    %c32_111 = arith.constant 32 : index
    %466 = vector.load %arg6[%c0_110, %c32_111] : memref<4x290xf32, #tpu.memory_space<vmem>>, vector<4x256xf32>
    %c0_112 = arith.constant 0 : index
    %c34_113 = arith.constant 34 : index
    %467 = vector.load %arg6[%c0_112, %c34_113] : memref<4x290xf32, #tpu.memory_space<vmem>>, vector<4x256xf32>
    %468 = arith.select %6, %467, %466 : vector<4x256xi1>, vector<4x256xf32>
    %c6_114 = arith.constant 6 : index
    %c0_115 = arith.constant 0 : index
    %c0_116 = arith.constant 0 : index
    %469 = vector.load %arg4[%c6_114, %c0_115, %c0_116] : memref<9x4x4xf32, #tpu.memory_space<vmem>>, vector<1x4x4xf32>
    %470 = vector.shape_cast %469 : vector<1x4x4xf32> to vector<4x4xf32>
    %471 = vector.extract_strided_slice %470 {offsets = [0, 0], sizes = [4, 1], strides = [1, 1]} : vector<4x4xf32> to vector<4x1xf32>
    %472 = vector.extract_strided_slice %468 {offsets = [0, 0], sizes = [1, 256], strides = [1, 1]} : vector<4x256xf32> to vector<1x256xf32>
    %473 = vector.broadcast %471 : vector<4x1xf32> to vector<4x256xf32>
    %474 = vector.broadcast %472 : vector<1x256xf32> to vector<4x256xf32>
    %475 = arith.mulf %473, %474 : vector<4x256xf32>
    %476 = arith.addf %465, %475 : vector<4x256xf32>
    %477 = vector.extract_strided_slice %470 {offsets = [0, 1], sizes = [4, 1], strides = [1, 1]} : vector<4x4xf32> to vector<4x1xf32>
    %478 = vector.extract_strided_slice %468 {offsets = [1, 0], sizes = [1, 256], strides = [1, 1]} : vector<4x256xf32> to vector<1x256xf32>
    %479 = vector.broadcast %477 : vector<4x1xf32> to vector<4x256xf32>
    %480 = vector.broadcast %478 : vector<1x256xf32> to vector<4x256xf32>
    %481 = arith.mulf %479, %480 : vector<4x256xf32>
    %482 = arith.addf %476, %481 : vector<4x256xf32>
    %483 = vector.extract_strided_slice %470 {offsets = [0, 2], sizes = [4, 1], strides = [1, 1]} : vector<4x4xf32> to vector<4x1xf32>
    %484 = vector.extract_strided_slice %468 {offsets = [2, 0], sizes = [1, 256], strides = [1, 1]} : vector<4x256xf32> to vector<1x256xf32>
    %485 = vector.broadcast %483 : vector<4x1xf32> to vector<4x256xf32>
    %486 = vector.broadcast %484 : vector<1x256xf32> to vector<4x256xf32>
    %487 = arith.mulf %485, %486 : vector<4x256xf32>
    %488 = arith.addf %482, %487 : vector<4x256xf32>
    %489 = vector.extract_strided_slice %470 {offsets = [0, 3], sizes = [4, 1], strides = [1, 1]} : vector<4x4xf32> to vector<4x1xf32>
    %490 = vector.extract_strided_slice %468 {offsets = [3, 0], sizes = [1, 256], strides = [1, 1]} : vector<4x256xf32> to vector<1x256xf32>
    %491 = vector.broadcast %489 : vector<4x1xf32> to vector<4x256xf32>
    %492 = vector.broadcast %490 : vector<1x256xf32> to vector<4x256xf32>
    %493 = arith.mulf %491, %492 : vector<4x256xf32>
    %494 = arith.addf %488, %493 : vector<4x256xf32>
    %c0_117 = arith.constant 0 : index
    %c33_118 = arith.constant 33 : index
    %495 = vector.load %arg6[%c0_117, %c33_118] : memref<4x290xf32, #tpu.memory_space<vmem>>, vector<4x256xf32>
    %c7_119 = arith.constant 7 : index
    %c0_120 = arith.constant 0 : index
    %c0_121 = arith.constant 0 : index
    %496 = vector.load %arg4[%c7_119, %c0_120, %c0_121] : memref<9x4x4xf32, #tpu.memory_space<vmem>>, vector<1x4x4xf32>
    %497 = vector.shape_cast %496 : vector<1x4x4xf32> to vector<4x4xf32>
    %498 = vector.extract_strided_slice %497 {offsets = [0, 0], sizes = [4, 1], strides = [1, 1]} : vector<4x4xf32> to vector<4x1xf32>
    %499 = vector.extract_strided_slice %495 {offsets = [0, 0], sizes = [1, 256], strides = [1, 1]} : vector<4x256xf32> to vector<1x256xf32>
    %500 = vector.broadcast %498 : vector<4x1xf32> to vector<4x256xf32>
    %501 = vector.broadcast %499 : vector<1x256xf32> to vector<4x256xf32>
    %502 = arith.mulf %500, %501 : vector<4x256xf32>
    %503 = arith.addf %494, %502 : vector<4x256xf32>
    %504 = vector.extract_strided_slice %497 {offsets = [0, 1], sizes = [4, 1], strides = [1, 1]} : vector<4x4xf32> to vector<4x1xf32>
    %505 = vector.extract_strided_slice %495 {offsets = [1, 0], sizes = [1, 256], strides = [1, 1]} : vector<4x256xf32> to vector<1x256xf32>
    %506 = vector.broadcast %504 : vector<4x1xf32> to vector<4x256xf32>
    %507 = vector.broadcast %505 : vector<1x256xf32> to vector<4x256xf32>
    %508 = arith.mulf %506, %507 : vector<4x256xf32>
    %509 = arith.addf %503, %508 : vector<4x256xf32>
    %510 = vector.extract_strided_slice %497 {offsets = [0, 2], sizes = [4, 1], strides = [1, 1]} : vector<4x4xf32> to vector<4x1xf32>
    %511 = vector.extract_strided_slice %495 {offsets = [2, 0], sizes = [1, 256], strides = [1, 1]} : vector<4x256xf32> to vector<1x256xf32>
    %512 = vector.broadcast %510 : vector<4x1xf32> to vector<4x256xf32>
    %513 = vector.broadcast %511 : vector<1x256xf32> to vector<4x256xf32>
    %514 = arith.mulf %512, %513 : vector<4x256xf32>
    %515 = arith.addf %509, %514 : vector<4x256xf32>
    %516 = vector.extract_strided_slice %497 {offsets = [0, 3], sizes = [4, 1], strides = [1, 1]} : vector<4x4xf32> to vector<4x1xf32>
    %517 = vector.extract_strided_slice %495 {offsets = [3, 0], sizes = [1, 256], strides = [1, 1]} : vector<4x256xf32> to vector<1x256xf32>
    %518 = vector.broadcast %516 : vector<4x1xf32> to vector<4x256xf32>
    %519 = vector.broadcast %517 : vector<1x256xf32> to vector<4x256xf32>
    %520 = arith.mulf %518, %519 : vector<4x256xf32>
    %521 = arith.addf %515, %520 : vector<4x256xf32>
    %c0_122 = arith.constant 0 : index
    %c34_123 = arith.constant 34 : index
    %522 = vector.load %arg6[%c0_122, %c34_123] : memref<4x290xf32, #tpu.memory_space<vmem>>, vector<4x256xf32>
    %c0_124 = arith.constant 0 : index
    %c32_125 = arith.constant 32 : index
    %523 = vector.load %arg6[%c0_124, %c32_125] : memref<4x290xf32, #tpu.memory_space<vmem>>, vector<4x256xf32>
    %524 = arith.select %8, %523, %522 : vector<4x256xi1>, vector<4x256xf32>
    %c8_126 = arith.constant 8 : index
    %c0_127 = arith.constant 0 : index
    %c0_128 = arith.constant 0 : index
    %525 = vector.load %arg4[%c8_126, %c0_127, %c0_128] : memref<9x4x4xf32, #tpu.memory_space<vmem>>, vector<1x4x4xf32>
    %526 = vector.shape_cast %525 : vector<1x4x4xf32> to vector<4x4xf32>
    %527 = vector.extract_strided_slice %526 {offsets = [0, 0], sizes = [4, 1], strides = [1, 1]} : vector<4x4xf32> to vector<4x1xf32>
    %528 = vector.extract_strided_slice %524 {offsets = [0, 0], sizes = [1, 256], strides = [1, 1]} : vector<4x256xf32> to vector<1x256xf32>
    %529 = vector.broadcast %527 : vector<4x1xf32> to vector<4x256xf32>
    %530 = vector.broadcast %528 : vector<1x256xf32> to vector<4x256xf32>
    %531 = arith.mulf %529, %530 : vector<4x256xf32>
    %532 = arith.addf %521, %531 : vector<4x256xf32>
    %533 = vector.extract_strided_slice %526 {offsets = [0, 1], sizes = [4, 1], strides = [1, 1]} : vector<4x4xf32> to vector<4x1xf32>
    %534 = vector.extract_strided_slice %524 {offsets = [1, 0], sizes = [1, 256], strides = [1, 1]} : vector<4x256xf32> to vector<1x256xf32>
    %535 = vector.broadcast %533 : vector<4x1xf32> to vector<4x256xf32>
    %536 = vector.broadcast %534 : vector<1x256xf32> to vector<4x256xf32>
    %537 = arith.mulf %535, %536 : vector<4x256xf32>
    %538 = arith.addf %532, %537 : vector<4x256xf32>
    %539 = vector.extract_strided_slice %526 {offsets = [0, 2], sizes = [4, 1], strides = [1, 1]} : vector<4x4xf32> to vector<4x1xf32>
    %540 = vector.extract_strided_slice %524 {offsets = [2, 0], sizes = [1, 256], strides = [1, 1]} : vector<4x256xf32> to vector<1x256xf32>
    %541 = vector.broadcast %539 : vector<4x1xf32> to vector<4x256xf32>
    %542 = vector.broadcast %540 : vector<1x256xf32> to vector<4x256xf32>
    %543 = arith.mulf %541, %542 : vector<4x256xf32>
    %544 = arith.addf %538, %543 : vector<4x256xf32>
    %545 = vector.extract_strided_slice %526 {offsets = [0, 3], sizes = [4, 1], strides = [1, 1]} : vector<4x4xf32> to vector<4x1xf32>
    %546 = vector.extract_strided_slice %524 {offsets = [3, 0], sizes = [1, 256], strides = [1, 1]} : vector<4x256xf32> to vector<1x256xf32>
    %547 = vector.broadcast %545 : vector<4x1xf32> to vector<4x256xf32>
    %548 = vector.broadcast %546 : vector<1x256xf32> to vector<4x256xf32>
    %549 = arith.mulf %547, %548 : vector<4x256xf32>
    %550 = arith.addf %544, %549 : vector<4x256xf32>
    %cst_129 = arith.constant dense<0.000000e+00> : vector<4xf32>
    %551 = vector.multi_reduction <add>, %550, %cst_129 [1] : vector<4x256xf32> to vector<4xf32>
    %552 = vector.shape_cast %551 : vector<4xf32> to vector<4x1xf32>
    %cst_130 = arith.constant 2.560000e+02 : f32
    %553 = vector.broadcast %cst_130 : f32 to vector<4x1xf32>
    %554 = arith.divf %552, %553 : vector<4x1xf32>
    %555 = vector.broadcast %554 : vector<4x1xf32> to vector<4x256xf32>
    %556 = arith.subf %550, %555 : vector<4x256xf32>
    %557 = arith.mulf %556, %556 : vector<4x256xf32>
    %cst_131 = arith.constant dense<0.000000e+00> : vector<4xf32>
    %558 = vector.multi_reduction <add>, %557, %cst_131 [1] : vector<4x256xf32> to vector<4xf32>
    %559 = vector.shape_cast %558 : vector<4xf32> to vector<4x1xf32>
    %cst_132 = arith.constant 2.560000e+02 : f32
    %560 = vector.broadcast %cst_132 : f32 to vector<4x1xf32>
    %561 = arith.divf %559, %560 : vector<4x1xf32>
    %562 = vector.broadcast %554 : vector<4x1xf32> to vector<4x256xf32>
    %563 = arith.subf %550, %562 : vector<4x256xf32>
    %cst_133 = arith.constant 9.99999974E-6 : f32
    %564 = vector.broadcast %cst_133 : f32 to vector<4x1xf32>
    %565 = arith.addf %561, %564 : vector<4x1xf32>
    %566 = math.rsqrt %565 : vector<4x1xf32>
    %567 = vector.broadcast %566 : vector<4x1xf32> to vector<4x256xf32>
    %568 = arith.mulf %563, %567 : vector<4x256xf32>
    %569 = arith.addf %1, %568 : vector<4x256xf32>
    %c0_134 = arith.constant 0 : index
    %c0_135 = arith.constant 0 : index
    %c0_136 = arith.constant 0 : index
    %570 = vector.load %arg5[%c0_134, %c0_135, %c0_136] : memref<1x4x256xf32, #tpu.memory_space<vmem>>, vector<1x4x256xf32>
    %571 = vector.shape_cast %570 : vector<1x4x256xf32> to vector<4x256xf32>
    %572 = vector.shape_cast %569 : vector<4x256xf32> to vector<1x4x256xf32>
    tpu.vector_store %arg5[%c0_134, %c0_135, %c0_136], %572 {strides = array<i32>} : memref<1x4x256xf32, #tpu.memory_space<vmem>>, vector<1x4x256xf32>,
    return
  }
  func.func @transform_0(%arg0: i32) -> (i32, i32) {
    %c0_i32 = arith.constant 0 : i32
    %c0_i32_0 = arith.constant 0 : i32
    %c0_i32_1 = arith.constant 0 : i32
    return %c0_i32, %c0_i32_0 : i32, i32
  }
  func.func @transform_1(%arg0: i32) -> (i32, i32, i32) {
    %c0_i32 = arith.constant 0 : i32
    %c0_i32_0 = arith.constant 0 : i32
    %c0_i32_1 = arith.constant 0 : i32
    return %arg0, %c0_i32, %c0_i32_0 : i32, i32, i32
  }
  func.func @transform_2(%arg0: i32) -> (i32, i32, i32) {
    %c0_i32 = arith.constant 0 : i32
    %c0_i32_0 = arith.constant 0 : i32
    %c0_i32_1 = arith.constant 0 : i32
    %c0_i32_2 = arith.constant 0 : i32
    return %c0_i32, %c0_i32_0, %c0_i32_1 : i32, i32, i32
  }
  func.func @transform_3(%arg0: i32) -> (i32, i32, i32) {
    %c0_i32 = arith.constant 0 : i32
    %c0_i32_0 = arith.constant 0 : i32
    %c0_i32_1 = arith.constant 0 : i32
    %c0_i32_2 = arith.constant 0 : i32
    return %c0_i32, %c0_i32_0, %c0_i32_1 : i32, i32, i32
  }
  func.func @transform_4(%arg0: i32) -> (i32, i32, i32) {
    %c0_i32 = arith.constant 0 : i32
    %c0_i32_0 = arith.constant 0 : i32
    %c0_i32_1 = arith.constant 0 : i32
    return %arg0, %c0_i32, %c0_i32_0 : i32, i32, i32
  }
}

</mosaic_0001>

<bundles_post_ra>
// kernel: resnet_block.1
= control target key start
LH: loop header
LB: loop body
LE: loop exit
PB: predicated region body
PF: predicated region fallthrough
CT: control target
= control target key end

     0   :  { %s2256_s15 = smov 0   ;;  %s3599_s0 = inlined_call_operand.vmem [shape: s32[1,256], index: 0, kind: input, shape index: {}]   ;;  %s3600_s1 = inlined_call_operand.vmem [shape: f32[2,4,256], index: 1, kind: input, shape index: {}]   ;;  %s3601_s2 = inlined_call_operand.vmem [shape: f32[9,4,4], index: 2, kind: input, shape index: {}]   ;;  %s3602_s3 = inlined_call_operand.vmem [shape: f32[9,4,4], index: 3, kind: input, shape index: {}]   ;;  %s3603_s4 = inlined_call_operand.vmem [shape: f32[2,4,256], index: 4, kind: output, shape index: {}]  }
   0x1 LB: > { %s2089_s16 = sadd.s32 4294967295, %s2214_s15   ;;  %p2093_p0 = scmp.ge.s32.totalorder %s2214_s15, 1  ;;  %s2214_s15 = sphi %s2256_s15, %s14_s15  }
   0x2   : > { %p162_p1 = scmp.lt.s32.totalorder %s2214_s15, 3 }
   0x4   : > { %p163_p2 = pnand %p2093_p0, %p162_p1 }
   0x6   : > { %166 = sbr.rel (%p163_p2) target bundleno = 1731 (0x6c3), region = 36 }
   0xb   : > { %p188_p3 = scmp.lt.s32.totalorder %s2089_s16, 1  ;;  %v3610_v0 = vmov 2   ;;  %v2268_v1 = vld [vmem:[%s3601_s2] sm:$0xf]  ;;  %v3604_v2 = vmov 1   ;;  %s2218_s23 = smov 17  }
   0xc   : > { %2151 = vset.pattern.permute.xlu0 %v3610_v0  ;;  %2142 = vset.pattern.permute.xlu2 %v3610_v0  ;;  %v3606_v4 = vmov 3   ;;  %v2100_v5 = vld [vmem:[%s3601_s2 + $0xc] sm:$0xf]  ;;  %v2098_v6 = vld [vmem:[%s3601_s2 + $0x4] sm:$0xf]  ;;  %v3608_v8 = vmov 0  }
   0xd   : > { %s3731_s16 = smov (!%p188_p3, %s2089_s16), 1  ;;  %2141 = vset.pattern.permute.xlu1 %v3604_v2  ;;  %288 = vperm.xlu2 %2142, %v2268_v1   ;;  %v2099_v7 = vld [vmem:[%s3601_s2 + $0x8] sm:$0xf]  ;;  %v2101_v9 = vld [vmem:[%s3601_s2 + $0x10] sm:$0xf]  ;;  %vm214_vm0 = vcmask 1043592  }
   0xe   : > { %278 = vperm.xlu1 %2141, %v2268_v1   ;;  %s2116_s19 = sshll.u32 %s3731_s16, 3  ;;  %v2102_v10 = vld [vmem:[%s3601_s2 + $0x14] sm:$0xf]  ;;  %v2104_v11 = vld [vmem:[%s3601_s2 + $0x1c] sm:$0xf]  ;;  %vm215_vm1 = vcmask 1047556  }
   0xf   : > { %s2282_s22 = scalar_lea.vmem %s3600_s1, %s2116_s19  ;;  %v2103_v12 = vld [vmem:[%s3601_s2 + $0x18] sm:$0xf]  ;;  %vm210_vm2 = vcmask 138240   ;;  %vm218_vm3 = vcmask 134144   ;;  %vm2331_vm4 = vmor %vm215_vm1, %vm214_vm0  ;;  %v3638_v14 = vmov 0  ;;  %s2221_s12 = smov 32  }
  0x10   : > { %v198_v3 = vld [vmem:[%s2282_s22] sm:$0xff]  ;;  %v3639_v14 = vsel %vm2331_vm4, 4294967295, %v3638_v14  ;;  %s2222_s13 = smov 96   ;;  %vm225_vm5 = vcmask 134152   ;;  %vm232_vm6 = vcmask 261120   ;;  %vm235_vm7 = vcmask 265352  }
  0x11   : > { %207 = vrot.lane.b32.xlu0 %v198_v3, %s2218_s23  ;;  %3640 = vst [vmem:[#allocation3_spill] sm:$0xff] %v3639_v14  ;;  %s2223_s14 = smov 127   ;;  %s2224_s17 = smov 111   ;;  %vm3622_vm9 = vcmask 1031168   ;;  %vm339_vm10 = vcmask 1039360   ;;  %vm3627_vm13 = vcmask 916480  }
  0x12   : > { %s2225_s18 = smov 95   ;;  %s2226_s20 = smov 126   ;;  %vm3626_vm14 = vcmask 900096   ;;  %vm3623_vm0 = vcmask 908288   ;;  %vm3624_vm1 = vcmask 785408  }
  0x13   : > { %s2227_s21 = smov 110   ;;  %s2228_s24 = smov 112  }
  0x14   : > { %s2229_s25 = smov 94  }
  0x15   : > { %2144 = vset.pattern.permute.xlu2 %v3608_v8 }
  0x16   : > { %2143 = vset.pattern.permute.xlu1 %v3606_v4  ;;  %313 = vperm.xlu2 %2144, %v2098_v6  }
  0x17   : > { %298 = vperm.xlu1 %2143, %v2268_v1  }
  0x19   : > { %569 = vperm.xlu0 %2151, %v2100_v5  }
  0x1e   : > { %2145 = vset.pattern.permute.xlu2 %v3610_v0 }
  0x1f   : > { %2147 = vset.pattern.permute.xlu1 %v3610_v0  ;;  %378 = vperm.xlu2 %2145, %v2098_v6  }
  0x20   : > { %486 = vperm.xlu1 %2147, %v2099_v7  }
  0x21   : > { %2152 = vset.pattern.permute.xlu0 %v3606_v4 }
  0x22   : > { %409 = vperm.xlu0 %2152, %v2098_v6  }
  0x27   : > { %2146 = vset.pattern.permute.xlu2 %v3608_v8 }
  0x28   : > { %2149 = vset.pattern.permute.xlu1 %v3608_v8  ;;  %466 = vperm.xlu2 %2146, %v2099_v7  }
  0x29   : > { %549 = vperm.xlu1 %2149, %v2100_v5  }
  0x2a   : > { %690 = vperm.xlu0 %2152, %v2101_v9  }
  0x30   : > { %2148 = vset.pattern.permute.xlu2 %v3606_v4 }
  0x31   : > { %2153 = vset.pattern.permute.xlu1 %v3606_v4  ;;  %496 = vperm.xlu2 %2148, %v2099_v7  }
  0x32   : > { %579 = vperm.xlu1 %2153, %v2100_v5   ;;  %2157 = vset.pattern.permute.xlu0 %v3604_v2 }
  0x33   : > { %347 = vperm.xlu0 %2157, %v2098_v6  }
  0x39   : > { %2150 = vset.pattern.permute.xlu2 %v3604_v2 }
  0x3a   : > { %2155 = vset.pattern.permute.xlu1 %v3604_v2  ;;  %559 = vperm.xlu2 %2150, %v2100_v5  }
  0x3b   : > { %628 = vperm.xlu1 %2155, %v2101_v9   ;;  %476 = vperm.xlu0 %2157, %v2099_v7  }
  0x42   : > { %2154 = vset.pattern.permute.xlu2 %v3608_v8 }
  0x43   : > { %2159 = vset.pattern.permute.xlu1 %v3610_v0  ;;  %768 = vperm.xlu0 %2157, %v2102_v10  }
  0x44   : > { %778 = vperm.xlu1 %2159, %v2102_v10   ;;  %594 = vperm.xlu2 %2154, %v2101_v9  }
  0x4b   : > { %920 = vperm.xlu0 %2157, %v2104_v11  }
  0x4c   : > { %2161 = vset.pattern.permute.xlu1 %v3608_v8  ;;  %2156 = vset.pattern.permute.xlu2 %v3610_v0 }
  0x4d   : > { %841 = vperm.xlu1 %2161, %v2103_v12   ;;  %659 = vperm.xlu2 %2156, %v2101_v9  }
  0x53   : > { %851 = vperm.xlu0 %2157, %v2103_v12  }
  0x55   : > { %2163 = vset.pattern.permute.xlu1 %v3610_v0  ;;  %2158 = vset.pattern.permute.xlu2 %v3608_v8 }
  0x56   : > { %951 = vperm.xlu1 %2163, %v2104_v11   ;;  %758 = vperm.xlu2 %2158, %v2102_v10  }
  0x5b   : > { %2165 = vset.pattern.permute.xlu0 %v3608_v8 }
  0x5e   : > { %861 = vperm.xlu1 %2163, %v2103_v12   ;;  %2160 = vset.pattern.permute.xlu2 %v3606_v4 }
  0x5f   : > { %788 = vperm.xlu2 %2160, %v2102_v10  }
  0x66   : > { %2166 = vset.pattern.permute.xlu1 %v3604_v2 }
  0x67   : > { %2162 = vset.pattern.permute.xlu2 %v3608_v8  ;;  %v2359_v27 = vpop.permute.xlu2 %288 }
  0x68   : > { %886 = vperm.xlu2 %2162, %v2104_v11  }
  0x70   : > { %2164 = vset.pattern.permute.xlu2 %v3606_v4  ;;  %v2365_v30 = vpop.permute.xlu2 %313 }
  0x71   : > { %982 = vperm.xlu2 %2164, %v2104_v11  }
  0x79   : > { %871 = vperm.xlu2 %2164, %v2103_v12   ;;  %v2371_v33 = vpop.permute.xlu2 %378 }
  0x80   : > { %v2343_v19 = vpop.permute.xlu1 %278 }
  0x81   : > { %2167 = vset.pattern.permute.xlu2 %v3610_v0 }
  0x82   : > { %v2377_v36 = vpop.permute.xlu2 %466 }
  0x83   : > { %v208_v13 = vpop.permute.xlu0 %207 }
  0x84   : > { %v209_v15 = vrot.slane %v208_v13, 4 }
  0x86   : > { %v211_v16 = vsel %vm210_vm2, %v209_v15, %v208_v13  ;;  %219 = vst.msk [vmem:[#allocation2 + $0x8] sm:$0xf] %vm218_vm3, %v209_v15 }
  0x87   : > { %217 = vst.msk [vmem:[#allocation2] sm:$0xff] %vm2331_vm4, %v211_v16 }
  0x89   : > { %v2345_v20 = vpop.permute.xlu1 %298 }
  0x8b   : > { %v2349_v22 = vpop.permute.xlu0 %569  ;;  %v2383_v39 = vpop.permute.xlu2 %496 }
  0x8e   : > { %v227_v17 = vld [vmem:[#allocation2 + $0x4] sm:$0xff]  ;;  %v220_v18 = vld [vmem:[#allocation2] sm:$0xf] }
  0x8f   : > { %229 = vrot.lane.b32.xlu1 %v227_v17, %s2221_s12  ;;  %222 = vrot.lane.b32.xlu0 %v220_v18, %s2222_s13 }
  0x92   : > { %v2347_v21 = vpop.permute.xlu1 %486 }
  0x94   : > { %v2353_v24 = vpop.permute.xlu0 %409  ;;  %v2389_v42 = vpop.permute.xlu2 %559 }
  0x97   : > { %268 = vperm.xlu0 %2165, %v2268_v1  }
  0x9b   : > { %v2351_v23 = vpop.permute.xlu1 %549 }
  0x9c   : > { %v2357_v26 = vpop.permute.xlu0 %690 }
  0x9e   : > { %v2394_v47 = vpop.permute.xlu2 %594 }
  0xa4   : > { %v2355_v25 = vpop.permute.xlu1 %579 }
  0xa5   : > { %v2363_v29 = vpop.permute.xlu0 %347 }
  0xa7   : > { %v2417_v62 = vpop.permute.xlu2 %659 }
  0xad   : > { %v2361_v28 = vpop.permute.xlu1 %628  ;;  %v2369_v32 = vpop.permute.xlu0 %476 }
  0xb0   : > { %v2447_v16 = vpop.permute.xlu2 %758 }
  0xb5   : > { %v2375_v35 = vpop.permute.xlu0 %768 }
  0xb6   : > { %v2367_v31 = vpop.permute.xlu1 %778 }
  0xbd   : > { %v2381_v38 = vpop.permute.xlu0 %920 }
  0xbf   : > { %v2373_v34 = vpop.permute.xlu1 %841 }
  0xc0   : > { %3641 = vst [vmem:[#allocation4_spill] sm:$0xff] %v2373_v34 }
  0xc5   : > { %v2387_v41 = vpop.permute.xlu0 %851 }
  0xc6   : > { %3643 = vst [vmem:[#allocation6_spill] sm:$0xff] %v2387_v41 }
  0xc8   : > { %v2379_v37 = vpop.permute.xlu1 %951 }
  0xd0   : > { %v2385_v40 = vpop.permute.xlu1 %861 }
  0xd1   : > { %3642 = vst [vmem:[#allocation5_spill] sm:$0xff] %v2385_v40 }
 0x101   : > { %v230_v43 = vpop.permute.xlu1 %229  ;;  %v223_v44 = vpop.permute.xlu0 %222 }
 0x102   : > { %v231_v45 = vrot.slane %v230_v43, 4  ;;  %226 = vst.msk [vmem:[#allocation2] sm:$0xf] %vm225_vm5, %v223_v44 }
 0x104   : > { %v233_v46 = vsel %vm232_vm6, %v230_v43, %v231_v45 }
 0x105   : > { %236 = vst.msk [vmem:[#allocation2 + $0x8] sm:$0xf] %vm235_vm7, %v233_v46 }
 0x109   : > { %v2396_v48 = vld [vmem:[#allocation2] sm:$0xff] }
 0x10a   : > { %241 = vst [vmem:[#allocation1] ss:$2 sm:$0xff] %v2396_v48  ;;  %v351_v49 = vperm.slane %v2396_v48, 5  ;;  %v319_v50 = vperm.slane %v2396_v48, 4  ;;  %v318_v51 = vperm.slane %v2396_v48, 0  ;;  %v413_v56 = vperm.slane %v2396_v48, 7 }
 0x10b   : > { %v350_v60 = vperm.slane %v2396_v48, 1  ;;  %v381_v61 = vperm.slane %v2396_v48, 2  ;;  %v382_v11 = vperm.slane %v2396_v48, 6  ;;  %v412_v46 = vperm.slane %v2396_v48, 3 }
 0x10c   : > { %v238_v52 = vld [vmem:[#allocation2 + $0x8] sm:$0xf]  ;;  %v2402_v53 = vperm.slane %v351_v49, 1  ;;  %v2404_v54 = vperm.slane %v319_v50, 0  ;;  %v2406_v55 = vperm.slane %v318_v51, 0  ;;  %v2427_v3 = vperm.slane %v413_v56, 3 }
 0x10d   : > { %243 = vst [vmem:[#allocation1 + $0x10] ss:$2 sm:$0xff] %v238_v52  ;;  %v356_v5 = vperm.slane %v350_v60, 1  ;;  %v2431_v7 = vperm.slane %v381_v61, 2  ;;  %v2449_v17 = vperm.slane %v382_v11, 2 }
 0x10e   : > { %v360_v57 = vmul.f32 %v2402_v53, %v2363_v29  ;;  %v328_v58 = vmul.f32 %v2404_v54, %v2365_v30  ;;  %v327_v59 = vmul.f32 %v2406_v55, %v2365_v30  ;;  %v422_v9 = vmul.f32 %v2427_v3, %v2353_v24  ;;  %v506_v43 = vld [vmem:[#allocation2 + $0x8] sm:$0xf] }
 0x10f   : > { %v359_v10 = vmul.f32 %v356_v5, %v2363_v29  ;;  %v390_v12 = vmul.f32 %v2431_v7, %v2371_v33  ;;  %v609_v44 = vmul.f32 %v2394_v47, %v2404_v54  ;;  %v391_v45 = vmul.f32 %v2449_v17, %v2371_v33  ;;  %v798_v4 = vld [vmem:[#allocation2 + $0x8] sm:$0xf] }
 0x110   : > { %367 = vrot.lane.b32.xlu2 %v360_v57, %s2223_s14  ;;  %335 = vrot.lane.b32.xlu1 %v328_v58, %s2223_s14  ;;  %v641_v49 = vmul.f32 %v2361_v28, %v2402_v53  ;;  %v2470_v57 = vpop.permute.xlu2 %788  ;;  %v640_v58 = vmul.f32 %v2361_v28, %v356_v5  ;;  %v671_v60 = vmul.f32 %v2417_v62, %v2431_v7 }
 0x111   : > { %v2419_v63 = vld.sshfl [vmem:[#allocation1] sm:$0xff pattern:$0x75316420]  ;;  %v2421_v1 = vld.sshfl [vmem:[#allocation1 + $0x8] sm:$0xff pattern:$0x75316420]  ;;  %333 = vrot.lane.b32.xlu0 %v327_v59, %s2223_s14  ;;  %v932_v2 = vmul.f32 %v2381_v38, %v356_v5 }
 0x112   : > { %258 = vst [vmem:[#allocation1] ss:$2 sm:$0xff] %v2396_v48 }
 0x113   : > { %3644 = vst [vmem:[#allocation7_spill] sm:$0xff] %v2470_v57 }
 0x114   : > { %v2429_v6 = vld.sshfl [vmem:[#allocation1 + $0x10] sm:$0xff pattern:$0x75316420] }
 0x115   : > { %446 = vst [vmem:[#allocation1 + $0x10] ss:$2 sm:$0xff] %v238_v52  ;;  %v418_v52 = vperm.slane %v412_v46, 3 }
 0x117   : > { %v421_v59 = vmul.f32 %v418_v52, %v2353_v24  ;;  %v702_v5 = vmul.f32 %v2357_v26, %v418_v52 }
 0x118   : > { %429 = vrot.lane.b32.xlu2 %v422_v9, %s2223_s14  ;;  %365 = vrot.lane.b32.xlu1 %v359_v10, %s2223_s14  ;;  %v2486_v11 = vpop.permute.xlu2 %886 }
 0x119   : > { %v2439_v13 = vld.sshfl [vmem:[#allocation1] sm:$0xff pattern:$0x75316420]  ;;  %v2441_v15 = vld.sshfl [vmem:[#allocation1 + $0x8] sm:$0xff pattern:$0x75316420]  ;;  %396 = vrot.lane.b32.xlu0 %v390_v12, %s2223_s14  ;;  %v703_v12 = vmul.f32 %v2357_v26, %v2427_v3 }
 0x11a   : > { %439 = vst [vmem:[#allocation1] ss:$2 sm:$0xff] %v2396_v48 }
 0x11c   : > { %v2451_v18 = vld.sshfl [vmem:[#allocation1 + $0x10] sm:$0xff pattern:$0x75316420] }
 0x11d   : > { %511 = vst [vmem:[#allocation1 + $0x10] ss:$2 sm:$0xff] %v506_v43 }
 0x120   : > { %616 = vrot.lane.b32.xlu2 %v609_v44, %s2224_s17  ;;  %398 = vrot.lane.b32.xlu1 %v391_v45, %s2223_s14  ;;  %v608_v44 = vmul.f32 %v2394_v47, %v2406_v55  ;;  %v900_v45 = vmul.f32 %v2486_v11, %v2406_v55  ;;  %v672_v55 = vmul.f32 %v2417_v62, %v2449_v17 }
 0x121   : > { %v2460_v50 = vld.sshfl [vmem:[#allocation1] sm:$0xff pattern:$0x75316420]  ;;  %v2462_v51 = vld.sshfl [vmem:[#allocation1 + $0x8] sm:$0xff pattern:$0x75316420]  ;;  %648 = vrot.lane.b32.xlu0 %v641_v49, %s2224_s17 }
 0x122   : > { %444 = vst [vmem:[#allocation1] ss:$2 sm:$0xff] %v2396_v48 }
 0x124   : > { %v2468_v56 = vld.sshfl [vmem:[#allocation1 + $0x10] sm:$0xff pattern:$0x75316420] }
 0x125   : > { %528 = vst [vmem:[#allocation1 + $0x10] ss:$2 sm:$0xff] %v506_v43 }
 0x128   : > { %646 = vrot.lane.b32.xlu2 %v640_v58, %s2224_s17  ;;  %427 = vrot.lane.b32.xlu1 %v421_v59, %s2223_s14  ;;  %v2504_v59 = vld [vmem:[#allocation2 + $0x8] sm:$0xf] }
 0x129   : > { %v2476_v61 = vld.sshfl [vmem:[#allocation1] sm:$0xff pattern:$0x75316420]  ;;  %v2478_v9 = vld.sshfl [vmem:[#allocation1 + $0x8] sm:$0xff pattern:$0x75316420]  ;;  %677 = vrot.lane.b32.xlu0 %v671_v60, %s2224_s17 }
 0x12a   : > { %509 = vst [vmem:[#allocation1] ss:$2 sm:$0xff] %v2396_v48  ;;  %v320_v60 = vperm.slane %v2504_v59, 0  ;;  %v383_v0 = vperm.slane %v2504_v59, 2 }
 0x12c   : > { %v2484_v10 = vld.sshfl [vmem:[#allocation1 + $0x10] sm:$0xff pattern:$0x75316420] }
 0x12d   : > { %722 = vst [vmem:[#allocation1 + $0x10] ss:$2 sm:$0xff] %v506_v43 }
 0x130   : > { %710 = vrot.lane.b32.xlu2 %v703_v12, %s2224_s17  ;;  %614 = vrot.lane.b32.xlu1 %v608_v44, %s2224_s17 }
 0x131   : > { %v2494_v46 = vld.sshfl [vmem:[#allocation1] sm:$0xff pattern:$0x75316420]  ;;  %v2496_v49 = vld.sshfl [vmem:[#allocation1 + $0x8] sm:$0xff pattern:$0x75316420]  ;;  %906 = vrot.lane.b32.xlu0 %v900_v45, %s2225_s18 }
 0x132   : > { %526 = vst [vmem:[#allocation1] ss:$2 sm:$0xff] %v2396_v48 }
 0x134   : > { %v2502_v58 = vld.sshfl [vmem:[#allocation1 + $0x10] sm:$0xff pattern:$0x75316420] }
 0x135   : > { %738 = vst [vmem:[#allocation1 + $0x10] ss:$2 sm:$0xff] %v506_v43  ;;  %v326_v43 = vperm.slane %v320_v60, 0  ;;  %v2534_v60 = vld [vmem:[#allocation2 + $0x8] sm:$0xf] }
 0x137   : > { %v329_v8 = vmul.f32 %v326_v43, %v2365_v30  ;;  %v2538_v43 = vpop.permute.xlu2 %982 }
 0x138   : > { %679 = vrot.lane.b32.xlu1 %v672_v55, %s2224_s17  ;;  %249 = vrot.lane.b32.xlu2 %v2421_v1, %s2226_s20  ;;  %v963_v55 = vmul.f32 %v2379_v37, %v2431_v7  ;;  %v389_v1 = vperm.slane %v383_v0, 2  ;;  %v901_v7 = vmul.f32 %v2486_v11, %v2404_v54  ;;  %v994_v40 = vmul.f32 %v2538_v43, %v418_v52 }
 0x139   : > { %v2510_v12 = vld.sshfl [vmem:[#allocation1] sm:$0xff pattern:$0x75316420]  ;;  %v2512_v44 = vld.sshfl [vmem:[#allocation1 + $0x8] sm:$0xff pattern:$0x75316420]  ;;  %938 = vrot.lane.b32.xlu0 %v932_v2, %s2225_s18  ;;  %v933_v52 = vmul.f32 %v2381_v38, %v2402_v53 }
 0x13a   : > { %720 = vst [vmem:[#allocation1] ss:$2 sm:$0xff] %v2396_v48 }
 0x13c   : > { %v2519_v45 = vld.sshfl [vmem:[#allocation1 + $0x10] sm:$0xff pattern:$0x75316420] }
 0x13d   : > { %803 = vst [vmem:[#allocation1 + $0x10] ss:$2 sm:$0xff] %v798_v4 }
 0x140   : > { %708 = vrot.lane.b32.xlu1 %v702_v5, %s2224_s17  ;;  %337 = vrot.lane.b32.xlu2 %v329_v8, %s2223_s14  ;;  %v392_v5 = vmul.f32 %v389_v1, %v2371_v33  ;;  %v664_v8 = vperm.slane %v2534_v60, 2  ;;  %v2554_v1 = vld [vmem:[#allocation2 + $0x8] sm:$0xf] }
 0x141   : > { %v2526_v14 = vld.sshfl [vmem:[#allocation1] sm:$0xff pattern:$0x75316420]  ;;  %v2530_v2 = vld.sshfl [vmem:[#allocation1 + $0x8] sm:$0xff pattern:$0x75316420]  ;;  %969 = vrot.lane.b32.xlu0 %v963_v55, %s2225_s18 }
 0x142   : > { %736 = vst [vmem:[#allocation1] ss:$2 sm:$0xff] %v2396_v48  ;;  %v601_v55 = vperm.slane %v2534_v60, 0  ;;  %v670_v54 = vperm.slane %v664_v8, 2 }
 0x144   : > { %v2536_v30 = vld.sshfl [vmem:[#allocation1 + $0x10] sm:$0xff pattern:$0x75316420]  ;;  %v607_v33 = vperm.slane %v601_v55, 0 }
 0x145   : > { %820 = vst [vmem:[#allocation1 + $0x10] ss:$2 sm:$0xff] %v798_v4 }
 0x146   : > { %v610_v57 = vmul.f32 %v607_v33, %v2394_v47 }
 0x148   : > { %908 = vrot.lane.b32.xlu1 %v901_v7, %s2225_s18  ;;  %400 = vrot.lane.b32.xlu2 %v392_v5, %s2223_s14  ;;  %v673_v7 = vmul.f32 %v670_v54, %v2417_v62  ;;  %v893_v5 = vperm.slane %v2554_v1, 0  ;;  %v964_v62 = vmul.f32 %v2379_v37, %v2449_v17  ;;  %v925_v54 = vperm.slane %v2554_v1, 1 }
 0x149   : > { %v2548_v0 = vld.sshfl [vmem:[#allocation1 + $0x8] sm:$0xff pattern:$0x75316420]  ;;  %v2550_v41 = vld.sshfl [vmem:[#allocation1] sm:$0xff pattern:$0x75316420]  ;;  %1000 = vrot.lane.b32.xlu0 %v994_v40, %s2225_s18  ;;  %v995_v17 = vmul.f32 %v2538_v43, %v2427_v3 }
 0x14a   : > { %801 = vst [vmem:[#allocation1] ss:$2 sm:$0xff] %v2396_v48  ;;  %v899_v55 = vperm.slane %v893_v5, 0 }
 0x14c   : > { %v2556_v34 = vld.sshfl [vmem:[#allocation1 + $0x10] sm:$0xff pattern:$0x75316420]  ;;  %v902_v47 = vmul.f32 %v899_v55, %v2486_v11 }
 0x14d   : > { %1014 = vst [vmem:[#allocation1 + $0x10] ss:$2 sm:$0xff] %v798_v4 }
 0x150   : > { %940 = vrot.lane.b32.xlu1 %v933_v52, %s2225_s18  ;;  %681 = vrot.lane.b32.xlu2 %v673_v7, %s2224_s17  ;;  %v956_v52 = vperm.slane %v2554_v1, 2 }
 0x151   : > { %v2565_v40 = vld.sshfl [vmem:[#allocation1] sm:$0xff pattern:$0x75316420]  ;;  %v2567_v8 = vld.sshfl [vmem:[#allocation1 + $0x8] sm:$0xff pattern:$0x75316420]  ;;  %618 = vrot.lane.b32.xlu0 %v610_v57, %s2224_s17 }
 0x152   : > { %818 = vst [vmem:[#allocation1] ss:$2 sm:$0xff] %v2396_v48  ;;  %v962_v55 = vperm.slane %v956_v52, 2 }
 0x154   : > { %v2571_v53 = vld.sshfl [vmem:[#allocation1 + $0x10] sm:$0xff pattern:$0x75316420]  ;;  %v965_v3 = vmul.f32 %v962_v55, %v2379_v37 }
 0x155   : > { %1030 = vst [vmem:[#allocation1 + $0x10] ss:$2 sm:$0xff] %v798_v4  ;;  %v931_v4 = vperm.slane %v925_v54, 1  ;;  %v633_v54 = vperm.slane %v2534_v60, 1 }
 0x157   : > { %v934_v11 = vmul.f32 %v931_v4, %v2381_v38  ;;  %v352_v38 = vperm.slane %v2504_v59, 1  ;;  %v2637_v4 = vpop.permute.xlu0 %268 }
 0x158   : > { %971 = vrot.lane.b32.xlu1 %v964_v62, %s2225_s18  ;;  %910 = vrot.lane.b32.xlu2 %v902_v47, %s2225_s18  ;;  %v414_v47 = vperm.slane %v2504_v59, 3 }
 0x159   : > { %v2579_v33 = vld.sshfl [vmem:[#allocation1] sm:$0xff pattern:$0x75316420]  ;;  %v2581_v57 = vld.sshfl [vmem:[#allocation1 + $0x8] sm:$0xff pattern:$0x75316420]  ;;  %519 = vrot.lane.b32.xlu0 %v2468_v56, %s2227_s21  ;;  %v2597_v56 = vpop.permute.xlu2 %871 }
 0x15a   : > { %1012 = vst [vmem:[#allocation1] ss:$2 sm:$0xff] %v2396_v48 }
 0x160   : > { %1002 = vrot.lane.b32.xlu1 %v995_v17, %s2225_s18  ;;  %942 = vrot.lane.b32.xlu2 %v934_v11, %s2225_s18  ;;  %v2105_v11 = vld [vmem:[%s3601_s2 + $0x20] sm:$0xf] }
 0x161   : > { %v1015_v7 = vld.sshfl [vmem:[#allocation1] sm:$0xff pattern:$0x75316420]  ;;  %v2592_v5 = vld.sshfl [vmem:[#allocation1 + $0x8] sm:$0xff pattern:$0x75316420]  ;;  %452 = vrot.lane.b32.xlu0 %v2478_v9, %s2226_s20 }
 0x162   : > { %1028 = vst [vmem:[#allocation1] ss:$2 sm:$0xff] %v2396_v48  ;;  %v358_v9 = vperm.slane %v352_v38, 1 }
 0x164   : > { %v361_v48 = vmul.f32 %v358_v9, %v2363_v29 }
 0x168   : > { %973 = vrot.lane.b32.xlu2 %v965_v3, %s2225_s18  ;;  %247 = vrot.lane.b32.xlu1 %v2419_v63, %s2226_s20  ;;  %v420_v63 = vperm.slane %v414_v47, 3  ;;  %v987_v3 = vperm.slane %v2554_v1, 3 }
 0x169   : > { %536 = vrot.lane.b32.xlu0 %v2484_v10, %s2228_s24 }
 0x16a   : > { %v2606_v62 = vpop.permute.xlu2 %367  ;;  %v423_v10 = vmul.f32 %v420_v63, %v2353_v24  ;;  %v993_v38 = vperm.slane %v987_v3, 3 }
 0x170   : > { %251 = vrot.lane.b32.xlu2 %v2429_v6, %s2226_s20  ;;  %369 = vrot.lane.b32.xlu1 %v361_v48, %s2223_s14  ;;  %v639_v6 = vperm.slane %v633_v54, 1  ;;  %v996_v48 = vmul.f32 %v993_v38, %v2538_v43  ;;  %v1032_v54 = vld.sshfl [vmem:[#allocation1 + $0x8] sm:$0xff pattern:$0x75316420] }
 0x171   : > { %728 = vrot.lane.b32.xlu0 %v2530_v2, %s2228_s24  ;;  %v695_v2 = vperm.slane %v2534_v60, 3 }
 0x172   : > { %v2615_v37 = vpop.permute.xlu2 %429  ;;  %v642_v59 = vmul.f32 %v639_v6, %v2361_v28  ;;  %v3653_v6 = vmov 0  }
 0x178   : > { %431 = vrot.lane.b32.xlu1 %v423_v10, %s2223_s14  ;;  %450 = vrot.lane.b32.xlu2 %v2476_v61, %s2226_s20 }
 0x179   : > { %811 = vrot.lane.b32.xlu0 %v2536_v30, %s2229_s25  ;;  %v701_v30 = vperm.slane %v695_v2, 3 }
 0x17a   : > { %v2624_v29 = vpop.permute.xlu2 %616 }
 0x17b   : > { %v704_v17 = vmul.f32 %v701_v30, %v2357_v26  ;;  %v2738_v30 = vld [vmem:[%s3599_s0] sm:$0x3] }
 0x180   : > { %650 = vrot.lane.b32.xlu1 %v642_v59, %s2224_s17  ;;  %517 = vrot.lane.b32.xlu2 %v2496_v49, %s2227_s21 }
 0x181   : > { %744 = vrot.lane.b32.xlu0 %v2548_v0, %s2227_s21 }
 0x182   : > { %v2633_v24 = vpop.permute.xlu2 %646  ;;  %v2635_v61 = vpop.permute.xlu1 %335 }
 0x183   : > { %v2649_v60 = vpop.permute.xlu0 %333 }
 0x188   : > { %712 = vrot.lane.b32.xlu1 %v704_v17, %s2224_s17  ;;  %534 = vrot.lane.b32.xlu2 %v2512_v44, %s2228_s24 }
 0x189   : > { %828 = vrot.lane.b32.xlu0 %v2556_v34, %s2222_s13  ;;  %v1031_v34 = vld.sshfl [vmem:[#allocation1] sm:$0xff pattern:$0x75316420] }
 0x18a   : > { %v2645_v28 = vpop.permute.xlu2 %710  ;;  %v2647_v49 = vpop.permute.xlu1 %365 }
 0x18b   : > { %v2660_v0 = vpop.permute.xlu0 %396 }
 0x190   : > { %454 = vrot.lane.b32.xlu1 %v2451_v18, %s2226_s20  ;;  %726 = vrot.lane.b32.xlu2 %v2526_v14, %s2228_s24 }
 0x191   : > { %1018 = vrot.lane.b32.xlu0 %v1015_v7, %s2222_s13  ;;  %v3645_v7 = vmov 2  }
 0x192   : > { %v2656_v26 = vpop.permute.xlu1 %398  ;;  %v2658_v44 = vpop.permute.xlu2 %249 }
 0x198   : > { %515 = vrot.lane.b32.xlu1 %v2494_v46, %s2227_s21  ;;  %742 = vrot.lane.b32.xlu2 %v2550_v41, %s2227_s21  ;;  %v2678_v46 = vpop.permute.xlu0 %648 }
 0x199   : > { %1034 = vrot.lane.b32.xlu0 %v1031_v34, %s2229_s25 }
 0x19a   : > { %v2667_v18 = vpop.permute.xlu1 %427  ;;  %v2669_v14 = vpop.permute.xlu2 %337 }
 0x1a0   : > { %730 = vrot.lane.b32.xlu1 %v2502_v58, %s2228_s24  ;;  %809 = vrot.lane.b32.xlu2 %v2567_v8, %s2229_s25  ;;  %v2693_v8 = vpop.permute.xlu0 %677 }
 0x1a1   : > { %1050 = vperm.xlu0 %2165, %v2105_v11  }
 0x1a2   : > { %v2680_v41 = vpop.permute.xlu1 %614  ;;  %v2682_v52 = vpop.permute.xlu2 %400 }
 0x1a8   : > { %532 = vrot.lane.b32.xlu1 %v2510_v12, %s2228_s24  ;;  %1022 = vrot.lane.b32.xlu2 %v2571_v53, %s2222_s13  ;;  %v2704_v9 = vpop.permute.xlu0 %906 }
 0x1a9   : > { %2186 = vset.pattern.permute.xlu0 %v3645_v7  ;;  %3646 = vst [vmem:[#allocation8_spill] sm:$0xff] %v2704_v9 }
 0x1aa   : > { %v2689_v55 = vpop.permute.xlu1 %679  ;;  %v2691_v58 = vpop.permute.xlu2 %681 }
 0x1b0   : > { %746 = vrot.lane.b32.xlu1 %v2519_v45, %s2227_s21  ;;  %826 = vrot.lane.b32.xlu2 %v2581_v57, %s2222_s13  ;;  %v2714_v47 = vpop.permute.xlu0 %938  ;;  %v1033_v57 = vld.sshfl [vmem:[#allocation1 + $0x10] sm:$0xff pattern:$0x75316420] }
 0x1b1   : > { %3648 = vst [vmem:[#allocation10_spill] sm:$0xff] %v2714_v47 }
 0x1b2   : > { %v2700_v12 = vpop.permute.xlu1 %708  ;;  %v2702_v53 = vpop.permute.xlu2 %910 }
 0x1b8   : > { %807 = vrot.lane.b32.xlu1 %v2565_v40, %s2229_s25  ;;  %1004 = vrot.lane.b32.xlu2 %v996_v48, %s2225_s18  ;;  %v2725_v40 = vpop.permute.xlu0 %969 }
 0x1b9   : > { %3651 = vst [vmem:[#allocation13_spill] sm:$0xff] %v2725_v40  ;;  %v3658_v40 = vmov 3  }
 0x1ba   : > { %v2710_v1 = vpop.permute.xlu1 %908  ;;  %v2712_v45 = vpop.permute.xlu2 %942 }
 0x1bb   : > { %3647 = vst [vmem:[#allocation9_spill] sm:$0xff] %v2712_v45 }
 0x1c0   : > { %1038 = vrot.lane.b32.xlu2 %v1033_v57, %s2229_s25  ;;  %824 = vrot.lane.b32.xlu1 %v2579_v33, %s2222_s13  ;;  %v2733_v33 = vpop.permute.xlu0 %1000 }
 0x1c1   : > { %3655 = vst [vmem:[#allocation16_spill] sm:$0xff] %v2733_v33 }
 0x1c2   : > { %v2719_v63 = vpop.permute.xlu1 %940  ;;  %v2721_v43 = vpop.permute.xlu2 %973 }
 0x1c3   : > { %3649 = vst [vmem:[#allocation11_spill] sm:$0xff] %v2719_v63 }
 0x1c4   : > { %3650 = vst [vmem:[#allocation12_spill] sm:$0xff] %v2721_v43 }
 0x1c8   : > { %1020 = vrot.lane.b32.xlu1 %v2592_v5, %s2222_s13  ;;  %1070 = vperm.xlu2 %2167, %v2105_v11   ;;  %v3617_v5 = vperm.slane %v2738_v30, 0  ;;  %v2754_v57 = vpop.permute.xlu0 %618 }
 0x1ca   : > { %v2727_v10 = vpop.permute.xlu1 %971  ;;  %v252_v59 = vpop.permute.xlu2 %251  ;;  %vm2743_vm8 = vcmp.eq.s32.totalorder %v3617_v5, 0 }
 0x1cb   : > { %3652 = vst [vmem:[#allocation14_spill] sm:$0xff] %v2727_v10  ;;  %v201_v10 = vperm.slane %v2738_v30, 1 }
 0x1cd   : > { %vm2762_vm11 = vcmp.eq.s32.totalorder %v201_v10, 0  ;;  %vm2800_vm12 = vcmp.eq.s32.totalorder %v201_v10, 15 }
 0x1d0   : > { %1036 = vrot.lane.b32.xlu1 %v1032_v54, %s2229_s25  ;;  %2172 = vset.pattern.permute.xlu2 %v3653_v6 }
 0x1d2   : > { %v2731_v2 = vpop.permute.xlu1 %1002  ;;  %v2747_v3 = vpop.permute.xlu2 %450 }
 0x1d3   : > { %3654 = vst [vmem:[#allocation15_spill] sm:$0xff] %v2731_v2 }
 0x1d8   : > { %1060 = vperm.xlu1 %2166, %v2105_v11  }
 0x1da   : > { %v248_v34 = vpop.permute.xlu1 %247 }
 0x1db   : > { %v254_v38 = vsel %vm3622_vm9, %v248_v34, %v2658_v44 }
 0x1dc   : > { %v263_v48 = vsel %vm2743_vm8, %v254_v38, %v2439_v13 }
 0x1dd   : > { %v271_v54 = vperm.slane %v263_v48, 0  ;;  %v281_v7 = vperm.slane %v263_v48, 1  ;;  %v291_v33 = vperm.slane %v263_v48, 2  ;;  %v301_v43 = vperm.slane %v263_v48, 3 }
 0x1df   : > { %v273_v5 = vmul.f32 %v271_v54, %v2637_v4  ;;  %v283_v2 = vmul.f32 %v281_v7, %v2343_v19  ;;  %v293_v34 = vmul.f32 %v291_v33, %v2359_v27  ;;  %v303_v38 = vmul.f32 %v301_v43, %v2345_v20  ;;  %v2768_v54 = vpop.permute.xlu2 %517 }
 0x1e0   : > { %2168 = vset.pattern.permute.xlu1 %v3658_v40  ;;  %v255_v7 = vsel %vm3622_vm9, %v2658_v44, %v252_v59  ;;  %v402_v44 = vsel %vm339_vm10, %v2660_v0, %v2656_v26 }
 0x1e1   : > { %v285_v45 = vadd.f32 %v283_v2, %v273_v5  ;;  %1080 = vperm.xlu1 %2168, %v2105_v11   ;;  %v340_v2 = vsel %vm339_vm10, %v2649_v60, %v2635_v61  ;;  %v520_v11 = vpop.permute.xlu0 %519  ;;  %v264_v43 = vsel %vm2762_vm11, %v255_v7, %v2441_v15 }
 0x1e2   : > { %v370_v47 = vpop.permute.xlu1 %369  ;;  %v282_v60 = vperm.slane %v264_v43, 1 }
 0x1e3   : > { %v295_v13 = vadd.f32 %v293_v34, %v285_v45  ;;  %v371_v45 = vsel %vm339_vm10, %v2647_v49, %v2606_v62  ;;  %v272_v34 = vperm.slane %v264_v43, 0 }
 0x1e5   : > { %v305_v48 = vadd.f32 %v303_v38, %v295_v13  ;;  %v274_v38 = vmul.f32 %v272_v34, %v2637_v4  ;;  %v372_v34 = vsel %vm339_vm10, %v2606_v62, %v370_v47 }
 0x1e7   : > { %v344_v33 = vadd.f32 %v340_v2, %v305_v48  ;;  %v284_v48 = vmul.f32 %v282_v60, %v2343_v19  ;;  %v2785_v49 = vpop.permute.xlu2 %534  ;;  %v292_v2 = vperm.slane %v264_v43, 2  ;;  %v341_v19 = vsel %vm339_vm10, %v2635_v61, %v2669_v14 }
 0x1e9   : > { %v375_v5 = vadd.f32 %v371_v45, %v344_v33  ;;  %2169 = vset.pattern.permute.xlu1 %v3653_v6  ;;  %v453_v40 = vpop.permute.xlu0 %452  ;;  %v286_v7 = vadd.f32 %v284_v48, %v274_v38  ;;  %v294_v33 = vmul.f32 %v292_v2, %v2359_v27  ;;  %v302_v45 = vperm.slane %v264_v43, 3 }
 0x1ea   : > { %v432_v59 = vpop.permute.xlu1 %431 }
 0x1eb   : > { %v406_v13 = vadd.f32 %v402_v44, %v375_v5  ;;  %v296_v6 = vadd.f32 %v294_v33, %v286_v7  ;;  %v304_v0 = vmul.f32 %v302_v45, %v2345_v20  ;;  %v434_v62 = vsel %vm339_vm10, %v2615_v37, %v432_v59 }
 0x1ec   : > { %v3663_v33 = vperm.slane %v2738_v30, 0 }
 0x1ed   : > { %v306_v44 = vadd.f32 %v304_v0, %v296_v6  ;;  %v403_v6 = vsel %vm339_vm10, %v2656_v26, %v2682_v52  ;;  %v456_v52 = vsel %vm3622_vm9, %v2747_v3, %v453_v40 }
 0x1ee   : > { %vm2821_vm15 = vcmp.eq.s32.totalorder %v3663_v33, 15 }
 0x1ef   : > { %v2791_v9 = vpop.permute.xlu2 %726  ;;  %v345_v60 = vadd.f32 %v341_v19, %v306_v44 }
 0x1f1   : > { %v537_v4 = vpop.permute.xlu0 %536  ;;  %v376_v38 = vadd.f32 %v372_v34, %v345_v60  ;;  %v460_v34 = vsel %vm2821_vm15, %v2460_v50, %v456_v52 }
 0x1f2   : > { %v2787_v15 = vpop.permute.xlu1 %650  ;;  %v540_v14 = vsel %vm3627_vm13, %v2785_v49, %v537_v4  ;;  %v479_v33 = vperm.slane %v460_v34, 1 }
 0x1f3   : > { %v407_v10 = vadd.f32 %v403_v6, %v376_v38  ;;  %v469_v38 = vperm.slane %v460_v34, 0 }
 0x1f5   : > { %v438_v59 = vadd.f32 %v434_v62, %v407_v10  ;;  %v471_v52 = vmul.f32 %v469_v38, %v2377_v36 }
 0x1f7   : > { %v2804_v43 = vpop.permute.xlu2 %742 }
 0x1f9   : > { %v2817_v47 = vpop.permute.xlu0 %728 }
 0x1fa   : > { %v2793_v5 = vpop.permute.xlu1 %712 }
 0x202   : > { %v455_v20 = vpop.permute.xlu1 %454 }
 0x203   : > { %v457_v48 = vsel %vm3622_vm9, %v453_v40, %v455_v20  ;;  %vm3625_vm9 = vcmask 769024  }
 0x204   : > { %v461_v61 = vsel %vm2800_vm12, %v2462_v51, %v457_v48  ;;  %v523_v51 = vsel %vm3626_vm14, %v2768_v54, %v520_v11  ;;  %v2837_v48 = vpop.permute.xlu2 %809 }
 0x205   : > { %v470_v2 = vperm.slane %v461_v61, 0  ;;  %v480_v7 = vperm.slane %v461_v61, 1  ;;  %v490_v0 = vperm.slane %v461_v61, 2  ;;  %v544_v4 = vsel %vm2762_vm11, %v523_v51, %v540_v14 }
 0x206   : > { %v500_v19 = vperm.slane %v461_v61, 3  ;;  %v553_v40 = vperm.slane %v544_v4, 0  ;;  %v563_v20 = vperm.slane %v544_v4, 1  ;;  %v433_v61 = vsel %vm339_vm10, %v2667_v18, %v2615_v37 }
 0x207   : > { %v472_v45 = vmul.f32 %v470_v2, %v2377_v36  ;;  %v482_v30 = vmul.f32 %v480_v7, %v2369_v32  ;;  %v492_v11 = vmul.f32 %v490_v0, %v2347_v21  ;;  %v437_v14 = vadd.f32 %v433_v61, %v406_v13  ;;  %v812_v2 = vpop.permute.xlu0 %811 }
 0x208   : > { %v502_v62 = vmul.f32 %v500_v19, %v2383_v39  ;;  %v555_v10 = vmul.f32 %v553_v40, %v2351_v23  ;;  %v573_v50 = vperm.slane %v544_v4, 2  ;;  %v565_v51 = vmul.f32 %v563_v20, %v2389_v42 }
 0x209   : > { %v474_v44 = vadd.f32 %v472_v45, %v438_v59  ;;  %v583_v59 = vperm.slane %v544_v4, 3  ;;  %v473_v19 = vadd.f32 %v471_v52, %v437_v14  ;;  %v481_v37 = vmul.f32 %v479_v33, %v2369_v32 }
 0x20a   : > { %v516_v60 = vpop.permute.xlu1 %515  ;;  %v489_v18 = vperm.slane %v460_v34, 2  ;;  %v499_v4 = vperm.slane %v460_v34, 3  ;;  %v622_v20 = vsel %vm3623_vm0, %v2624_v29, %v2754_v57  ;;  %v653_v57 = vsel %vm3623_vm0, %v2678_v46, %v2787_v15 }
 0x20b   : > { %v484_v3 = vadd.f32 %v482_v30, %v474_v44  ;;  %v575_v44 = vmul.f32 %v573_v50, %v2349_v22  ;;  %v585_v13 = vmul.f32 %v583_v59, %v2355_v25  ;;  %v522_v32 = vsel %vm3626_vm14, %v516_v60, %v2768_v54 }
 0x20c   : > { %v491_v36 = vmul.f32 %v489_v18, %v2347_v21  ;;  %v501_v21 = vmul.f32 %v499_v4, %v2383_v39  ;;  %v684_v39 = vsel %vm3623_vm0, %v2689_v55, %v2691_v58 }
 0x20d   : > { %v494_v6 = vadd.f32 %v492_v11, %v484_v3  ;;  %v2849_v11 = vpop.permute.xlu2 %1022 }
 0x20f   : > { %v504_v7 = vadd.f32 %v502_v62, %v494_v6  ;;  %v483_v6 = vadd.f32 %v481_v37, %v473_v19  ;;  %v745_v38 = vpop.permute.xlu0 %744 }
 0x211   : > { %v557_v45 = vadd.f32 %v555_v10, %v504_v7  ;;  %v493_v61 = vadd.f32 %v491_v36, %v483_v6  ;;  %v715_v36 = vsel %vm3623_vm0, %v2645_v28, %v2793_v5 }
 0x212   : > { %v731_v0 = vpop.permute.xlu1 %730 }
 0x213   : > { %v567_v30 = vadd.f32 %v565_v51, %v557_v45  ;;  %v503_v33 = vadd.f32 %v501_v21, %v493_v61 }
 0x215   : > { %v577_v40 = vadd.f32 %v575_v44, %v567_v30  ;;  %v2866_v51 = vpop.permute.xlu2 %826  ;;  %v748_v44 = vsel %vm3626_vm14, %v2804_v43, %v745_v38 }
 0x217   : > { %v587_v3 = vadd.f32 %v585_v13, %v577_v40  ;;  %v829_v30 = vpop.permute.xlu0 %828  ;;  %v732_v13 = vsel %vm3627_vm13, %v2791_v9, %v2817_v47  ;;  %v815_v9 = vsel %vm3625_vm9, %v2837_v48, %v812_v2  ;;  %v652_v2 = vsel %vm3623_vm0, %v2633_v24, %v2678_v46 }
 0x218   : > { %v832_v58 = vsel %vm3624_vm1, %v2866_v51, %v829_v30  ;;  %v714_v24 = vsel %vm3623_vm0, %v2700_v12, %v2645_v28 }
 0x219   : > { %v626_v10 = vadd.f32 %v622_v20, %v587_v3 }
 0x21a   : > { %v533_v62 = vpop.permute.xlu1 %532 }
 0x21b   : > { %v539_v14 = vsel %vm3627_vm13, %v533_v62, %v2785_v49  ;;  %v657_v60 = vadd.f32 %v653_v57, %v626_v10  ;;  %v836_v62 = vsel %vm2762_vm11, %v815_v9, %v832_v58 }
 0x21c   : > { %v543_v50 = vsel %vm2743_vm8, %v522_v32, %v539_v14  ;;  %v845_v21 = vperm.slane %v836_v62, 0 }
 0x21d   : > { %v552_v34 = vperm.slane %v543_v50, 0  ;;  %v562_v7 = vperm.slane %v543_v50, 1  ;;  %v572_v54 = vperm.slane %v543_v50, 2  ;;  %v582_v45 = vperm.slane %v543_v50, 3 }
 0x21e   : > { %v688_v18 = vadd.f32 %v684_v39, %v657_v60 }
 0x21f   : > { %v554_v52 = vmul.f32 %v552_v34, %v2351_v23  ;;  %v564_v59 = vmul.f32 %v562_v7, %v2389_v42  ;;  %v733_v23 = vsel %vm3627_vm13, %v2817_v47, %v731_v0  ;;  %v574_v37 = vmul.f32 %v572_v54, %v2349_v22  ;;  %v3666_v54 = vld [vmem:[#allocation7_spill] sm:$0xff] }
 0x220   : > { %v584_v0 = vmul.f32 %v582_v45, %v2355_v25  ;;  %v752_v22 = vsel %vm2821_vm15, %v732_v13, %v748_v44  ;;  %v719_v4 = vadd.f32 %v715_v36, %v688_v18  ;;  %v621_v25 = vsel %vm3623_vm0, %v2680_v41, %v2624_v29  ;;  %v3667_v45 = vld [vmem:[#allocation4_spill] sm:$0xff] }
 0x221   : > { %v556_v49 = vadd.f32 %v554_v52, %v503_v33  ;;  %v761_v10 = vperm.slane %v752_v22, 0  ;;  %v683_v29 = vsel %vm3623_vm0, %v2693_v8, %v2689_v55  ;;  %v771_v41 = vperm.slane %v752_v22, 1 }
 0x222   : > { %v747_v15 = vpop.permute.xlu1 %746  ;;  %v781_v46 = vperm.slane %v752_v22, 2  ;;  %v847_v39 = vmul.f32 %v845_v21, %v3667_v45  ;;  %v791_v55 = vperm.slane %v752_v22, 3  ;;  %v865_v18 = vperm.slane %v836_v62, 2  ;;  %v3669_v22 = vld [vmem:[#allocation5_spill] sm:$0xff] }
 0x223   : > { %v566_v19 = vadd.f32 %v564_v59, %v556_v49  ;;  %v749_v42 = vsel %vm3626_vm14, %v745_v38, %v747_v15  ;;  %v855_v49 = vperm.slane %v836_v62, 1  ;;  %v763_v59 = vmul.f32 %v761_v10, %v2447_v16 }
 0x224   : > { %v753_v43 = vsel %vm2800_vm12, %v733_v23, %v749_v42  ;;  %v773_v15 = vmul.f32 %v771_v41, %v2375_v35  ;;  %v783_v13 = vmul.f32 %v781_v46, %v2367_v31  ;;  %v867_v36 = vmul.f32 %v865_v18, %v3669_v22 }
 0x225   : > { %v576_v40 = vadd.f32 %v574_v37, %v566_v19  ;;  %v762_v3 = vperm.slane %v753_v43, 0  ;;  %v772_v6 = vperm.slane %v753_v43, 1  ;;  %v782_v20 = vperm.slane %v753_v43, 2  ;;  %v3668_v19 = vld [vmem:[#allocation6_spill] sm:$0xff] }
 0x226   : > { %v792_v5 = vperm.slane %v753_v43, 3  ;;  %v857_v37 = vmul.f32 %v855_v49, %v3668_v19  ;;  %v793_v43 = vmul.f32 %v791_v55, %v3666_v54  ;;  %vm912_vm0 = vcmask 777216   ;;  %v3675_v55 = vld [vmem:[#allocation13_spill] sm:$0xff] }
 0x227   : > { %v586_v47 = vadd.f32 %v584_v0, %v576_v40  ;;  %v764_v38 = vmul.f32 %v762_v3, %v2447_v16  ;;  %v774_v14 = vmul.f32 %v772_v6, %v2375_v35  ;;  %v784_v57 = vmul.f32 %v782_v20, %v2367_v31  ;;  %v1019_v40 = vpop.permute.xlu0 %1018 }
 0x228   : > { %v794_v60 = vmul.f32 %v792_v5, %v3666_v54  ;;  %v875_v31 = vperm.slane %v836_v62, 3 }
 0x229   : > { %v625_v32 = vadd.f32 %v621_v25, %v586_v47  ;;  %v766_v61 = vadd.f32 %v764_v38, %v719_v4  ;;  %v1005_v4 = vpop.permute.xlu2 %1004 }
 0x22a   : > { %v808_v50 = vpop.permute.xlu1 %807 }
 0x22b   : > { %v656_v34 = vadd.f32 %v652_v2, %v625_v32  ;;  %v776_v7 = vadd.f32 %v774_v14, %v766_v61  ;;  %v814_v28 = vsel %vm3625_vm9, %v808_v50, %v2837_v48  ;;  %v877_v32 = vmul.f32 %v875_v31, %v2597_v56 }
 0x22c   : > { %v914_v50 = vsel %vm912_vm0, %v2710_v1, %v2702_v53 }
 0x22d   : > { %v687_v33 = vadd.f32 %v683_v29, %v656_v34  ;;  %v786_v52 = vadd.f32 %v784_v57, %v776_v7  ;;  %v3670_v7 = vld [vmem:[#allocation8_spill] sm:$0xff] }
 0x22e   : > { %v913_v57 = vsel %vm912_vm0, %v3670_v7, %v2710_v1 }
 0x22f   : > { %v718_v44 = vadd.f32 %v714_v24, %v687_v33  ;;  %v796_v23 = vadd.f32 %v794_v60, %v786_v52  ;;  %v1035_v21 = vpop.permute.xlu0 %1034  ;;  %v3671_v33 = vld [vmem:[#allocation11_spill] sm:$0xff]  ;;  %v3672_v52 = vld [vmem:[#allocation10_spill] sm:$0xff]  ;;  %v3673_v60 = vld [vmem:[#allocation9_spill] sm:$0xff] }
 0x230   : > { %v944_v54 = vsel %vm912_vm0, %v3672_v52, %v3671_v33  ;;  %v2106_v52 = vld [vmem:[%s3602_s3 + $0x4] sm:$0xf] }
 0x231   : > { %v849_v8 = vadd.f32 %v847_v39, %v796_v23  ;;  %v765_v30 = vadd.f32 %v763_v59, %v718_v44  ;;  %v1039_v24 = vpop.permute.xlu2 %1038 }
 0x232   : > { %v825_v42 = vpop.permute.xlu1 %824 }
 0x233   : > { %v775_v12 = vadd.f32 %v773_v15, %v765_v30  ;;  %v831_v16 = vsel %vm3624_vm1, %v825_v42, %v2866_v51  ;;  %v859_v58 = vadd.f32 %v857_v37, %v849_v8  ;;  %v3674_v15 = vld [vmem:[#allocation14_spill] sm:$0xff]  ;;  %v3677_v42 = vld [vmem:[#allocation15_spill] sm:$0xff] }
 0x234   : > { %v835_v35 = vsel %vm2743_vm8, %v814_v28, %v831_v16  ;;  %v975_v8 = vsel %vm912_vm0, %v3675_v55, %v3674_v15 }
 0x235   : > { %v785_v0 = vadd.f32 %v783_v13, %v775_v12  ;;  %v844_v3 = vperm.slane %v835_v35, 0  ;;  %v854_v6 = vperm.slane %v835_v35, 1  ;;  %v864_v47 = vperm.slane %v835_v35, 2  ;;  %v3678_v13 = vld [vmem:[#allocation16_spill] sm:$0xff] }
 0x236   : > { %v869_v38 = vadd.f32 %v867_v36, %v859_v58  ;;  %v874_v25 = vperm.slane %v835_v35, 3  ;;  %v1006_v28 = vsel %vm912_vm0, %v3678_v13, %v3677_v42  ;;  %v2109_v13 = vld [vmem:[%s3602_s3 + $0x10] sm:$0xf] }
 0x237   : > { %v795_v9 = vadd.f32 %v793_v43, %v785_v0  ;;  %v846_v48 = vmul.f32 %v844_v3, %v3667_v45  ;;  %v856_v20 = vmul.f32 %v854_v6, %v3668_v19  ;;  %v866_v5 = vmul.f32 %v864_v47, %v3669_v22  ;;  %v1051_v58 = vpop.permute.xlu0 %1050 }
 0x238   : > { %v879_v2 = vadd.f32 %v877_v32, %v869_v38  ;;  %v876_v62 = vmul.f32 %v874_v25, %v2597_v56  ;;  %v945_v56 = vsel %vm912_vm0, %v3671_v33, %v3673_v60  ;;  %v1007_v6 = vsel %vm912_vm0, %v3677_v42, %v1005_v4  ;;  %v1181_v33 = vld [vmem:[%s3602_s3] sm:$0xf]  ;;  %v2112_v42 = vld [vmem:[%s3602_s3 + $0x1c] sm:$0xf] }
 0x239   : > { %v848_v51 = vadd.f32 %v846_v48, %v795_v9  ;;  %1184 = vperm.xlu1 %2169, %v1181_v33  }
 0x23a   : > { %v1021_v61 = vpop.permute.xlu1 %1020  ;;  %v918_v29 = vadd.f32 %v914_v50, %v879_v2 }
 0x23b   : > { %v858_v14 = vadd.f32 %v856_v20, %v848_v51  ;;  %v1024_v46 = vsel %vm3624_vm1, %v1019_v40, %v1021_v61  ;;  %v1025_v49 = vsel %vm3624_vm1, %v1021_v61, %v2849_v11  ;;  %v3676_v11 = vld [vmem:[#allocation12_spill] sm:$0xff]  ;;  %v1071_v51 = vpop.permute.xlu2 %1070  ;;  %vm1089_vm1 = vcmask 1043456  }
 0x23c   : > { %v949_v23 = vadd.f32 %v945_v56, %v918_v29  ;;  %v976_v18 = vsel %vm912_vm0, %v3674_v15, %v3676_v11  ;;  %v2108_v11 = vld [vmem:[%s3602_s3 + $0xc] sm:$0xf] }
 0x23d   : > { %v868_v10 = vadd.f32 %v866_v5, %v858_v14 }
 0x23e   : > { %v980_v12 = vadd.f32 %v976_v18, %v949_v23  ;;  %v3683_v18 = vmov 0  }
 0x23f   : > { %v878_v34 = vadd.f32 %v876_v62, %v868_v10 }
 0x240   : > { %v1011_v22 = vadd.f32 %v1007_v6, %v980_v12  ;;  %v2111_v12 = vld [vmem:[%s3602_s3 + $0x18] sm:$0xf] }
 0x241   : > { %v917_v41 = vadd.f32 %v913_v57, %v878_v34 }
 0x242   : > { %v1037_v53 = vpop.permute.xlu1 %1036 }
 0x243   : > { %v1040_v59 = vsel %vm3625_vm9, %v1035_v21, %v1037_v53  ;;  %v1041_v1 = vsel %vm3625_vm9, %v1037_v53, %v1039_v24  ;;  %v948_v45 = vadd.f32 %v944_v54, %v917_v41  ;;  %v2230_v41 = vmov 256.0  }
 0x244   : > { %v1044_v39 = vsel %vm2821_vm15, %v1024_v46, %v1040_v59  ;;  %v1045_v44 = vsel %vm2800_vm12, %v1025_v49, %v1041_v1  ;;  %2201 = vrcp.f32 %v2230_v41  ;;  %v3679_v24 = vmov 2  }
 0x245   : > { %v1053_v30 = vperm.slane %v1044_v39, 0  ;;  %v1054_v19 = vperm.slane %v1045_v44, 0  ;;  %v979_v37 = vadd.f32 %v975_v8, %v948_v45  ;;  %v1064_v35 = vperm.slane %v1045_v44, 1  ;;  %2170 = vset.pattern.permute.xlu1 %v3679_v24  ;;  %v2107_v8 = vld [vmem:[%s3602_s3 + $0x8] sm:$0xf] }
 0x246   : > { %v1063_v3 = vperm.slane %v1044_v39, 1  ;;  %v1073_v9 = vperm.slane %v1044_v39, 2  ;;  %v1074_v48 = vperm.slane %v1045_v44, 2  ;;  %v1084_v14 = vperm.slane %v1045_v44, 3  ;;  %1204 = vperm.xlu1 %2170, %v1181_v33  }
 0x247   : > { %v1010_v16 = vadd.f32 %v1006_v28, %v979_v37  ;;  %v1055_v40 = vmul.f32 %v1053_v30, %v1051_v58  ;;  %v1056_v0 = vmul.f32 %v1054_v19, %v1051_v58  ;;  %v1083_v5 = vperm.slane %v1044_v39, 3  ;;  %v2110_v28 = vld [vmem:[%s3602_s3 + $0x14] sm:$0xf] }
 0x248   : > { %v1075_v32 = vmul.f32 %v1073_v9, %v1071_v51  ;;  %v1076_v61 = vmul.f32 %v1074_v48, %v1071_v51  ;;  %v3680_v46 = vmov 1   ;;  %v3681_v59 = vmov 3  }
 0x249   : > { %v1057_v47 = vadd.f32 %v1055_v40, %v1010_v16  ;;  %v1058_v38 = vadd.f32 %v1056_v0, %v1011_v22 }
 0x24a   : > { %v1061_v43 = vpop.permute.xlu1 %1060  ;;  %v2202_v54 = vpop.eup %2201 }
 0x24b   : > { %v1065_v36 = vmul.f32 %v1063_v3, %v1061_v43  ;;  %v1066_v31 = vmul.f32 %v1064_v35, %v1061_v43  ;;  %v1096_v60 = vmul.f32 256.0, %v2202_v54  ;;  %vm1100_vm9 = vweird.f32 %v2202_v54 }
 0x24d   : > { %v1067_v20 = vadd.f32 %v1065_v36, %v1057_v47  ;;  %v1068_v25 = vadd.f32 %v1066_v31, %v1058_v38  ;;  %v1097_v56 = vsub.f32 1.0, %v1096_v60 }
 0x24e   : > { %2171 = vset.pattern.permute.xlu1 %v3681_v59 }
 0x24f   : > { %v1077_v10 = vadd.f32 %v1075_v32, %v1067_v20  ;;  %v1078_v62 = vadd.f32 %v1076_v61, %v1068_v25  ;;  %v1098_v53 = vmul.f32 %v2202_v54, %v1097_v56  ;;  %1214 = vperm.xlu1 %2171, %v1181_v33  }
 0x251   : > { %v1099_v49 = vadd.f32 %v2202_v54, %v1098_v53 }
 0x253   : > { %v1081_v2 = vpop.permute.xlu1 %1080  ;;  %v2973_v1 = vsel %vm1100_vm9, %v2202_v54, %v1099_v49 }
 0x254   : > { %v1085_v50 = vmul.f32 %v1083_v5, %v1081_v2  ;;  %v1086_v21 = vmul.f32 %v1084_v14, %v1081_v2  ;;  %3682 = vst [vmem:[#allocation7_spill] sm:$0xff] %v2973_v1 }
 0x256   : > { %v1087_v4 = vadd.f32 %v1085_v50, %v1077_v10  ;;  %v1088_v34 = vadd.f32 %v1086_v21, %v1078_v62 }
 0x257   : > { %2174 = vset.pattern.permute.xlu1 %v3679_v24 }
 0x258   : > { %v1090_v7 = vsel %vm1089_vm1, %v1087_v4, 0.0  ;;  %v1091_v57 = vsel %vm1089_vm1, %v1088_v34, 0.0  ;;  %1293 = vperm.xlu1 %2174, %v2106_v52  }
 0x259   : > { %v1092_v29 = vadd.f32 %v1091_v57, %v1090_v7 }
 0x25b   : > { %1093 = vadd.xlane.f32.xlu2 %v1092_v29 }
 0x260   : > { %2176 = vset.pattern.permute.xlu1 %v3680_v46 }
 0x261   : > { %1391 = vperm.xlu1 %2176, %v2107_v8  }
 0x269   : > { %2178 = vset.pattern.permute.xlu1 %v3681_v59 }
 0x26a   : > { %1411 = vperm.xlu1 %2178, %v2107_v8  }
 0x272   : > { %2180 = vset.pattern.permute.xlu1 %v3679_v24 }
 0x273   : > { %1229 = vperm.xlu2 %2172, %v2106_v52   ;;  %1482 = vperm.xlu1 %2180, %v2108_v11  }
 0x27b   : > { %2173 = vset.pattern.permute.xlu2 %v3680_v46  ;;  %2182 = vset.pattern.permute.xlu1 %v3683_v18 }
 0x27c   : > { %1262 = vperm.xlu2 %2173, %v2106_v52   ;;  %1507 = vperm.xlu1 %2182, %v2109_v13  }
 0x284   : > { %2175 = vset.pattern.permute.xlu2 %v3681_v59  ;;  %1796 = vperm.xlu1 %2182, %v2112_v42  }
 0x285   : > { %1324 = vperm.xlu2 %2175, %v2106_v52  }
 0x28c   : > { %2188 = vset.pattern.permute.xlu1 %v3681_v59 }
 0x28d   : > { %2177 = vset.pattern.permute.xlu2 %v3679_v24  ;;  %1891 = vperm.xlu1 %2188, %v2112_v42  }
 0x28e   : > { %1401 = vperm.xlu2 %2177, %v2107_v8  }
 0x295   : > { %2191 = vset.pattern.permute.xlu1 %v3679_v24 }
 0x296   : > { %2179 = vset.pattern.permute.xlu2 %v3683_v18  ;;  %1690 = vperm.xlu1 %2191, %v2110_v28  }
 0x297   : > { %1462 = vperm.xlu2 %2179, %v2108_v11  }
 0x29e   : > { %2193 = vset.pattern.permute.xlu1 %v3683_v18 }
 0x29f   : > { %2181 = vset.pattern.permute.xlu2 %v3681_v59  ;;  %1751 = vperm.xlu1 %2193, %v2111_v12  }
 0x2a0   : > { %1492 = vperm.xlu2 %2181, %v2108_v11  }
 0x2a7   : > { %2195 = vset.pattern.permute.xlu1 %v3679_v24 }
 0x2a8   : > { %2183 = vset.pattern.permute.xlu2 %v3680_v46  ;;  %1771 = vperm.xlu1 %2195, %v2111_v12  }
 0x2a9   : > { %1540 = vperm.xlu2 %2183, %v2109_v13  }
 0x2ab   : > { %v3028_v6 = vpop.permute.xlu1 %1184 }
 0x2b0   : > { %2197 = vset.pattern.permute.xlu1 %v3680_v46 }
 0x2b1   : > { %2184 = vset.pattern.permute.xlu2 %v3679_v24 }
 0x2b2   : > { %1571 = vperm.xlu2 %2184, %v2109_v13  }
 0x2b8   : > { %v3032_v38 = vpop.permute.xlu1 %1204 }
 0x2ba   : > { %2185 = vset.pattern.permute.xlu2 %v3680_v46 }
 0x2bb   : > { %1829 = vperm.xlu2 %2185, %v2112_v42  }
 0x2c1   : > { %v3036_v32 = vpop.permute.xlu1 %1214 }
 0x2c3   : > { %2189 = vset.pattern.permute.xlu2 %v3683_v18 }
 0x2c4   : > { %1670 = vperm.xlu2 %2189, %v2110_v28  }
 0x2ca   : > { %v3038_v61 = vpop.permute.xlu1 %1293 }
 0x2cc   : > { %2194 = vset.pattern.permute.xlu2 %v3680_v46 }
 0x2cd   : > { %1761 = vperm.xlu2 %2194, %v2111_v12  }
 0x2ce   : > { %v1094_v45 = vpop.xlane.xlu2 %1093 }
 0x2cf   : > { %v1102_v39 = vmul.f32 %v2973_v1, %v1094_v45 }
 0x2d1   : > { %v2976_v44 = vsub.f32 %v1087_v4, %v1102_v39  ;;  %v2978_v23 = vsub.f32 %v1088_v34, %v1102_v39 }
 0x2d3   : > { %v1105_v15 = vmul.f32 %v2976_v44, %v2976_v44  ;;  %v1106_v55 = vmul.f32 %v2978_v23, %v2978_v23  ;;  %v3040_v14 = vpop.permute.xlu1 %1391 }
 0x2d5   : > { %v1107_v30 = vsel %vm1089_vm1, %v1105_v15, 0.0  ;;  %v1108_v19 = vsel %vm1089_vm1, %v1106_v55, 0.0  ;;  %2196 = vset.pattern.permute.xlu2 %v3681_v59 }
 0x2d6   : > { %v1109_v37 = vadd.f32 %v1108_v19, %v1107_v30  ;;  %1781 = vperm.xlu2 %2196, %v2111_v12   ;;  %v3064_v54 = vpop.permute.xlu2 %1229 }
 0x2d8   : > { %1110 = vadd.xlane.f32.xlu0 %v1109_v37 }
 0x2dc   : > { %v3042_v5 = vpop.permute.xlu1 %1411 }
 0x2de   : > { %2198 = vset.pattern.permute.xlu2 %v3679_v24  ;;  %v3066_v60 = vpop.permute.xlu2 %1262 }
 0x2e5   : > { %v3044_v2 = vpop.permute.xlu1 %1482 }
 0x2e6   : > { %3684 = vst [vmem:[#allocation4_spill] sm:$0xff] %v3044_v2  ;;  %v3068_v56 = vpop.permute.xlu2 %1324 }
 0x2ec   : > { %1860 = vperm.xlu0 %2186, %v2112_v42  }
 0x2ee   : > { %v3046_v10 = vpop.permute.xlu1 %1507 }
 0x2f4   : > { %2187 = vset.pattern.permute.xlu0 %v3680_v46  ;;  %v3071_v46 = vpop.permute.xlu2 %1401 }
 0x2f5   : > { %1194 = vperm.xlu0 %2187, %v1181_v33  }
 0x2f6   : > { %v3048_v62 = vpop.permute.xlu1 %1796 }
 0x2fc   : > { %v3089_v37 = vpop.permute.xlu2 %1462 }
 0x2fd   : > { %1472 = vperm.xlu0 %2187, %v2108_v11  }
 0x2ff   : > { %v3050_v50 = vpop.permute.xlu1 %1891 }
 0x305   : > { %1680 = vperm.xlu0 %2187, %v2110_v28  }
 0x308   : > { %v3052_v21 = vpop.permute.xlu1 %1690 }
 0x309   : > { %3685 = vst [vmem:[#allocation6_spill] sm:$0xff] %v3052_v21 }
 0x30d   : > { %2190 = vset.pattern.permute.xlu0 %v3681_v59 }
 0x30e   : > { %1602 = vperm.xlu0 %2190, %v2109_v13  }
 0x311   : > { %v3054_v4 = vpop.permute.xlu1 %1751 }
 0x312   : > { %3686 = vst [vmem:[#allocation5_spill] sm:$0xff] %v3054_v4 }
 0x316   : > { %1700 = vperm.xlu0 %2190, %v2110_v28  }
 0x31a   : > { %v3056_v34 = vpop.permute.xlu1 %1771 }
 0x31b   : > { %3687 = vst [vmem:[#allocation8_spill] sm:$0xff] %v3056_v34 }
 0x31e   : > { %2192 = vset.pattern.permute.xlu0 %v3683_v18 }
 0x31f   : > { %1381 = vperm.xlu0 %2192, %v2107_v8  }
 0x34b   : > { %v1111_v16 = vpop.xlane.xlu0 %1110 }
 0x34c   : > { %v1112_v58 = vmul.f32 %v1111_v16, %v2973_v1 }
 0x34e   : > { %v1113_v35 = vadd.f32 1e-05, %v1112_v58 }
 0x350   : > { %2203 = vrsqrt.f32 %v1113_v35  ;;  %vm1120_vm14 = vweird.f32 %v1113_v35 }
 0x356   : > { %v2204_v43 = vpop.eup %2203 }
 0x357   : > { %v1115_v40 = vmul.f32 %v2204_v43, %v1113_v35  ;;  %vm1121_vm9 = vweird.f32 %v2204_v43 }
 0x358   : > { %vm1122_vm13 = vmor %vm1120_vm14, %vm1121_vm9  ;;  %vm3704_vm14 = vcmask 908288  }
 0x359   : > { %v1116_v0 = vmul.f32 %v2204_v43, %v1115_v40  ;;  %vm3705_vm9 = vmmov %vm3704_vm14 }
 0x35b   : > { %v1117_v3 = vmul.f32 0.5, %v1116_v0 }
 0x35d   : > { %v1118_v22 = vsub.f32 1.5, %v1117_v3 }
 0x35f   : > { %v1119_v36 = vmul.f32 %v2204_v43, %v1118_v22 }
 0x361   : > { %v1123_v31 = vsel %vm1122_vm13, %v2204_v43, %v1119_v36 }
 0x362   : > { %v1124_v9 = vmul.f32 %v1123_v31, %v2976_v44  ;;  %v1125_v48 = vmul.f32 %v1123_v31, %v2978_v23  ;;  %v3077_v44 = vpop.permute.xlu0 %1860 }
 0x364   : > { %v1127_v47 = vmax.f32 %v1125_v48, 0.0  ;;  %v1126_v51 = vmax.f32 %v1124_v9, 0.0  ;;  %v3122_v9 = vpop.permute.xlu2 %1492 }
 0x365   : > { %3689 = vst [vmem:[#allocation11_spill] sm:$0xff] %v3122_v9 }
 0x366   : > { %v1130_v20 = vrot.slane %v1127_v47, 4 }
 0x368   : > { %v1131_v25 = vsel %vm1089_vm1, %v1126_v51, %v1130_v20 }
 0x369   : > { %1132 = vrot.lane.b32.xlu1 %v1131_v25, %s2218_s23 }
 0x36a   : > { %v3111_v0 = vpop.permute.xlu0 %1194 }
 0x3db   : > { %v1133_v7 = vpop.permute.xlu1 %1132 }
 0x3dc   : > { %v1134_v57 = vrot.slane %v1133_v7, 4 }
 0x3de   : > { %v1135_v29 = vsel %vm210_vm2, %v1134_v57, %v1133_v7  ;;  %1139 = vst.msk [vmem:[#allocation2 + $0x8] sm:$0xf] %vm218_vm3, %v1134_v57  ;;  %vm3693_vm2 = vcmask 1031168  }
 0x3df   : > { %1138 = vst.msk [vmem:[#allocation2] sm:$0xff] %vm2331_vm4, %v1135_v29  ;;  %v3140_v29 = vpop.permute.xlu0 %1472  ;;  %vm3694_vm3 = vmmov %vm3693_vm2 }
 0x3e0   : > { %3690 = vst [vmem:[#allocation10_spill] sm:$0xff] %v3140_v29  ;;  %vm3695_vm4 = vmmov %vm3693_vm2 }
 0x3e6   : > { %v1140_v33 = vld [vmem:[#allocation2] sm:$0xf]  ;;  %v1146_v52 = vld [vmem:[#allocation2 + $0x4] sm:$0xff] }
 0x3e7   : > { %1142 = vrot.lane.b32.xlu1 %v1140_v33, %s2222_s13 }
 0x3ef   : > { %1148 = vrot.lane.b32.xlu1 %v1146_v52, %s2221_s12 }
 0x459   : > { %v1143_v24 = vpop.permute.xlu1 %1142 }
 0x45a   : > { %1145 = vst.msk [vmem:[#allocation2] sm:$0xf] %vm225_vm5, %v1143_v24  ;;  %vm3696_vm5 = vmmov %vm3693_vm2 }
 0x461   : > { %v3073_v53 = vld [vmem:[#allocation2] sm:$0xff]  ;;  %v1149_v49 = vpop.permute.xlu1 %1148 }
 0x462   : > { %1158 = vst [vmem:[#allocation1] ss:$2 sm:$0xff] %v3073_v53  ;;  %v1575_v45 = vperm.slane %v3073_v53, 6  ;;  %v1150_v39 = vrot.slane %v1149_v49, 4  ;;  %v1235_v23 = vperm.slane %v3073_v53, 4  ;;  %v1605_v30 = vperm.slane %v3073_v53, 3 }
 0x463   : > { %v1833_v11 = vperm.slane %v3073_v53, 5  ;;  %v1234_v42 = vperm.slane %v3073_v53, 0  ;;  %v1832_v43 = vperm.slane %v3073_v53, 1  ;;  %v1574_v22 = vperm.slane %v3073_v53, 2 }
 0x464   : > { %v3080_v15 = vperm.slane %v1575_v45, 2  ;;  %v1151_v55 = vsel %vm232_vm6, %v1149_v49, %v1150_v39  ;;  %v3084_v8 = vperm.slane %v1235_v23, 0  ;;  %v3102_v12 = vperm.slane %v1605_v30, 3  ;;  %v3153_v49 = vpop.permute.xlu2 %1540 }
 0x465   : > { %1153 = vst.msk [vmem:[#allocation2 + $0x8] sm:$0xf] %vm235_vm7, %v1151_v55  ;;  %v3104_v16 = vperm.slane %v1234_v42, 0  ;;  %v3106_v58 = vperm.slane %v1833_v11, 1  ;;  %v3119_v31 = vperm.slane %v1832_v43, 1  ;;  %v3130_v51 = vperm.slane %v1574_v22, 2 }
 0x466   : > { %v1306_v19 = vmul.f32 %v3080_v15, %v3038_v61  ;;  %v1244_v18 = vmul.f32 %v3084_v8, %v3064_v54  ;;  %v1336_v3 = vmul.f32 %v3102_v12, %v3068_v56  ;;  %v1606_v20 = vperm.slane %v3073_v53, 7 }
 0x467   : > { %v1243_v40 = vmul.f32 %v3104_v16, %v3064_v54  ;;  %v1275_v36 = vmul.f32 %v3106_v58, %v3066_v60  ;;  %v1274_v25 = vmul.f32 %v3119_v31, %v3066_v60  ;;  %v1522_v57 = vmul.f32 %v3046_v10, %v3084_v8 }
 0x468   : > { %1313 = vrot.lane.b32.xlu0 %v1306_v19, %s2223_s14  ;;  %1251 = vrot.lane.b32.xlu2 %v1244_v18, %s2223_s14  ;;  %v1305_v41 = vmul.f32 %v3130_v51, %v3038_v61  ;;  %v3144_v33 = vperm.slane %v1606_v20, 3  ;;  %v1552_v55 = vmul.f32 %v3119_v31, %v3153_v49  ;;  %v1521_v30 = vmul.f32 %v3046_v10, %v3104_v16  ;;  %v3169_v18 = vpop.permute.xlu0 %1680 }
 0x469   : > { %v3096_v13 = vld.sshfl [vmem:[#allocation1] sm:$0xff pattern:$0x75316420]  ;;  %v3098_v28 = vld.sshfl [vmem:[#allocation1 + $0x8] sm:$0xff pattern:$0x75316420]  ;;  %1249 = vrot.lane.b32.xlu1 %v1243_v40, %s2223_s14  ;;  %v1553_v42 = vmul.f32 %v3106_v58, %v3153_v49 }
 0x46a   : > { %1174 = vst [vmem:[#allocation1] ss:$2 sm:$0xff] %v3073_v53  ;;  %v1337_v39 = vmul.f32 %v3144_v33, %v3068_v56  ;;  %vm3697_vm6 = vcmask 916480   ;;  %vm3698_vm7 = vcmask 900096  }
 0x46b   : > { %3691 = vst [vmem:[#allocation9_spill] sm:$0xff] %v3169_v18  ;;  %vm3700_vm13 = vmmov %vm3697_vm6 }
 0x46c   : > { %v1155_v35 = vld [vmem:[#allocation2 + $0x8] sm:$0xf]  ;;  %v3177_v43 = vpop.permute.xlu2 %1571 }
 0x46d   : > { %1160 = vst [vmem:[#allocation1 + $0x10] ss:$2 sm:$0xff] %v1155_v35  ;;  %v1421_v45 = vld [vmem:[#allocation2 + $0x8] sm:$0xf]  ;;  %v1584_v40 = vmul.f32 %v3080_v15, %v3177_v43 }
 0x46e   : > { %v3212_v1 = vld [vmem:[#allocation2 + $0x8] sm:$0xf] }
 0x46f   : > { %v1803_v21 = vperm.slane %v3212_v1, 0 }
 0x470   : > { %1342 = vrot.lane.b32.xlu0 %v1336_v3, %s2223_s14  ;;  %1282 = vrot.lane.b32.xlu2 %v1275_v36, %s2223_s14  ;;  %v1583_v3 = vmul.f32 %v3130_v51, %v3177_v43  ;;  %v3191_v20 = vpop.permute.xlu0 %1602 }
 0x471   : > { %v3124_v48 = vld.sshfl [vmem:[#allocation1] sm:$0xff pattern:$0x75316420]  ;;  %v3126_v47 = vld.sshfl [vmem:[#allocation1 + $0x8] sm:$0xff pattern:$0x75316420]  ;;  %1280 = vrot.lane.b32.xlu1 %v1274_v25, %s2223_s14  ;;  %v1811_v25 = vmul.f32 %v3048_v62, %v3084_v8 }
 0x472   : > { %1354 = vst [vmem:[#allocation1] ss:$2 sm:$0xff] %v3073_v53 }
 0x474   : > { %v3135_v7 = vld.sshfl [vmem:[#allocation1 + $0x10] sm:$0xff pattern:$0x75316420] }
 0x475   : > { %1361 = vst [vmem:[#allocation1 + $0x10] ss:$2 sm:$0xff] %v1155_v35 }
 0x478   : > { %1529 = vrot.lane.b32.xlu0 %v1522_v57, %s2224_s17  ;;  %1311 = vrot.lane.b32.xlu2 %v1305_v41, %s2223_s14  ;;  %v3195_v57 = vld [vmem:[#allocation2 + $0x8] sm:$0xf] }
 0x479   : > { %v3147_v52 = vld.sshfl [vmem:[#allocation1] sm:$0xff pattern:$0x75316420]  ;;  %v3149_v24 = vld.sshfl [vmem:[#allocation1 + $0x8] sm:$0xff pattern:$0x75316420]  ;;  %1344 = vrot.lane.b32.xlu1 %v1337_v39, %s2223_s14  ;;  %v1615_v39 = vmul.f32 %v3144_v33, %v3191_v20 }
 0x47a   : > { %1359 = vst [vmem:[#allocation1] ss:$2 sm:$0xff] %v3073_v53  ;;  %v1236_v9 = vperm.slane %v3195_v57, 0 }
 0x47c   : > { %v3157_v23 = vld.sshfl [vmem:[#allocation1 + $0x10] sm:$0xff pattern:$0x75316420]  ;;  %v1242_v2 = vperm.slane %v1236_v9, 0 }
 0x47d   : > { %1426 = vst [vmem:[#allocation1 + $0x10] ss:$2 sm:$0xff] %v1421_v45 }
 0x480   : > { %1558 = vrot.lane.b32.xlu0 %v1552_v55, %s2224_s17  ;;  %1527 = vrot.lane.b32.xlu2 %v1521_v30, %s2224_s17  ;;  %v1614_v55 = vmul.f32 %v3102_v12, %v3191_v20  ;;  %v1329_v30 = vperm.slane %v3195_v57, 3 }
 0x481   : > { %v3165_v19 = vld.sshfl [vmem:[#allocation1] sm:$0xff pattern:$0x75316420]  ;;  %v3167_v11 = vld.sshfl [vmem:[#allocation1 + $0x8] sm:$0xff pattern:$0x75316420]  ;;  %1560 = vrot.lane.b32.xlu1 %v1553_v42, %s2224_s17 }
 0x482   : > { %1424 = vst [vmem:[#allocation1] ss:$2 sm:$0xff] %v3073_v53 }
 0x484   : > { %v3175_v35 = vld.sshfl [vmem:[#allocation1 + $0x10] sm:$0xff pattern:$0x75316420] }
 0x485   : > { %1442 = vst [vmem:[#allocation1 + $0x10] ss:$2 sm:$0xff] %v1421_v45 }
 0x488   : > { %1591 = vrot.lane.b32.xlu0 %v1584_v40, %s2224_s17  ;;  %1589 = vrot.lane.b32.xlu2 %v1583_v3, %s2224_s17  ;;  %v1830_v40 = vpop.permute.xlu2 %1829  ;;  %v1335_v3 = vperm.slane %v1329_v30, 3 }
 0x489   : > { %v3185_v22 = vld.sshfl [vmem:[#allocation1] sm:$0xff pattern:$0x75316420]  ;;  %v3187_v36 = vld.sshfl [vmem:[#allocation1 + $0x8] sm:$0xff pattern:$0x75316420]  ;;  %1818 = vrot.lane.b32.xlu1 %v1811_v25, %s2225_s18  ;;  %v1842_v25 = vmul.f32 %v3106_v58, %v1830_v40 }
 0x48a   : > { %1440 = vst [vmem:[#allocation1] ss:$2 sm:$0xff] %v3073_v53  ;;  %v1338_v4 = vmul.f32 %v1335_v3, %v3068_v56  ;;  %v1809_v58 = vperm.slane %v1803_v21, 0  ;;  %v1841_v56 = vmul.f32 %v3119_v31, %v1830_v40  ;;  %v1834_v3 = vperm.slane %v3212_v1, 1 }
 0x48c   : > { %v3197_v41 = vld.sshfl [vmem:[#allocation1 + $0x10] sm:$0xff pattern:$0x75316420] }
 0x48d   : > { %1634 = vst [vmem:[#allocation1 + $0x10] ss:$2 sm:$0xff] %v1421_v45 }
 0x490   : > { %1622 = vrot.lane.b32.xlu0 %v1615_v39, %s2224_s17  ;;  %1620 = vrot.lane.b32.xlu2 %v1614_v55, %s2224_s17  ;;  %v1810_v39 = vmul.f32 %v3048_v62, %v3104_v16  ;;  %v3246_v31 = vpop.permute.xlu2 %1670 }
 0x491   : > { %v3206_v42 = vld.sshfl [vmem:[#allocation1] sm:$0xff pattern:$0x75316420]  ;;  %v3208_v8 = vld.sshfl [vmem:[#allocation1 + $0x8] sm:$0xff pattern:$0x75316420]  ;;  %1849 = vrot.lane.b32.xlu1 %v1842_v25, %s2225_s18  ;;  %v1873_v25 = vmul.f32 %v3077_v44, %v3080_v15 }
 0x492   : > { %1632 = vst [vmem:[#allocation1] ss:$2 sm:$0xff] %v3073_v53  ;;  %v1840_v15 = vperm.slane %v1834_v3, 1 }
 0x493   : > { %3692 = vst [vmem:[#allocation14_spill] sm:$0xff] %v3246_v31 }
 0x494   : > { %v3215_v34 = vld.sshfl [vmem:[#allocation1 + $0x10] sm:$0xff pattern:$0x75316420] }
 0x495   : > { %1650 = vst [vmem:[#allocation1 + $0x10] ss:$2 sm:$0xff] %v1421_v45  ;;  %v1710_v45 = vld [vmem:[#allocation2 + $0x8] sm:$0xf] }
 0x498   : > { %1816 = vrot.lane.b32.xlu0 %v1810_v39, %s2225_s18  ;;  %1346 = vrot.lane.b32.xlu2 %v1338_v4, %s2223_s14  ;;  %v1812_v39 = vmul.f32 %v1809_v58, %v3048_v62  ;;  %v1872_v62 = vmul.f32 %v3077_v44, %v3130_v51  ;;  %v1267_v58 = vperm.slane %v3195_v57, 1 }
 0x499   : > { %v3223_v55 = vld.sshfl [vmem:[#allocation1] sm:$0xff pattern:$0x75316420]  ;;  %v3225_v30 = vld.sshfl [vmem:[#allocation1 + $0x8] sm:$0xff pattern:$0x75316420]  ;;  %1880 = vrot.lane.b32.xlu1 %v1873_v25, %s2225_s18  ;;  %v1843_v25 = vmul.f32 %v1840_v15, %v1830_v40 }
 0x49a   : > { %1648 = vst [vmem:[#allocation1] ss:$2 sm:$0xff] %v3073_v53  ;;  %v1273_v31 = vperm.slane %v1267_v58, 1 }
 0x49c   : > { %v3231_v16 = vld.sshfl [vmem:[#allocation1 + $0x10] sm:$0xff pattern:$0x75316420]  ;;  %v1276_v40 = vmul.f32 %v1273_v31, %v3066_v60 }
 0x49d   : > { %1715 = vst [vmem:[#allocation1 + $0x10] ss:$2 sm:$0xff] %v1710_v45  ;;  %v1502_v60 = vld [vmem:[#allocation2 + $0x8] sm:$0xf] }
 0x4a0   : > { %1847 = vrot.lane.b32.xlu0 %v1841_v56, %s2225_s18  ;;  %1820 = vrot.lane.b32.xlu2 %v1812_v39, %s2225_s18  ;;  %v1865_v56 = vperm.slane %v3212_v1, 2 }
 0x4a1   : > { %v3238_v4 = vld.sshfl [vmem:[#allocation1] sm:$0xff pattern:$0x75316420]  ;;  %v3240_v21 = vld.sshfl [vmem:[#allocation1 + $0x8] sm:$0xff pattern:$0x75316420]  ;;  %1164 = vrot.lane.b32.xlu1 %v3096_v13, %s2226_s20 }
 0x4a2   : > { %1713 = vst [vmem:[#allocation1] ss:$2 sm:$0xff] %v3073_v53  ;;  %v1871_v13 = vperm.slane %v1865_v56, 2  ;;  %v1245_v56 = vmul.f32 %v1242_v2, %v3064_v54 }
 0x4a4   : > { %v3244_v18 = vld.sshfl [vmem:[#allocation1 + $0x10] sm:$0xff pattern:$0x75316420]  ;;  %v1874_v15 = vmul.f32 %v1871_v13, %v3077_v44  ;;  %v1545_v13 = vperm.slane %v1502_v60, 1 }
 0x4a5   : > { %1731 = vst [vmem:[#allocation1 + $0x10] ss:$2 sm:$0xff] %v1710_v45 }
 0x4a8   : > { %1878 = vrot.lane.b32.xlu0 %v1872_v62, %s2225_s18  ;;  %1851 = vrot.lane.b32.xlu2 %v1843_v25, %s2225_s18  ;;  %v3268_v62 = vpop.permute.xlu2 %1761 }
 0x4a9   : > { %v3255_v39 = vld.sshfl [vmem:[#allocation1] sm:$0xff pattern:$0x75316420]  ;;  %v3257_v3 = vld.sshfl [vmem:[#allocation1 + $0x8] sm:$0xff pattern:$0x75316420]  ;;  %1166 = vrot.lane.b32.xlu1 %v3098_v28, %s2226_s20 }
 0x4aa   : > { %1729 = vst [vmem:[#allocation1] ss:$2 sm:$0xff] %v3073_v53  ;;  %v1298_v28 = vperm.slane %v3195_v57, 2  ;;  %v1514_v57 = vperm.slane %v1502_v60, 0 }
 0x4ac   : > { %v3262_v51 = vld.sshfl [vmem:[#allocation1 + $0x10] sm:$0xff pattern:$0x75316420]  ;;  %v1304_v44 = vperm.slane %v1298_v28, 2 }
 0x4ad   : > { %1923 = vst [vmem:[#allocation1 + $0x10] ss:$2 sm:$0xff] %v1710_v45 }
 0x4ae   : > { %v1307_v54 = vmul.f32 %v1304_v44, %v3038_v61  ;;  %v1551_v61 = vperm.slane %v1545_v13, 1 }
 0x4b0   : > { %1284 = vrot.lane.b32.xlu0 %v1276_v40, %s2223_s14  ;;  %1882 = vrot.lane.b32.xlu2 %v1874_v15, %s2225_s18  ;;  %v3286_v31 = vpop.permute.xlu2 %1781  ;;  %v1576_v40 = vperm.slane %v1502_v60, 2 }
 0x4b1   : > { %v1732_v25 = vld.sshfl [vmem:[#allocation1] sm:$0xff pattern:$0x75316420]  ;;  %v3271_v58 = vld.sshfl [vmem:[#allocation1 + $0x8] sm:$0xff pattern:$0x75316420]  ;;  %1253 = vrot.lane.b32.xlu1 %v1245_v56, %s2223_s14 }
 0x4b2   : > { %1921 = vst [vmem:[#allocation1] ss:$2 sm:$0xff] %v3073_v53  ;;  %v1582_v15 = vperm.slane %v1576_v40, 2  ;;  %v1904_v40 = vmul.f32 %v3050_v50, %v3144_v33 }
 0x4b4   : > { %v3277_v29 = vld.sshfl [vmem:[#allocation1 + $0x10] sm:$0xff pattern:$0x75316420]  ;;  %v1585_v28 = vmul.f32 %v1582_v15, %v3177_v43 }
 0x4b5   : > { %1939 = vst [vmem:[#allocation1 + $0x10] ss:$2 sm:$0xff] %v1710_v45  ;;  %v1520_v45 = vperm.slane %v1514_v57, 0 }
 0x4b8   : > { %1365 = vrot.lane.b32.xlu0 %v3165_v19, %s2226_s20  ;;  %1168 = vrot.lane.b32.xlu2 %v3135_v7, %s2226_s20  ;;  %v1523_v7 = vmul.f32 %v1520_v45, %v3046_v10  ;;  %v1903_v10 = vmul.f32 %v3050_v50, %v3102_v12 }
 0x4b9   : > { %v3282_v9 = vld.sshfl [vmem:[#allocation1 + $0x8] sm:$0xff pattern:$0x75316420]  ;;  %v1924_v2 = vld.sshfl [vmem:[#allocation1] sm:$0xff pattern:$0x75316420]  ;;  %1315 = vrot.lane.b32.xlu1 %v1307_v54, %s2223_s14 }
 0x4ba   : > { %1937 = vst [vmem:[#allocation1] ss:$2 sm:$0xff] %v3073_v53  ;;  %v3299_v53 = vpop.permute.xlu0 %1700 }
 0x4c0   : > { %1432 = vrot.lane.b32.xlu0 %v3187_v36, %s2227_s21  ;;  %1369 = vrot.lane.b32.xlu2 %v3157_v23, %s2226_s20  ;;  %v1554_v23 = vmul.f32 %v1551_v61, %v3153_v49  ;;  %v1896_v49 = vperm.slane %v3212_v1, 3 }
 0x4c1   : > { %1531 = vrot.lane.b32.xlu1 %v1523_v7, %s2224_s17 }
 0x4c2   : > { %v3295_v19 = vpop.permute.xlu2 %1251  ;;  %v3312_v56 = vpop.permute.xlu0 %1381 }
 0x4c8   : > { %1448 = vrot.lane.b32.xlu0 %v3208_v8, %s2228_s24  ;;  %1430 = vrot.lane.b32.xlu2 %v3185_v22, %s2227_s21  ;;  %v1607_v22 = vperm.slane %v1502_v60, 3 }
 0x4c9   : > { %1562 = vrot.lane.b32.xlu1 %v1554_v23, %s2224_s17 }
 0x4ca   : > { %v3305_v36 = vpop.permute.xlu2 %1282  ;;  %v1613_v44 = vperm.slane %v1607_v22, 3 }
 0x4cc   : > { %v1616_v60 = vmul.f32 %v1613_v44, %v3191_v20 }
 0x4d0   : > { %1909 = vrot.lane.b32.xlu0 %v1903_v10, %s2225_s18  ;;  %1642 = vrot.lane.b32.xlu2 %v3215_v34, %s2228_s24  ;;  %v1902_v34 = vperm.slane %v1896_v49, 3 }
 0x4d1   : > { %1593 = vrot.lane.b32.xlu1 %v1585_v28, %s2224_s17 }
 0x4d2   : > { %v3316_v8 = vpop.permute.xlu2 %1311  ;;  %v1905_v43 = vmul.f32 %v1902_v34, %v3050_v50 }
 0x4d8   : > { %1654 = vrot.lane.b32.xlu0 %v3238_v4, %s2227_s21  ;;  %1446 = vrot.lane.b32.xlu2 %v3206_v42, %s2228_s24 }
 0x4d9   : > { %1624 = vrot.lane.b32.xlu1 %v1616_v60, %s2224_s17  ;;  %v1942_v60 = vld.sshfl [vmem:[#allocation1 + $0x10] sm:$0xff pattern:$0x75316420]  ;;  %s197_s17 = scalar_lea.vmem %s3603_s4, %s2116_s19 }
 0x4da   : > { %v3325_v12 = vpop.permute.xlu0 %1313  ;;  %v3327_v54 = vpop.permute.xlu2 %1527 }
 0x4db   : > { %v3332_v57 = vpop.permute.xlu1 %1249 }
 0x4e0   : > { %1735 = vrot.lane.b32.xlu0 %v1732_v25, %s2222_s13  ;;  %1913 = vrot.lane.b32.xlu2 %v1905_v43, %s2225_s18  ;;  %v1940_v25 = vld.sshfl [vmem:[#allocation1] sm:$0xff pattern:$0x75316420] }
 0x4e1   : > { %1434 = vrot.lane.b32.xlu1 %v3175_v35, %s2227_s21 }
 0x4e2   : > { %v1343_v1 = vpop.permute.xlu0 %1342  ;;  %v3336_v4 = vpop.permute.xlu2 %1589 }
 0x4e3   : > { %v3340_v42 = vpop.permute.xlu1 %1280 }
 0x4e8   : > { %1927 = vrot.lane.b32.xlu0 %v1924_v2, %s2222_s13  ;;  %1658 = vrot.lane.b32.xlu2 %v3231_v16, %s2227_s21 }
 0x4e9   : > { %1367 = vrot.lane.b32.xlu1 %v3167_v11, %s2226_s20  ;;  %v3365_v11 = vld [vmem:[%s3602_s3 + $0x20] sm:$0xf] }
 0x4ea   : > { %v3345_v20 = vpop.permute.xlu0 %1529  ;;  %v3347_v45 = vpop.permute.xlu2 %1620 }
 0x4eb   : > { %v1345_v7 = vpop.permute.xlu1 %1344 }
 0x4ec   : > { %v3353_v35 = vsel %vm339_vm10, %v1343_v1, %v1345_v7 }
 0x4f0   : > { %1943 = vrot.lane.b32.xlu0 %v1940_v25, %s2229_s25  ;;  %1638 = vrot.lane.b32.xlu2 %v3223_v55, %s2228_s24 }
 0x4f1   : > { %1450 = vrot.lane.b32.xlu1 %v3197_v41, %s2228_s24 }
 0x4f2   : > { %v3357_v2 = vpop.permute.xlu0 %1558  ;;  %v1347_v16 = vpop.permute.xlu2 %1346 }
 0x4f3   : > { %v3360_v13 = vsel %vm339_vm10, %v1345_v7, %v1347_v16  ;;  %v3369_v61 = vpop.permute.xlu1 %1560 }
 0x4f8   : > { %1959 = vperm.xlu0 %2192, %v3365_v11   ;;  %1723 = vrot.lane.b32.xlu2 %v3244_v18, %s2229_s25 }
 0x4f9   : > { %1911 = vrot.lane.b32.xlu1 %v1904_v40, %s2225_s18 }
 0x4fa   : > { %v3374_v55 = vpop.permute.xlu0 %1591  ;;  %v1821_v23 = vpop.permute.xlu2 %1820 }
 0x4fb   : > { %v1819_v10 = vpop.permute.xlu1 %1818 }
 0x4fc   : > { %v3381_v41 = vsel %vm912_vm0, %v1819_v10, %v1821_v23 }
 0x500   : > { %2200 = vset.pattern.permute.xlu0 %v3681_v59  ;;  %1739 = vrot.lane.b32.xlu2 %v3262_v51, %s2222_s13 }
 0x501   : > { %1640 = vrot.lane.b32.xlu1 %v3225_v30, %s2228_s24 }
 0x502   : > { %v3385_v15 = vpop.permute.xlu0 %1622  ;;  %v1852_v18 = vpop.permute.xlu2 %1851 }
 0x503   : > { %v1850_v22 = vpop.permute.xlu1 %1849 }
 0x504   : > { %v3390_v50 = vsel %vm912_vm0, %v1850_v22, %v1852_v18 }
 0x508   : > { %1719 = vrot.lane.b32.xlu2 %v3255_v39, %s2229_s25 }
 0x509   : > { %1656 = vrot.lane.b32.xlu1 %v3240_v21, %s2227_s21 }
 0x50a   : > { %v1817_v33 = vpop.permute.xlu0 %1816  ;;  %v1883_v51 = vpop.permute.xlu2 %1882 }
 0x50b   : > { %v3395_v28 = vsel %vm912_vm0, %v1817_v33, %v1819_v10  ;;  %v1881_v49 = vpop.permute.xlu1 %1880 }
 0x50c   : > { %v3400_v44 = vsel %vm912_vm0, %v1881_v49, %v1883_v51 }
 0x510   : > { %1931 = vrot.lane.b32.xlu2 %v3277_v29, %s2222_s13 }
 0x511   : > { %1721 = vrot.lane.b32.xlu1 %v3257_v3, %s2229_s25 }
 0x512   : > { %v1848_v30 = vpop.permute.xlu0 %1847  ;;  %v1169_v1 = vpop.permute.xlu2 %1168 }
 0x513   : > { %v3405_v34 = vsel %vm912_vm0, %v1848_v30, %v1850_v22  ;;  %v1165_v39 = vpop.permute.xlu1 %1164 }
 0x518   : > { %1947 = vrot.lane.b32.xlu2 %v1942_v60, %s2229_s25 }
 0x519   : > { %1737 = vrot.lane.b32.xlu1 %v3271_v58, %s2222_s13 }
 0x51a   : > { %v1879_v21 = vpop.permute.xlu0 %1878 }
 0x51b   : > { %v3411_v43 = vsel %vm912_vm0, %v1879_v21, %v1881_v49  ;;  %v1167_v29 = vpop.permute.xlu1 %1166 }
 0x51c   : > { %v1170_v25 = vsel %vm3693_vm2, %v1165_v39, %v1167_v29  ;;  %v1171_v7 = vsel %vm3694_vm3, %v1167_v29, %v1169_v1  ;;  %vm3706_vm2 = vmmov %vm3705_vm9 }
 0x51d   : > { %v1179_v3 = vsel %vm2743_vm8, %v1170_v25, %v3124_v48  ;;  %v1180_v16 = vsel %vm2762_vm11, %v1171_v7, %v3126_v47  ;;  %vm3707_vm3 = vmmov %vm3706_vm2 }
 0x51e   : > { %v1187_v23 = vperm.slane %v1179_v3, 0  ;;  %v1188_v40 = vperm.slane %v1180_v16, 0  ;;  %v1197_v10 = vperm.slane %v1179_v3, 1  ;;  %v1198_v58 = vperm.slane %v1180_v16, 1 }
 0x51f   : > { %v1207_v18 = vperm.slane %v1179_v3, 2  ;;  %v1208_v22 = vperm.slane %v1180_v16, 2  ;;  %v1217_v33 = vperm.slane %v1179_v3, 3  ;;  %v1218_v51 = vperm.slane %v1180_v16, 3 }
 0x520   : > { %1979 = vperm.xlu2 %2198, %v3365_v11   ;;  %v1189_v49 = vmul.f32 %v1187_v23, %v3028_v6  ;;  %v1190_v30 = vmul.f32 %v1188_v40, %v3028_v6  ;;  %v1199_v39 = vmul.f32 %v1197_v10, %v3111_v0  ;;  %v1200_v48 = vmul.f32 %v1198_v58, %v3111_v0 }
 0x521   : > { %1929 = vrot.lane.b32.xlu1 %v3282_v9, %s2222_s13  ;;  %v1209_v60 = vmul.f32 %v1207_v18, %v3032_v38  ;;  %v1210_v1 = vmul.f32 %v1208_v22, %v3032_v38  ;;  %v1219_v7 = vmul.f32 %v1217_v33, %v3036_v32  ;;  %v1220_v6 = vmul.f32 %v1218_v51, %v3036_v32  ;;  %v1941_v38 = vld.sshfl [vmem:[#allocation1 + $0x8] sm:$0xff pattern:$0x75316420] }
 0x522   : > { %v1201_v47 = vadd.f32 %v1199_v39, %v1189_v49  ;;  %v1202_v21 = vadd.f32 %v1200_v48, %v1190_v30  ;;  %v1285_v40 = vpop.permute.xlu0 %1284  ;;  %v1255_v0 = vsel %vm339_vm10, %v3332_v57, %v3295_v19  ;;  %v1286_v18 = vsel %vm339_vm10, %v3340_v42, %v3305_v36  ;;  %v1370_v30 = vpop.permute.xlu2 %1369 }
 0x523   : > { %v1254_v29 = vpop.permute.xlu1 %1253  ;;  %v1287_v32 = vsel %vm339_vm10, %v3305_v36, %v1285_v40  ;;  %v1317_v57 = vsel %vm339_vm10, %v3316_v8, %v3325_v12 }
 0x524   : > { %v1211_v25 = vadd.f32 %v1209_v60, %v1201_v47  ;;  %v1212_v3 = vadd.f32 %v1210_v1, %v1202_v21  ;;  %v1256_v9 = vsel %vm339_vm10, %v3295_v19, %v1254_v29 }
 0x526   : > { %v1221_v16 = vadd.f32 %v1219_v7, %v1211_v25  ;;  %v1222_v23 = vadd.f32 %v1220_v6, %v1212_v3 }
 0x528   : > { %v1259_v10 = vadd.f32 %v1255_v0, %v1221_v16  ;;  %v1260_v58 = vadd.f32 %v1256_v9, %v1222_v23 }
 0x529   : > { %1945 = vrot.lane.b32.xlu1 %v1941_v38, %s2229_s25 }
 0x52a   : > { %v1290_v22 = vadd.f32 %v1286_v18, %v1259_v10  ;;  %v1291_v33 = vadd.f32 %v1287_v32, %v1260_v58  ;;  %v1431_v47 = vpop.permute.xlu2 %1430  ;;  %v1366_v21 = vpop.permute.xlu0 %1365 }
 0x52b   : > { %v1316_v51 = vpop.permute.xlu1 %1315 }
 0x52c   : > { %v1318_v19 = vsel %vm339_vm10, %v3325_v12, %v1316_v51  ;;  %v1321_v49 = vadd.f32 %v1317_v57, %v1290_v22  ;;  %vm3699_vm10 = vmmov %vm3698_vm7 }
 0x52d   : > { %v1322_v39 = vadd.f32 %v1318_v19, %v1291_v33 }
 0x52e   : > { %v1352_v42 = vadd.f32 %v3353_v35, %v1321_v49 }
 0x52f   : > { %v1353_v48 = vadd.f32 %v3360_v13, %v1322_v39 }
 0x531   : > { %1969 = vperm.xlu1 %2197, %v3365_v11  }
 0x532   : > { %v3459_v60 = vpop.permute.xlu2 %1642  ;;  %v1433_v13 = vpop.permute.xlu0 %1432 }
 0x533   : > { %v3453_v36 = vpop.permute.xlu1 %1531  ;;  %v1436_v58 = vsel %vm3698_vm7, %v1431_v47, %v1433_v13  ;;  %vm3711_vm7 = vmmov %vm3706_vm2 }
 0x539   : > { %2199 = vset.pattern.permute.xlu1 %v3681_v59 }
 0x53a   : > { %1989 = vperm.xlu1 %2199, %v3365_v11   ;;  %v1447_v1 = vpop.permute.xlu2 %1446  ;;  %v1449_v7 = vpop.permute.xlu0 %1448 }
 0x53b   : > { %v3457_v8 = vpop.permute.xlu1 %1562  ;;  %v1452_v6 = vsel %vm3697_vm6, %v1447_v1, %v1449_v7  ;;  %vm3710_vm6 = vmmov %vm3706_vm2 }
 0x53c   : > { %v1456_v32 = vsel %vm2743_vm8, %v1436_v58, %v1452_v6  ;;  %v3701_v58 = vld [vmem:[#allocation10_spill] sm:$0xff] }
 0x53d   : > { %v1465_v39 = vperm.slane %v1456_v32, 0  ;;  %v1475_v6 = vperm.slane %v1456_v32, 1 }
 0x542   : > { %v3465_v25 = vpop.permute.xlu2 %1913 }
 0x543   : > { %v3461_v12 = vpop.permute.xlu1 %1593 }
 0x54a   : > { %v3477_v38 = vpop.permute.xlu2 %1658 }
 0x54b   : > { %v3463_v35 = vpop.permute.xlu1 %1624 }
 0x553   : > { %v1435_v29 = vpop.permute.xlu1 %1434 }
 0x554   : > { %v1437_v47 = vsel %vm3699_vm10, %v1433_v13, %v1435_v29  ;;  %vm3712_vm10 = vmmov %vm3700_vm13 }
 0x55b   : > { %v1368_v3 = vpop.permute.xlu1 %1367 }
 0x55c   : > { %v1371_v59 = vsel %vm3695_vm4, %v1366_v21, %v1368_v3  ;;  %v1372_v11 = vsel %vm3696_vm5, %v1368_v3, %v1370_v30  ;;  %vm3708_vm4 = vmmov %vm3706_vm2 }
 0x55d   : > { %v1375_v16 = vsel %vm2821_vm15, %v3147_v52, %v1371_v59  ;;  %v1376_v23 = vsel %vm2800_vm12, %v3149_v24, %v1372_v11  ;;  %vm3709_vm5 = vmmov %vm3706_vm2 }
 0x55e   : > { %v1384_v40 = vperm.slane %v1375_v16, 0  ;;  %v1385_v0 = vperm.slane %v1376_v23, 0  ;;  %v1394_v9 = vperm.slane %v1375_v16, 1  ;;  %v1395_v10 = vperm.slane %v1376_v23, 1 }
 0x55f   : > { %v1404_v18 = vperm.slane %v1375_v16, 2  ;;  %v1405_v33 = vperm.slane %v1376_v23, 2  ;;  %v1414_v57 = vperm.slane %v1375_v16, 3  ;;  %v1415_v51 = vperm.slane %v1376_v23, 3 }
 0x560   : > { %v1386_v22 = vmul.f32 %v1384_v40, %v3312_v56  ;;  %v1387_v52 = vmul.f32 %v1385_v0, %v3312_v56  ;;  %v1396_v49 = vmul.f32 %v1394_v9, %v3040_v14  ;;  %v1397_v30 = vmul.f32 %v1395_v10, %v3040_v14 }
 0x561   : > { %v1406_v21 = vmul.f32 %v1404_v18, %v3071_v46  ;;  %v1407_v11 = vmul.f32 %v1405_v33, %v3071_v46  ;;  %v1467_v40 = vmul.f32 %v1465_v39, %v3089_v37  ;;  %v1485_v0 = vperm.slane %v1456_v32, 2 }
 0x562   : > { %v1388_v24 = vadd.f32 %v1386_v22, %v1352_v42  ;;  %v1389_v19 = vadd.f32 %v1387_v52, %v1353_v48  ;;  %v1416_v42 = vmul.f32 %v1414_v57, %v3042_v5  ;;  %v1417_v48 = vmul.f32 %v1415_v51, %v3042_v5  ;;  %v1639_v52 = vpop.permute.xlu2 %1638 }
 0x563   : > { %v1451_v1 = vpop.permute.xlu1 %1450  ;;  %v1477_v18 = vmul.f32 %v1475_v6, %v3701_v58  ;;  %v1495_v22 = vperm.slane %v1456_v32, 3  ;;  %v1533_v6 = vsel %vm3704_vm14, %v3327_v54, %v3345_v20  ;;  %v1595_v54 = vsel %vm3708_vm4, %v3336_v4, %v3374_v55 }
 0x564   : > { %v1398_v3 = vadd.f32 %v1396_v49, %v1388_v24  ;;  %v1399_v59 = vadd.f32 %v1397_v30, %v1389_v19  ;;  %v1453_v56 = vsel %vm3700_vm13, %v1449_v7, %v1451_v1  ;;  %v3702_v19 = vld [vmem:[#allocation4_spill] sm:$0xff]  ;;  %vm3713_vm13 = vmmov %vm3712_vm10  ;;  %vm3714_vm14 = vcmask 900096  }
 0x565   : > { %v1457_v14 = vsel %vm2762_vm11, %v1437_v47, %v1453_v56  ;;  %v1487_v49 = vmul.f32 %v1485_v0, %v3702_v19  ;;  %vm3721_vm4 = vcmask 785408  }
 0x566   : > { %v1408_v16 = vadd.f32 %v1406_v21, %v1398_v3  ;;  %v1409_v23 = vadd.f32 %v1407_v11, %v1399_v59  ;;  %v1466_v13 = vperm.slane %v1457_v14, 0  ;;  %v1476_v29 = vperm.slane %v1457_v14, 1  ;;  %v3703_v21 = vld [vmem:[#allocation11_spill] sm:$0xff]  ;;  %v3503_v59 = vpop.permute.xlu0 %1909 }
 0x567   : > { %v1486_v7 = vperm.slane %v1457_v14, 2  ;;  %v1496_v51 = vperm.slane %v1457_v14, 3 }
 0x568   : > { %v1418_v9 = vadd.f32 %v1416_v42, %v1408_v16  ;;  %v1419_v10 = vadd.f32 %v1417_v48, %v1409_v23  ;;  %v1468_v46 = vmul.f32 %v1466_v13, %v3089_v37  ;;  %v1478_v57 = vmul.f32 %v1476_v29, %v3701_v58 }
 0x569   : > { %v1488_v47 = vmul.f32 %v1486_v7, %v3702_v19  ;;  %v1497_v37 = vmul.f32 %v1495_v22, %v3703_v21  ;;  %v1498_v32 = vmul.f32 %v1496_v51, %v3703_v21  ;;  %v1534_v42 = vsel %vm3705_vm9, %v3345_v20, %v3453_v36  ;;  %vm3715_vm9 = vmmov %vm3714_vm14 }
 0x56a   : > { %v1469_v5 = vadd.f32 %v1467_v40, %v1418_v9  ;;  %v1470_v33 = vadd.f32 %v1468_v46, %v1419_v10  ;;  %v1564_v16 = vsel %vm3706_vm2, %v3357_v2, %v3369_v61  ;;  %v1565_v23 = vsel %vm3707_vm3, %v3369_v61, %v3457_v8  ;;  %v1724_v13 = vpop.permute.xlu2 %1723 }
 0x56b   : > { %v3497_v24 = vpop.permute.xlu1 %1911  ;;  %v1596_v20 = vsel %vm3709_vm5, %v3374_v55, %v3461_v12  ;;  %v1626_v2 = vsel %vm3710_vm6, %v3347_v45, %v3385_v15  ;;  %v1627_v61 = vsel %vm3711_vm7, %v3385_v15, %v3463_v35  ;;  %vm3719_vm2 = vcmask 769024   ;;  %vm3722_vm5 = vmmov %vm3721_vm4 }
 0x56c   : > { %v1479_v30 = vadd.f32 %v1477_v18, %v1469_v5  ;;  %v1480_v39 = vadd.f32 %v1478_v57, %v1470_v33  ;;  %v3716_v5 = vld [vmem:[#allocation14_spill] sm:$0xff]  ;;  %vm3720_vm3 = vmmov %vm3719_vm2 }
 0x56d   : > { %vm3727_vm6 = vmmov %vm3719_vm2 }
 0x56e   : > { %v1489_v1 = vadd.f32 %v1487_v49, %v1479_v30  ;;  %v1490_v3 = vadd.f32 %v1488_v47, %v1480_v39  ;;  %v1655_v46 = vpop.permute.xlu0 %1654  ;;  %vm3728_vm7 = vmmov %vm3719_vm2 }
 0x570   : > { %v1499_v11 = vadd.f32 %v1497_v37, %v1489_v1  ;;  %v1500_v56 = vadd.f32 %v1498_v32, %v1490_v3 }
 0x572   : > { %v1538_v48 = vadd.f32 %v1534_v42, %v1500_v56  ;;  %v1537_v14 = vadd.f32 %v1533_v6, %v1499_v11  ;;  %v1740_v18 = vpop.permute.xlu2 %1739  ;;  %v3718_v11 = vld [vmem:[#allocation6_spill] sm:$0xff] }
 0x573   : > { %v1641_v29 = vpop.permute.xlu1 %1640 }
 0x574   : > { %v1569_v40 = vadd.f32 %v1565_v23, %v1538_v48  ;;  %v1568_v0 = vadd.f32 %v1564_v16, %v1537_v14  ;;  %v1644_v4 = vsel %vm3712_vm10, %v1639_v52, %v1641_v29  ;;  %v1645_v58 = vsel %vm3713_vm13, %v1641_v29, %v3459_v60 }
 0x576   : > { %v1599_v36 = vadd.f32 %v1595_v54, %v1568_v0  ;;  %v1600_v9 = vadd.f32 %v1596_v20, %v1569_v40  ;;  %v1736_v30 = vpop.permute.xlu0 %1735 }
 0x578   : > { %v1630_v8 = vadd.f32 %v1626_v2, %v1599_v36  ;;  %v1631_v10 = vadd.f32 %v1627_v61, %v1600_v9 }
 0x57a   : > { %v1720_v1 = vpop.permute.xlu2 %1719 }
 0x57b   : > { %v1657_v7 = vpop.permute.xlu1 %1656 }
 0x57c   : > { %v1660_v55 = vsel %vm3714_vm14, %v1655_v46, %v1657_v7  ;;  %v1661_v12 = vsel %vm3715_vm9, %v1657_v7, %v3477_v38  ;;  %v3717_v38 = vld [vmem:[#allocation9_spill] sm:$0xff] }
 0x57d   : > { %v1664_v45 = vsel %vm2821_vm15, %v1644_v4, %v1660_v55  ;;  %v1665_v15 = vsel %vm2800_vm12, %v1645_v58, %v1661_v12  ;;  %v3723_v58 = vld [vmem:[#allocation5_spill] sm:$0xff] }
 0x57e   : > { %v1673_v35 = vperm.slane %v1664_v45, 0  ;;  %v1674_v22 = vperm.slane %v1665_v15, 0  ;;  %v1683_v57 = vperm.slane %v1664_v45, 1  ;;  %v1684_v60 = vperm.slane %v1665_v15, 1  ;;  %v1928_v61 = vpop.permute.xlu0 %1927 }
 0x57f   : > { %v1693_v21 = vperm.slane %v1664_v45, 2  ;;  %v1694_v37 = vperm.slane %v1665_v15, 2  ;;  %v1703_v42 = vperm.slane %v1664_v45, 3  ;;  %v1704_v48 = vperm.slane %v1665_v15, 3 }
 0x580   : > { %v1675_v33 = vmul.f32 %v1673_v35, %v3716_v5  ;;  %v1676_v52 = vmul.f32 %v1674_v22, %v3716_v5  ;;  %v1685_v39 = vmul.f32 %v1683_v57, %v3717_v38  ;;  %v1686_v47 = vmul.f32 %v1684_v60, %v3717_v38  ;;  %v3724_v60 = vld [vmem:[#allocation8_spill] sm:$0xff] }
 0x581   : > { %v1695_v56 = vmul.f32 %v1693_v21, %v3718_v11  ;;  %v1696_v6 = vmul.f32 %v1694_v37, %v3718_v11  ;;  %v1705_v20 = vmul.f32 %v1703_v42, %v3299_v53  ;;  %v1706_v36 = vmul.f32 %v1704_v48, %v3299_v53 }
 0x582   : > { %v1677_v51 = vadd.f32 %v1675_v33, %v1630_v8  ;;  %v1678_v19 = vadd.f32 %v1676_v52, %v1631_v10  ;;  %v1932_v53 = vpop.permute.xlu2 %1931 }
 0x583   : > { %v1722_v49 = vpop.permute.xlu1 %1721 }
 0x584   : > { %v1687_v3 = vadd.f32 %v1685_v39, %v1677_v51  ;;  %v1688_v32 = vadd.f32 %v1686_v47, %v1678_v19  ;;  %v1725_v29 = vsel %vm3719_vm2, %v1720_v1, %v1722_v49  ;;  %v1726_v40 = vsel %vm3720_vm3, %v1722_v49, %v1724_v13 }
 0x586   : > { %v1697_v14 = vadd.f32 %v1695_v56, %v1687_v3  ;;  %v1698_v16 = vadd.f32 %v1696_v6, %v1688_v32  ;;  %v1944_v47 = vpop.permute.xlu0 %1943 }
 0x588   : > { %v1707_v13 = vadd.f32 %v1705_v20, %v1697_v14  ;;  %v1708_v4 = vadd.f32 %v1706_v36, %v1698_v16 }
 0x58a   : > { %v1948_v3 = vpop.permute.xlu2 %1947 }
 0x58b   : > { %v1738_v23 = vpop.permute.xlu1 %1737 }
 0x58c   : > { %v1741_v0 = vsel %vm3721_vm4, %v1736_v30, %v1738_v23  ;;  %v1742_v54 = vsel %vm3722_vm5, %v1738_v23, %v1740_v18 }
 0x58d   : > { %v1745_v9 = vsel %vm2743_vm8, %v1725_v29, %v1741_v0  ;;  %v1746_v2 = vsel %vm2762_vm11, %v1726_v40, %v1742_v54  ;;  %vm3725_vm8 = vmmov %vm3721_vm4  ;;  %v1915_v40 = vsel %vm912_vm0, %v3503_v59, %v3497_v24 }
 0x58e   : > { %v1754_v8 = vperm.slane %v1745_v9, 0  ;;  %v1755_v10 = vperm.slane %v1746_v2, 0  ;;  %v1764_v46 = vperm.slane %v1745_v9, 1  ;;  %v1765_v7 = vperm.slane %v1746_v2, 1  ;;  %vm3726_vm11 = vmmov %vm3721_vm4 }
 0x58f   : > { %v1774_v18 = vperm.slane %v1745_v9, 2  ;;  %v1775_v45 = vperm.slane %v1746_v2, 2  ;;  %v1784_v15 = vperm.slane %v1745_v9, 3  ;;  %v1785_v17 = vperm.slane %v1746_v2, 3 }
 0x590   : > { %v1756_v55 = vmul.f32 %v1754_v8, %v3723_v58  ;;  %v1757_v12 = vmul.f32 %v1755_v10, %v3723_v58  ;;  %v1766_v63 = vmul.f32 %v1764_v46, %v3268_v62  ;;  %v1767_v5 = vmul.f32 %v1765_v7, %v3268_v62 }
 0x591   : > { %v1776_v51 = vmul.f32 %v1774_v18, %v3724_v60  ;;  %v1777_v19 = vmul.f32 %v1775_v45, %v3724_v60  ;;  %v1786_v38 = vmul.f32 %v1784_v15, %v3286_v31  ;;  %v1787_v39 = vmul.f32 %v1785_v17, %v3286_v31 }
 0x592   : > { %v1758_v35 = vadd.f32 %v1756_v55, %v1707_v13  ;;  %v1759_v22 = vadd.f32 %v1757_v12, %v1708_v4  ;;  %v1980_v46 = vpop.permute.xlu2 %1979 }
 0x593   : > { %v1930_v33 = vpop.permute.xlu1 %1929 }
 0x594   : > { %v1768_v52 = vadd.f32 %v1766_v63, %v1758_v35  ;;  %v1769_v57 = vadd.f32 %v1767_v5, %v1759_v22  ;;  %v1933_v32 = vsel %vm3725_vm8, %v1928_v61, %v1930_v33  ;;  %v1934_v11 = vsel %vm3726_vm11, %v1930_v33, %v1932_v53  ;;  %v3729_v5 = vld [vmem:[#allocation7_spill] sm:$0xff] }
 0x596   : > { %v1778_v49 = vadd.f32 %v1776_v51, %v1768_v52  ;;  %v1779_v30 = vadd.f32 %v1777_v19, %v1769_v57 }
 0x598   : > { %v1788_v21 = vadd.f32 %v1786_v38, %v1778_v49  ;;  %v1789_v37 = vadd.f32 %v1787_v39, %v1779_v30 }
 0x59a   : > { %v1826_v1 = vadd.f32 %v3395_v28, %v1788_v21  ;;  %v1827_v62 = vadd.f32 %v3381_v41, %v1789_v37 }
 0x59b   : > { %v1946_v56 = vpop.permute.xlu1 %1945 }
 0x59c   : > { %v1949_v6 = vsel %vm3727_vm6, %v1944_v47, %v1946_v56  ;;  %v1950_v42 = vsel %vm3728_vm7, %v1946_v56, %v1948_v3  ;;  %v1857_v48 = vadd.f32 %v3405_v34, %v1826_v1  ;;  %v1858_v31 = vadd.f32 %v3390_v50, %v1827_v62  ;;  %v1960_v34 = vpop.permute.xlu0 %1959 }
 0x59d   : > { %v1953_v14 = vsel %vm2821_vm15, %v1933_v32, %v1949_v6  ;;  %v1954_v41 = vsel %vm2800_vm12, %v1934_v11, %v1950_v42  ;;  %v1916_v50 = vsel %vm912_vm0, %v3497_v24, %v3465_v25 }
 0x59e   : > { %v1962_v28 = vperm.slane %v1953_v14, 0  ;;  %v1963_v16 = vperm.slane %v1954_v41, 0  ;;  %v1888_v23 = vadd.f32 %v3411_v43, %v1857_v48  ;;  %v1889_v29 = vadd.f32 %v3400_v44, %v1858_v31  ;;  %v2207_v31 = vld [vmem:[%s2282_s22] sm:$0xff] }
 0x59f   : > { %v1972_v26 = vperm.slane %v1953_v14, 1  ;;  %v1973_v0 = vperm.slane %v1954_v41, 1  ;;  %v1982_v61 = vperm.slane %v1953_v14, 2  ;;  %v1983_v44 = vperm.slane %v1954_v41, 2 }
 0x5a0   : > { %v1919_v27 = vadd.f32 %v1915_v40, %v1888_v23  ;;  %v1920_v20 = vadd.f32 %v1916_v50, %v1889_v29  ;;  %v1964_v36 = vmul.f32 %v1962_v28, %v1960_v34  ;;  %v1965_v9 = vmul.f32 %v1963_v16, %v1960_v34 }
 0x5a1   : > { %v1984_v13 = vmul.f32 %v1982_v61, %v1980_v46  ;;  %v1985_v4 = vmul.f32 %v1983_v44, %v1980_v46  ;;  %v1992_v25 = vperm.slane %v1953_v14, 3  ;;  %v1993_v24 = vperm.slane %v1954_v41, 3 }
 0x5a2   : > { %v1966_v8 = vadd.f32 %v1964_v36, %v1919_v27  ;;  %v1967_v10 = vadd.f32 %v1965_v9, %v1920_v20 }
 0x5a3   : > { %v1970_v54 = vpop.permute.xlu1 %1969 }
 0x5a4   : > { %v1974_v2 = vmul.f32 %v1972_v26, %v1970_v54  ;;  %v1975_v43 = vmul.f32 %v1973_v0, %v1970_v54 }
 0x5a6   : > { %v1976_v59 = vadd.f32 %v1974_v2, %v1966_v8  ;;  %v1977_v7 = vadd.f32 %v1975_v43, %v1967_v10 }
 0x5a8   : > { %v1986_v55 = vadd.f32 %v1984_v13, %v1976_v59  ;;  %v1987_v12 = vadd.f32 %v1985_v4, %v1977_v7 }
 0x5ac   : > { %v1990_v58 = vpop.permute.xlu1 %1989 }
 0x5ad   : > { %v1994_v18 = vmul.f32 %v1992_v25, %v1990_v58  ;;  %v1995_v45 = vmul.f32 %v1993_v24, %v1990_v58 }
 0x5af   : > { %v1996_v53 = vadd.f32 %v1994_v18, %v1986_v55  ;;  %v1997_v15 = vadd.f32 %v1995_v45, %v1987_v12 }
 0x5b1   : > { %v1998_v17 = vsel %vm1089_vm1, %v1996_v53, 0.0  ;;  %v1999_v35 = vsel %vm1089_vm1, %v1997_v15, 0.0 }
 0x5b2   : > { %v2000_v22 = vadd.f32 %v1999_v35, %v1998_v17 }
 0x5b4   : > { %2001 = vadd.xlane.f32.xlu2 %v2000_v22 }
 0x627   : > { %v2002_v63 = vpop.xlane.xlu2 %2001 }
 0x628   : > { %v2003_v33 = vmul.f32 %v2002_v63, %v3729_v5 }
 0x62a   : > { %v2004_v52 = vsub.f32 %v1996_v53, %v2003_v33  ;;  %v2005_v57 = vsub.f32 %v1997_v15, %v2003_v33 }
 0x62c   : > { %v2006_v60 = vmul.f32 %v2004_v52, %v2004_v52  ;;  %v2007_v51 = vmul.f32 %v2005_v57, %v2005_v57 }
 0x62e   : > { %v2008_v19 = vsel %vm1089_vm1, %v2006_v60, 0.0  ;;  %v2009_v49 = vsel %vm1089_vm1, %v2007_v51, 0.0 }
 0x62f   : > { %v2010_v30 = vadd.f32 %v2009_v49, %v2008_v19 }
 0x631   : > { %2011 = vadd.xlane.f32.xlu0 %v2010_v30 }
 0x6a4   : > { %v2012_v38 = vpop.xlane.xlu0 %2011 }
 0x6a5   : > { %v2013_v39 = vmul.f32 %v2012_v38, %v3729_v5 }
 0x6a7   : > { %v2014_v47 = vadd.f32 1e-05, %v2013_v39 }
 0x6a9   : > { %2205 = vrsqrt.f32 %v2014_v47  ;;  %vm2021_vm15 = vweird.f32 %v2014_v47 }
 0x6af   : > { %v2206_v21 = vpop.eup %2205 }
 0x6b0   : > { %v2016_v37 = vmul.f32 %v2206_v21, %v2014_v47  ;;  %vm2022_vm12 = vweird.f32 %v2206_v21 }
 0x6b1   : > { %vm2023_vm0 = vmor %vm2021_vm15, %vm2022_vm12 }
 0x6b2   : > { %v2017_v1 = vmul.f32 %v2206_v21, %v2016_v37 }
 0x6b4   : > { %v2018_v62 = vmul.f32 0.5, %v2017_v1 }
 0x6b6   : > { %v2019_v3 = vsub.f32 1.5, %v2018_v62 }
 0x6b8   : > { %v2020_v32 = vmul.f32 %v2206_v21, %v2019_v3 }
 0x6ba   : > { %v2024_v11 = vsel %vm2023_vm0, %v2206_v21, %v2020_v32 }
 0x6bb   : > { %v2026_v56 = vmul.f32 %v2024_v11, %v2005_v57  ;;  %v2025_v6 = vmul.f32 %v2024_v11, %v2004_v52 }
 0x6bd   : > { %v2029_v42 = vrot.slane %v2026_v56, 4 }
 0x6bf   : > { %v2030_v48 = vsel %vm1089_vm1, %v2025_v6, %v2029_v42 }
 0x6c0   : > { %v2032_v14 = vadd.f32 %v2207_v31, %v2030_v48 }
 0x6c2   : > { %2033 = vst [vmem:[%s197_s17] sm:$0xff] %v2032_v14 }
 0x6c3 PF: > { %s14_s15 = sadd.s32 1, %s2214_s15  }
 0x6c4   : > { %p11_p4 = scmp.ge.s32.totalorder %s14_s15, 4  }
 0x6c6   :  { %13 = sbr.rel (!%p11_p4) target bundleno = 1 (0x1), region = 102 }

</bundles_post_ra>
